<compile_context>
chip_gen: v7x
topology: tpu7x:2x2x1
jax: 0.10.0
libtpu: 0.0.40
codegen_flags: <defaults>
</compile_context>

<pallas_src>
import functools

import jax
import jax.numpy as jnp
from jax.experimental import pallas as pl
from jax.experimental.pallas import tpu as pltpu

NUM_CLASSES = 3
HEAD_CHANNELS = (
    ("hm", NUM_CLASSES),
    ("center", 2),
    ("center_z", 1),
    ("dim", 3),
    ("rot", 2),
    ("iou", 1),
)
TOTAL_HEAD = sum(c for _, c in HEAD_CHANNELS)  # 12
HEAD_PAD = 16  # pad head-channel dim to a full sublane tile (unmasked stores)


def _round_up(x, m):
    return (x + m - 1) // m * m


# ------------------------------- kernel -------------------------------------

def _fused_head_kernel(x_ref, w1_ref, b1_ref, w2_ref, b2_ref, o_ref, *, wp, ltot):
    """Fused 3x3 conv (+bias+ReLU) and 1x1 head conv (+sigmoid on hm rows).

    x_ref : (C, Lin)           bf16 zero-padded bev map(s), all batches laid out
                               contiguously along lanes with per-batch stride lp
                               (row stride wp, wp % 128 == 0), plus 3*wp tail pad.
    w1_ref: (hidden, 9*C)      bf16, column order = (kh*3 + kw)*C + c_in
    b1_ref: (hidden, 1)        f32
    w2_ref: (HEAD_PAD, hidden) bf16 (rows >= TOTAL_HEAD are zero)
    b2_ref: (HEAD_PAD, 1)      f32
    o_ref : (HEAD_PAD, ltot)   f32; only the first H*wp lanes (cols < W) of each
                               per-batch lp block are meaningful.
    """
    x = x_ref[...]                                  # (C, Lin) bf16
    win = ltot + 2 * wp

    # Only the 3 kw shifts (lane offsets 0/1/2) need cross-lane work; the kh row
    # shifts below are multiples of wp (== multiples of 128) -> vreg-aligned.
    pieces = [None] * 9
    for kw in range(3):
        shifted = x[:, kw:kw + win]                 # (C, ltot + 2*wp)
        for kh in range(3):
            pieces[kh * 3 + kw] = shifted[:, kh * wp:kh * wp + ltot]

    # im2col stack along sublanes -> one K = 9*C GEMM on the MXU.
    stacked = jnp.concatenate(pieces, axis=0)       # (9*C, ltot) bf16

    feat = jnp.dot(w1_ref[...], stacked, preferred_element_type=jnp.float32)
    feat = jnp.maximum(feat + b1_ref[...], 0.0).astype(jnp.bfloat16)

    heads = jnp.dot(w2_ref[...], feat, preferred_element_type=jnp.float32)
    heads = heads + b2_ref[...]

    # sigmoid only on the heatmap rows (first NUM_CLASSES output channels)
    row = jax.lax.broadcasted_iota(jnp.int32, heads.shape, 0)
    o_ref[...] = jnp.where(row < NUM_CLASSES, jax.nn.sigmoid(heads), heads)


# ------------------------------- glue ---------------------------------------

def init_params(key, c_in=4, hidden=32):
    k1, k2, k3, k4 = jax.random.split(key, 4)
    return {
        # shared 3x3 conv stored as [kh, kw, c_in, hidden] (HWIO).
        # NOTE: real PyTorch OIHW conv weights must be permuted to this layout.
        "w_shared": 0.1 * jax.random.normal(k1, (3, 3, c_in, hidden), jnp.float32),
        "b_shared": 0.01 * jax.random.normal(k2, (hidden,), jnp.float32),
        # fused 1x1 head conv: all heads concatenated along output channels
        "w_head": 0.1 * jax.random.normal(k3, (hidden, TOTAL_HEAD), jnp.float32),
        "b_head": 0.01 * jax.random.normal(k4, (TOTAL_HEAD,), jnp.float32),
    }


@jax.jit
def export_model_forward(params, bev_map):
    """bev_map: NCHW [B, C, H, W] -> tuple(hm, center, center_z, dim, rot, iou),
    each NCHW [B, c_head, H, W] (matching the PyTorch ExportModel outputs)."""
    B, C, H, W = bev_map.shape
    hidden = params["w_shared"].shape[-1]

    # Flattened-spatial layout: row stride wp is a multiple of 128 so row (kh)
    # shifts are vreg-aligned and input/output lanes are dense; 1 halo row on
    # top and bottom of each batch block; all batches concatenated along lanes
    # (per-batch stride lp), plus a 3*wp tail pad so shifted reads stay in range.
    wp = _round_up(W + 2, 128)
    hp = H + 2
    lp = hp * wp
    ltot = B * lp
    lin = ltot + 3 * wp

    xp = jnp.pad(bev_map, ((0, 0), (0, 0), (1, 1), (1, wp - W - 1)))  # (B,C,hp,wp)
    xp = jnp.transpose(xp, (1, 0, 2, 3)).reshape(C, ltot)
    xp = jnp.pad(xp, ((0, 0), (0, lin - ltot))).astype(jnp.bfloat16)
    # TODO(synk): at real BEV sizes produce the backbone output already
    # bf16/padded (or cast + halo-zero in-kernel) to avoid this extra HBM pass.

    # Weight layouts (bf16 MXU inputs, channels-on-sublane GEMMs).
    w1 = jnp.transpose(params["w_shared"], (3, 0, 1, 2)).reshape(hidden, 9 * C)
    w1 = w1.astype(jnp.bfloat16)                                   # (hidden, 9*C)
    b1 = params["b_shared"].reshape(hidden, 1).astype(jnp.float32)
    w2 = jnp.zeros((HEAD_PAD, hidden), jnp.float32)
    w2 = w2.at[:TOTAL_HEAD].set(params["w_head"].T).astype(jnp.bfloat16)
    b2 = jnp.zeros((HEAD_PAD, 1), jnp.float32)
    b2 = b2.at[:TOTAL_HEAD, 0].set(params["b_head"])

    kernel = functools.partial(_fused_head_kernel, wp=wp, ltot=ltot)

    out = pl.pallas_call(
        kernel,
        out_shape=jax.ShapeDtypeStruct((HEAD_PAD, ltot), jnp.float32),
        grid=(1,),  # batch folded along lanes -> single step (no per-step overhead)
        in_specs=[
            pl.BlockSpec((C, lin), lambda i: (0, 0)),
            pl.BlockSpec((hidden, 9 * C), lambda i: (0, 0)),
            pl.BlockSpec((hidden, 1), lambda i: (0, 0)),
            pl.BlockSpec((HEAD_PAD, hidden), lambda i: (0, 0)),
            pl.BlockSpec((HEAD_PAD, 1), lambda i: (0, 0)),
        ],
        out_specs=pl.BlockSpec((HEAD_PAD, ltot), lambda i: (0, 0)),
        compiler_params=pltpu.CompilerParams(
            dimension_semantics=("arbitrary",),
            vmem_limit_bytes=32 * 1024 * 1024,   # far above actual use; v7x-safe
        ),
    )(xp, w1, b1, w2, b2)

    # (HEAD_PAD, B*hp*wp) -> (B, HEAD_PAD, hp, wp) -> drop halo/garbage -> NCHW.
    heads = out.reshape(HEAD_PAD, B, hp, wp)
    heads = jnp.transpose(heads, (1, 0, 2, 3))[:, :TOTAL_HEAD, :H, :W]

    outs = {}
    start = 0
    for name, c in HEAD_CHANNELS:
        outs[name] = heads[:, start:start + c]
        start += c
    return (outs["hm"], outs["center"], outs["center_z"],
            outs["dim"], outs["rot"], outs["iou"])


# --------------------------- pure-jnp reference ------------------------------

def _reference_forward(params, bev_map):
    """f32 reference using the same bf16-cast inputs, for validation."""
    B, C, H, W = bev_map.shape
    hidden = params["w_shared"].shape[-1]
    x = bev_map.astype(jnp.bfloat16).astype(jnp.float32)
    xp = jnp.pad(x, ((0, 0), (0, 0), (1, 1), (1, 1)))
    taps = []
    for kh in range(3):
        for kw in range(3):
            taps.append(xp[:, :, kh:kh + H, kw:kw + W])
    taps = jnp.stack(taps, axis=1)                                   # [B,9,C,H,W]
    w1 = jnp.transpose(params["w_shared"], (0, 1, 3, 2)).reshape(9, hidden, C)
    w1 = w1.astype(jnp.bfloat16).astype(jnp.float32)
    feat = jnp.einsum("toc,btchw->bohw", w1, taps)
    feat = feat + params["b_shared"].reshape(1, hidden, 1, 1)
    feat = jnp.maximum(feat, 0.0).astype(jnp.bfloat16).astype(jnp.float32)
    w2 = params["w_head"].T.astype(jnp.bfloat16).astype(jnp.float32)
    heads = jnp.einsum("do,bohw->bdhw", w2, feat)
    heads = heads + params["b_head"].reshape(1, TOTAL_HEAD, 1, 1)
    hm = jax.nn.sigmoid(heads[:, :NUM_CLASSES])
    heads = jnp.concatenate([hm, heads[:, NUM_CLASSES:]], axis=1)
    outs, start = [], 0
    for _, c in HEAD_CHANNELS:
        outs.append(heads[:, start:start + c])
        start += c
    return tuple(outs)


if __name__ == "__main__":
    key = jax.random.PRNGKey(0)
    pkey, xkey = jax.random.split(key)

    B, C, H, W = 2, 4, 16, 16
    params = init_params(pkey, c_in=C, hidden=32)
    bev_map = jax.random.normal(xkey, (B, C, H, W), jnp.float32)

    outs = export_model_forward(params, bev_map)
    jax.block_until_ready(outs)
    hm, center, center_z, dim, rot, iou = outs

    assert hm.shape == (B, NUM_CLASSES, H, W)
    assert center.shape == (B, 2, H, W)
    assert center_z.shape == (B, 1, H, W)
    assert dim.shape == (B, 3, H, W)
    assert rot.shape == (B, 2, H, W)
    assert iou.shape == (B, 1, H, W)

    refs = _reference_forward(params, bev_map)
    for got, want in zip(outs, refs):
        err = float(jnp.max(jnp.abs(got - want)))
        assert bool(jnp.allclose(got, want, atol=3e-2, rtol=3e-2)), err

    print("KERNEL_OK")
</pallas_src>

<mosaic_0001>
module attributes {stable_mosaic.version = 11 : i64} {
  func.func @_fused_head_kernel(%arg0: i32, %arg1: memref<4x4992xbf16, #tpu.memory_space<vmem>>, %arg2: memref<32x36xbf16, #tpu.memory_space<vmem>>, %arg3: memref<32x1xf32, #tpu.memory_space<vmem>>, %arg4: memref<16x32xbf16, #tpu.memory_space<vmem>>, %arg5: memref<16x1xf32, #tpu.memory_space<vmem>>, %arg6: memref<16x4608xf32, #tpu.memory_space<vmem>>) attributes {dimension_semantics = [#tpu.dimension_semantics<arbitrary>], iteration_bounds = array<i64: 1>, scalar_prefetch = 0 : i64, scratch_operands = 0 : i64, tpu.core_type = #tpu.core_type<tc>, window_params = [{pipeline_mode = #tpu.pipeline_mode<synchronous>, transform_indices = @transform_0, window_bounds = array<i64: 4, 4992>}, {pipeline_mode = #tpu.pipeline_mode<synchronous>, transform_indices = @transform_1, window_bounds = array<i64: 32, 36>}, {pipeline_mode = #tpu.pipeline_mode<synchronous>, transform_indices = @transform_2, window_bounds = array<i64: 32, 1>}, {pipeline_mode = #tpu.pipeline_mode<synchronous>, transform_indices = @transform_3, window_bounds = array<i64: 16, 32>}, {pipeline_mode = #tpu.pipeline_mode<synchronous>, transform_indices = @transform_4, window_bounds = array<i64: 16, 1>}, {pipeline_mode = #tpu.pipeline_mode<synchronous>, transform_indices = @transform_5, window_bounds = array<i64: 16, 4608>}]} {
    %c0 = arith.constant 0 : index
    %c0_0 = arith.constant 0 : index
    %0 = vector.load %arg1[%c0, %c0_0] : memref<4x4992xbf16, #tpu.memory_space<vmem>>, vector<4x4992xbf16>
    %1 = vector.extract_strided_slice %0 {offsets = [0, 0], sizes = [4, 4864], strides = [1, 1]} : vector<4x4992xbf16> to vector<4x4864xbf16>
    %2 = vector.extract_strided_slice %1 {offsets = [0, 0], sizes = [4, 4608], strides = [1, 1]} : vector<4x4864xbf16> to vector<4x4608xbf16>
    %3 = vector.extract_strided_slice %1 {offsets = [0, 128], sizes = [4, 4608], strides = [1, 1]} : vector<4x4864xbf16> to vector<4x4608xbf16>
    %4 = vector.extract_strided_slice %1 {offsets = [0, 256], sizes = [4, 4608], strides = [1, 1]} : vector<4x4864xbf16> to vector<4x4608xbf16>
    %5 = vector.extract_strided_slice %0 {offsets = [0, 1], sizes = [4, 4864], strides = [1, 1]} : vector<4x4992xbf16> to vector<4x4864xbf16>
    %6 = vector.extract_strided_slice %5 {offsets = [0, 0], sizes = [4, 4608], strides = [1, 1]} : vector<4x4864xbf16> to vector<4x4608xbf16>
    %7 = vector.extract_strided_slice %5 {offsets = [0, 128], sizes = [4, 4608], strides = [1, 1]} : vector<4x4864xbf16> to vector<4x4608xbf16>
    %8 = vector.extract_strided_slice %5 {offsets = [0, 256], sizes = [4, 4608], strides = [1, 1]} : vector<4x4864xbf16> to vector<4x4608xbf16>
    %9 = vector.extract_strided_slice %0 {offsets = [0, 2], sizes = [4, 4864], strides = [1, 1]} : vector<4x4992xbf16> to vector<4x4864xbf16>
    %10 = vector.extract_strided_slice %9 {offsets = [0, 0], sizes = [4, 4608], strides = [1, 1]} : vector<4x4864xbf16> to vector<4x4608xbf16>
    %11 = vector.extract_strided_slice %9 {offsets = [0, 128], sizes = [4, 4608], strides = [1, 1]} : vector<4x4864xbf16> to vector<4x4608xbf16>
    %12 = vector.extract_strided_slice %9 {offsets = [0, 256], sizes = [4, 4608], strides = [1, 1]} : vector<4x4864xbf16> to vector<4x4608xbf16>
    %13 = tpu.concatenate %2, %6, %10, %3, %7, %11, %4, %8, %12 in 0 : vector<4x4608xbf16>, vector<4x4608xbf16>, vector<4x4608xbf16>, vector<4x4608xbf16>, vector<4x4608xbf16>, vector<4x4608xbf16>, vector<4x4608xbf16>, vector<4x4608xbf16>, vector<4x4608xbf16> -> vector<36x4608xbf16>
    %c0_1 = arith.constant 0 : index
    %c0_2 = arith.constant 0 : index
    %14 = vector.load %arg2[%c0_1, %c0_2] : memref<32x36xbf16, #tpu.memory_space<vmem>>, vector<32x36xbf16>
    %cst = arith.constant dense<0.000000e+00> : vector<32x4608xf32>
    %15 = tpu.matmul %14, %13, %cst {dimension_numbers = #tpu.dot_dimension_numbers<[1], [0], [0], [1], [0, 0, 1, 1], [], []>} : vector<32x36xbf16>, vector<36x4608xbf16>, vector<32x4608xf32> -> vector<32x4608xf32>
    %c0_3 = arith.constant 0 : index
    %c0_4 = arith.constant 0 : index
    %16 = vector.load %arg3[%c0_3, %c0_4] : memref<32x1xf32, #tpu.memory_space<vmem>>, vector<32x1xf32>
    %17 = vector.broadcast %16 : vector<32x1xf32> to vector<32x4608xf32>
    %18 = arith.addf %15, %17 : vector<32x4608xf32>
    %cst_5 = arith.constant 0.000000e+00 : f32
    %19 = vector.broadcast %cst_5 : f32 to vector<32x4608xf32>
    %20 = arith.maximumf %18, %19 : vector<32x4608xf32>
    %21 = arith.truncf %20 : vector<32x4608xf32> to vector<32x4608xbf16>
    %c0_6 = arith.constant 0 : index
    %c0_7 = arith.constant 0 : index
    %22 = vector.load %arg4[%c0_6, %c0_7] : memref<16x32xbf16, #tpu.memory_space<vmem>>, vector<16x32xbf16>
    %cst_8 = arith.constant dense<0.000000e+00> : vector<16x4608xf32>
    %23 = tpu.matmul %22, %21, %cst_8 {dimension_numbers = #tpu.dot_dimension_numbers<[1], [0], [0], [1], [0, 0, 1, 1], [], []>} : vector<16x32xbf16>, vector<32x4608xbf16>, vector<16x4608xf32> -> vector<16x4608xf32>
    %c0_9 = arith.constant 0 : index
    %c0_10 = arith.constant 0 : index
    %24 = vector.load %arg5[%c0_9, %c0_10] : memref<16x1xf32, #tpu.memory_space<vmem>>, vector<16x1xf32>
    %25 = vector.broadcast %24 : vector<16x1xf32> to vector<16x4608xf32>
    %26 = arith.addf %23, %25 : vector<16x4608xf32>
    %27 = tpu.iota {dimensions = array<i32: 0>} : vector<16x4608xi32>
    %c3_i32 = arith.constant 3 : i32
    %28 = vector.broadcast %c3_i32 : i32 to vector<16x4608xi32>
    %29 = arith.cmpi slt, %27, %28 : vector<16x4608xi32>
    %30 = arith.negf %26 : vector<16x4608xf32>
    %31 = math.exp %30 : vector<16x4608xf32>
    %cst_11 = arith.constant 1.000000e+00 : f32
    %32 = vector.broadcast %cst_11 : f32 to vector<16x4608xf32>
    %33 = arith.addf %32, %31 : vector<16x4608xf32>
    %34 = arith.divf %32, %33 : vector<16x4608xf32>
    %35 = arith.select %29, %34, %26 : vector<16x4608xi1>, vector<16x4608xf32>
    %c0_12 = arith.constant 0 : index
    %c0_13 = arith.constant 0 : index
    %36 = vector.load %arg6[%c0_12, %c0_13] : memref<16x4608xf32, #tpu.memory_space<vmem>>, vector<16x4608xf32>
    tpu.vector_store %arg6[%c0_12, %c0_13], %35 {strides = array<i32>} : memref<16x4608xf32, #tpu.memory_space<vmem>>, vector<16x4608xf32>,
    return
  }
  func.func @transform_0(%arg0: i32) -> (i32, i32) {
    %c0_i32 = arith.constant 0 : i32
    %c0_i32_0 = arith.constant 0 : i32
    %c0_i32_1 = arith.constant 0 : i32
    return %c0_i32, %c0_i32_0 : i32, i32
  }
  func.func @transform_1(%arg0: i32) -> (i32, i32) {
    %c0_i32 = arith.constant 0 : i32
    %c0_i32_0 = arith.constant 0 : i32
    %c0_i32_1 = arith.constant 0 : i32
    return %c0_i32, %c0_i32_0 : i32, i32
  }
  func.func @transform_2(%arg0: i32) -> (i32, i32) {
    %c0_i32 = arith.constant 0 : i32
    %c0_i32_0 = arith.constant 0 : i32
    %c0_i32_1 = arith.constant 0 : i32
    return %c0_i32, %c0_i32_0 : i32, i32
  }
  func.func @transform_3(%arg0: i32) -> (i32, i32) {
    %c0_i32 = arith.constant 0 : i32
    %c0_i32_0 = arith.constant 0 : i32
    %c0_i32_1 = arith.constant 0 : i32
    return %c0_i32, %c0_i32_0 : i32, i32
  }
  func.func @transform_4(%arg0: i32) -> (i32, i32) {
    %c0_i32 = arith.constant 0 : i32
    %c0_i32_0 = arith.constant 0 : i32
    %c0_i32_1 = arith.constant 0 : i32
    return %c0_i32, %c0_i32_0 : i32, i32
  }
  func.func @transform_5(%arg0: i32) -> (i32, i32) {
    %c0_i32 = arith.constant 0 : i32
    %c0_i32_0 = arith.constant 0 : i32
    %c0_i32_1 = arith.constant 0 : i32
    return %c0_i32, %c0_i32_0 : i32, i32
  }
}

</mosaic_0001>

<bundles_post_ra>
// kernel: export_model_forward.1
= control target key start
LH: loop header
LB: loop body
LE: loop exit
PB: predicated region body
PF: predicated region fallthrough
CT: control target
= control target key end

     0   :  { %v44_v0 = vlaneseq  ;;  %v4392_v2 = vmov 1983009808   ;;  %s4393_s22 = smov 127   ;;  %s4394_s23 = smov 126   ;;  %v4395_v28 = vmov 0   ;;  %vm364_vm0 = vcmask 1039360   ;;  %s6987_s0 = inlined_call_operand.vmem [shape: bf16[4,4992], index: 0, kind: input, shape index: {}]   ;;  %s6988_s1 = inlined_call_operand.vmem [shape: bf16[32,36], index: 1, kind: input, shape index: {}]   ;;  %s6989_s2 = inlined_call_operand.vmem [shape: f32[32,1], index: 2, kind: input, shape index: {}]   ;;  %s6990_s4 = inlined_call_operand.vmem [shape: f32[16,1], index: 4, kind: input, shape index: {}]   ;;  %s6991_s3 = inlined_call_operand.vmem [shape: bf16[16,32], index: 3, kind: input, shape index: {}]   ;;  %s6992_s5 = inlined_call_operand.vmem [shape: f32[16,4608], index: 5, kind: output, shape index: {}]  }
   0x1   :  { %v22_v1 = vld [vmem:[%s6987_s0 + $0x8] sm:$0xff]  ;;  %v42_v3 = vunpack.c.l.s4 %v4392_v2  ;;  %v21_v7 = vld [vmem:[%s6987_s0] sm:$0xff]  ;;  %v23_v27 = vld [vmem:[%s6987_s0 + $0x10] sm:$0xff]  ;;  %1550 = vmatprep.mubr.bf16.mxu0 %v4395_v28  ;;  %1603 = vmatprep.mubr.bf16.mxu1 %v4395_v28  ;;  %vm494_vm1 = vcmask 1031168   ;;  %vm836_vm2 = vcmask 1041408   ;;  %vm945_vm3 = vcmask 1043456  }
   0x2   :  { %v4429_v4 = vshrl.u32 %v44_v0, 7  ;;  %v203_v6 = vcombine.low %v22_v1, %v22_v1  ;;  %v194_v9 = vcombine.low %v21_v7, %v21_v7  ;;  %v40_v13 = vcombine.high %v21_v7, %v21_v7  ;;  %4221 = vset.pattern.permute.xlu1 %v4395_v28  ;;  %4222 = vset.pattern.permute.xlu0 %v4395_v28  ;;  %v24_v40 = vld [vmem:[%s6987_s0 + $0x18] sm:$0xff]  ;;  %v4663_v52 = vld [vmem:[%s6987_s0 + $0x20] sm:$0xff] }
   0x3   :  { %v43_v5 = vunpack.c.0.s8 %v42_v3  ;;  %v57_v25 = vcombine.high %v22_v1, %v22_v1  ;;  %v212_v29 = vcombine.low %v23_v27, %v23_v27  ;;  %v74_v38 = vcombine.high %v23_v27, %v23_v27 }
   0x4   :  { %v221_v41 = vcombine.low %v24_v40, %v24_v40  ;;  %v91_v50 = vcombine.high %v24_v40, %v24_v40  ;;  %v230_v53 = vcombine.low %v4663_v52, %v4663_v52  ;;  %vm1018_vm4 = vcmask 1045504  }
   0x5   :  { %v4435_v8 = vsub.s32 %v43_v5, %v4429_v4  ;;  %vm1411_vm5 = vcmask 293888   ;;  %vm2707_vm6 = vcmask 261120   ;;  %vm3488_vm7 = vcmp.lt.s32.totalorder %v4429_v4, 3 }
   0x7   :  { %v4438_v10 = vrot.slane %v203_v6, %v4435_v8  ;;  %v4441_v11 = vrot.slane %v21_v7, %v4435_v8  ;;  %v4448_v12 = vrot.slane %v194_v9, %v4435_v8  ;;  %v4461_v16 = vrot.slane %v40_v13, %v4435_v8 }
   0x8   :  { %v4464_v17 = vrot.slane %v22_v1, %v4435_v8  ;;  %v4526_v26 = vrot.slane %v57_v25, %v4435_v8  ;;  %v4543_v30 = vrot.slane %v23_v27, %v4435_v8  ;;  %v4546_v31 = vrot.slane %v212_v29, %v4435_v8 }
   0x9   :  { %298 = vrot.lane.b32.xlu1 %v4438_v10, %s4393_s22  ;;  %294 = vrot.lane.b32.xlu0 %v4441_v11, %s4393_s22  ;;  %v202_v14 = vcombine.high %v4448_v12, %v4448_v12  ;;  %v4458_v15 = vcombine.high %v4441_v11, %v4441_v11  ;;  %v4471_v18 = vcombine.low %v4461_v16, %v4461_v16 }
   0xa   :  { %v4479_v19 = vcombine.low %v4441_v11, %v4441_v11  ;;  %v4483_v20 = vcombine.low %v4464_v17, %v4464_v17  ;;  %v4491_v21 = vcombine.high %v4464_v17, %v4464_v17  ;;  %v4499_v22 = vcombine.high %v4461_v16, %v4461_v16 }
   0xb   :  { %v211_v23 = vcombine.high %v4438_v10, %v4438_v10  ;;  %v4515_v24 = vcombine.low %v4438_v10, %v4438_v10  ;;  %v4550_v32 = vcombine.low %v4526_v26, %v4526_v26  ;;  %v4558_v33 = vcombine.low %v4543_v30, %v4543_v30 }
   0xc   :  { %v4566_v34 = vcombine.high %v4543_v30, %v4543_v30  ;;  %v4574_v35 = vcombine.high %v4526_v26, %v4526_v26  ;;  %v220_v36 = vcombine.high %v4546_v31, %v4546_v31  ;;  %v4584_v37 = vcombine.low %v4546_v31, %v4546_v31 }
   0xd   :  { %422 = vrot.lane.b32.xlu1 %v4441_v11, %s4394_s23  ;;  %290 = vrot.lane.b32.xlu0 %v4448_v12, %s4393_s22  ;;  %v4594_v39 = vrot.slane %v74_v38, %v4435_v8  ;;  %v4607_v42 = vrot.slane %v24_v40, %v4435_v8  ;;  %v4610_v43 = vrot.slane %v221_v41, %v4435_v8 }
   0xe   :  { %v4658_v51 = vrot.slane %v91_v50, %v4435_v8  ;;  %v4676_v54 = vrot.slane %v4663_v52, %v4435_v8  ;;  %v4679_v55 = vrot.slane %v230_v53, %v4435_v8 }
   0xf   :  { %v4614_v44 = vcombine.low %v4594_v39, %v4594_v39  ;;  %v4622_v45 = vcombine.low %v4607_v42, %v4607_v42  ;;  %v4630_v46 = vcombine.high %v4607_v42, %v4607_v42  ;;  %v4638_v47 = vcombine.high %v4594_v39, %v4594_v39 }
  0x10   :  { %v229_v48 = vcombine.high %v4610_v43, %v4610_v43  ;;  %v4648_v49 = vcombine.low %v4610_v43, %v4610_v43  ;;  %v4683_v56 = vcombine.low %v4658_v51, %v4658_v51  ;;  %v4695_v59 = vcombine.low %v4676_v54, %v4676_v54 }
  0x11   :  { %292 = vrot.lane.b32.xlu0 %v202_v14, %s4393_s22  ;;  %296 = vrot.lane.b32.xlu1 %v4458_v15, %s4393_s22  ;;  %v4705_v62 = vcombine.high %v4676_v54, %v4676_v54  ;;  %v4717_v2 = vcombine.high %v4658_v51, %v4658_v51  ;;  %v238_v6 = vcombine.high %v4679_v55, %v4679_v55 }
  0x12   :  { %v4725_v7 = vcombine.low %v4679_v55, %v4679_v55 }
  0x15   :  { %426 = vrot.lane.b32.xlu1 %v4461_v16, %s4394_s23  ;;  %424 = vrot.lane.b32.xlu0 %v4471_v18, %s4394_s23 }
  0x19   :  { %420 = vrot.lane.b32.xlu1 %v4479_v19, %s4394_s23  ;;  %428 = vrot.lane.b32.xlu0 %v4483_v20, %s4394_s23 }
  0x1d   :  { %304 = vrot.lane.b32.xlu1 %v4491_v21, %s4393_s22  ;;  %302 = vrot.lane.b32.xlu0 %v4464_v17, %s4393_s22 }
  0x21   :  { %541 = vrot.lane.b32.xlu0 %v4461_v16, %s4393_s22  ;;  %543 = vrot.lane.b32.xlu1 %v4499_v22, %s4393_s22 }
  0x25   :  { %612 = vrot.lane.b32.xlu0 %v4458_v15, %s4394_s23  ;;  %614 = vrot.lane.b32.xlu1 %v4438_v10, %s4394_s23 }
  0x29   :  { %616 = vrot.lane.b32.xlu0 %v211_v23, %s4394_s23  ;;  %610 = vrot.lane.b32.xlu1 %v202_v14, %s4394_s23 }
  0x2d   :  { %704 = vrot.lane.b32.xlu0 %v4515_v24, %s4393_s22  ;;  %706 = vrot.lane.b32.xlu1 %v4483_v20, %s4393_s22 }
  0x31   :  { %702 = vrot.lane.b32.xlu0 %v4479_v19, %s4393_s22  ;;  %430 = vrot.lane.b32.xlu1 %v4464_v17, %s4394_s23 }
  0x35   :  { %434 = vrot.lane.b32.xlu0 %v4526_v26, %s4394_s23  ;;  %618 = vrot.lane.b32.xlu1 %v4491_v21, %s4394_s23 }
  0x39   :  { %784 = vrot.lane.b32.xlu0 %v4499_v22, %s4394_s23  ;;  %300 = vrot.lane.b32.xlu1 %v211_v23, %s4393_s22 }
  0x3d   :  { %306 = vrot.lane.b32.xlu0 %v4546_v31, %s4393_s22  ;;  %432 = vrot.lane.b32.xlu1 %v4550_v32, %s4394_s23 }
  0x41   :  { %436 = vrot.lane.b32.xlu0 %v4558_v33, %s4394_s23  ;;  %310 = vrot.lane.b32.xlu1 %v4543_v30, %s4393_s22 }
  0x45   :  { %312 = vrot.lane.b32.xlu0 %v4566_v34, %s4393_s22  ;;  %545 = vrot.lane.b32.xlu1 %v4526_v26, %s4393_s22 }
  0x49   :  { %547 = vrot.lane.b32.xlu0 %v4574_v35, %s4393_s22  ;;  %620 = vrot.lane.b32.xlu1 %v4546_v31, %s4394_s23 }
  0x4d   :  { %622 = vrot.lane.b32.xlu0 %v220_v36, %s4394_s23  ;;  %708 = vrot.lane.b32.xlu1 %v4584_v37, %s4393_s22 }
  0x51   :  { %710 = vrot.lane.b32.xlu0 %v4558_v33, %s4393_s22  ;;  %438 = vrot.lane.b32.xlu1 %v4543_v30, %s4394_s23 }
  0x55   :  { %442 = vrot.lane.b32.xlu0 %v4594_v39, %s4394_s23  ;;  %624 = vrot.lane.b32.xlu1 %v4566_v34, %s4394_s23 }
  0x59   :  { %786 = vrot.lane.b32.xlu0 %v4574_v35, %s4394_s23  ;;  %308 = vrot.lane.b32.xlu1 %v220_v36, %s4393_s22 }
  0x5d   :  { %314 = vrot.lane.b32.xlu0 %v4610_v43, %s4393_s22  ;;  %440 = vrot.lane.b32.xlu1 %v4614_v44, %s4394_s23 }
  0x61   :  { %444 = vrot.lane.b32.xlu0 %v4622_v45, %s4394_s23  ;;  %318 = vrot.lane.b32.xlu1 %v4607_v42, %s4393_s22 }
  0x65   :  { %320 = vrot.lane.b32.xlu0 %v4630_v46, %s4393_s22  ;;  %549 = vrot.lane.b32.xlu1 %v4594_v39, %s4393_s22 }
  0x69   :  { %551 = vrot.lane.b32.xlu0 %v4638_v47, %s4393_s22  ;;  %626 = vrot.lane.b32.xlu1 %v4610_v43, %s4394_s23 }
  0x6d   :  { %628 = vrot.lane.b32.xlu0 %v229_v48, %s4394_s23  ;;  %712 = vrot.lane.b32.xlu1 %v4648_v49, %s4393_s22 }
  0x71   :  { %714 = vrot.lane.b32.xlu0 %v4622_v45, %s4393_s22  ;;  %446 = vrot.lane.b32.xlu1 %v4607_v42, %s4394_s23 }
  0x75   :  { %450 = vrot.lane.b32.xlu0 %v4658_v51, %s4394_s23  ;;  %630 = vrot.lane.b32.xlu1 %v4630_v46, %s4394_s23 }
  0x79   :  { %788 = vrot.lane.b32.xlu0 %v4638_v47, %s4394_s23  ;;  %316 = vrot.lane.b32.xlu1 %v229_v48, %s4393_s22 }
  0x7b   :  { %v4685_v57 = vpop.permute.xlu1 %298  ;;  %v4687_v58 = vpop.permute.xlu0 %294 }
  0x7d   :  { %322 = vrot.lane.b32.xlu0 %v4679_v55, %s4393_s22  ;;  %448 = vrot.lane.b32.xlu1 %v4683_v56, %s4394_s23 }
  0x7f   :  { %v4697_v60 = vpop.permute.xlu1 %422  ;;  %v291_v61 = vpop.permute.xlu0 %290 }
  0x81   :  { %452 = vrot.lane.b32.xlu0 %v4695_v59, %s4394_s23  ;;  %326 = vrot.lane.b32.xlu1 %v4676_v54, %s4393_s22 }
  0x83   :  { %v293_v63 = vpop.permute.xlu0 %292  ;;  %v4707_v0 = vpop.permute.xlu1 %296 }
  0x84   :  { %v366_v1 = vsel %vm364_vm0, %v293_v63, %v4687_v58  ;;  %v365_v9 = vsel %vm364_vm0, %v291_v61, %v293_v63  ;;  %v367_v13 = vsel %vm364_vm0, %v4687_v58, %v4707_v0  ;;  %v368_v25 = vsel %vm364_vm0, %v4707_v0, %v4685_v57 }
  0x85   :  { %328 = vrot.lane.b32.xlu0 %v4705_v62, %s4393_s22  ;;  %553 = vrot.lane.b32.xlu1 %v4658_v51, %s4393_s22  ;;  %v842_v23 = vsel %vm836_vm2, %v4458_v15, %v366_v1  ;;  %v839_v40 = vsel %vm836_vm2, %v4441_v11, %v365_v9  ;;  %v845_v41 = vsel %vm836_vm2, %v4461_v16, %v367_v13 }
  0x86   :  { %v108_v61 = vcombine.high %v4663_v52, %v4663_v52 }
  0x87   :  { %v4719_v3 = vpop.permute.xlu1 %426  ;;  %v425_v5 = vpop.permute.xlu0 %424 }
  0x88   :  { %v496_v14 = vsel %vm494_vm1, %v4697_v60, %v425_v5  ;;  %v497_v27 = vsel %vm494_vm1, %v425_v5, %v4719_v3 }
  0x89   :  { %555 = vrot.lane.b32.xlu0 %v4717_v2, %s4393_s22  ;;  %632 = vrot.lane.b32.xlu1 %v4679_v55, %s4394_s23  ;;  %v949_v29 = vsel %vm945_vm3, %v842_v23, %v496_v14  ;;  %v951_v53 = vsel %vm945_vm3, %v845_v41, %v497_v27 }
  0x8a   :  { %v1023_v36 = vsel %vm1018_vm4, %v949_v29, %v4479_v19  ;;  %v848_v19 = vsel %vm836_vm2, %v4499_v22, %v368_v25  ;;  %v1025_v52 = vsel %vm1018_vm4, %v951_v53, %v4441_v11 }
  0x8b   :  { %v421_v38 = vpop.permute.xlu1 %420  ;;  %1518 = vmatprep.subr.bf16.mxu0 %v1023_v36  ;;  %v4747_v15 = vpop.permute.xlu0 %428 }
  0x8c   :  { %v495_v48 = vsel %vm494_vm1, %v421_v38, %v4697_v60  ;;  %v498_v50 = vsel %vm494_vm1, %v4719_v3, %v4747_v15 }
  0x8d   :  { %634 = vrot.lane.b32.xlu0 %v238_v6, %s4394_s23  ;;  %716 = vrot.lane.b32.xlu1 %v4725_v7, %s4393_s22  ;;  %v947_v63 = vsel %vm945_vm3, %v839_v40, %v495_v48  ;;  %v953_v1 = vsel %vm945_vm3, %v848_v19, %v498_v50 }
  0x8e   :  { %v1020_v5 = vsel %vm1018_vm4, %v947_v63, %v4448_v12  ;;  %v1028_v22 = vsel %vm1018_vm4, %v953_v1, %v4515_v24  ;;  %v4783_v12 = vrot.slane %v108_v61, %v4435_v8  ;;  %v4788_v24 = vld [vmem:[%s6987_s0 + $0x28] sm:$0xff] }
  0x8f   :  { %v4772_v9 = vpop.permute.xlu1 %304  ;;  %1519 = vmatpush1.bf16.msra.mxu0 %v1020_v5  ;;  %v4774_v13 = vpop.permute.xlu0 %302  ;;  %1571 = vmatprep.subr.bf16.mxu1 %v1028_v22  ;;  %v239_v11 = vcombine.low %v4788_v24, %v4788_v24  ;;  %v4811_v41 = vrot.slane %v4788_v24, %v4435_v8 }
  0x90   :  { %1572 = vmatpush1.bf16.msra.mxu1 %v1025_v52  ;;  %v4801_v36 = vcombine.low %v4783_v12, %v4783_v12  ;;  %v4819_v19 = vsel %vm364_vm0, %v4774_v13, %v4772_v9 }
  0x91   :  { %718 = vrot.lane.b32.xlu0 %v4695_v59, %s4393_s22  ;;  %454 = vrot.lane.b32.xlu1 %v4676_v54, %s4394_s23  ;;  %v4797_v29 = vrot.slane %v239_v11, %v4435_v8  ;;  %v4837_v52 = vcombine.low %v4811_v41, %v4811_v41 }
  0x93   :  { %v542_v14 = vpop.permute.xlu0 %541  ;;  %v544_v23 = vpop.permute.xlu1 %543 }
  0x94   :  { %v582_v48 = vsel %vm364_vm0, %v542_v14, %v544_v23  ;;  %v583_v50 = vsel %vm364_vm0, %v544_v23, %v4774_v13  ;;  %v581_v23 = vsel %vm364_vm0, %v4707_v0, %v542_v14 }
  0x95   :  { %458 = vrot.lane.b32.xlu0 %v4783_v12, %s4394_s23  ;;  %636 = vrot.lane.b32.xlu1 %v4705_v62, %s4394_s23 }
  0x97   :  { %v613_v25 = vpop.permute.xlu0 %612  ;;  %v615_v27 = vpop.permute.xlu1 %614 }
  0x98   :  { %v667_v38 = vsel %vm494_vm1, %v4697_v60, %v613_v25  ;;  %v668_v40 = vsel %vm494_vm1, %v613_v25, %v615_v27 }
  0x99   :  { %790 = vrot.lane.b32.xlu0 %v4717_v2, %s4394_s23  ;;  %324 = vrot.lane.b32.xlu1 %v238_v6, %s4393_s22  ;;  %v1123_v63 = vsel %vm836_vm2, %v582_v48, %v667_v38  ;;  %v1126_v6 = vsel %vm836_vm2, %v583_v50, %v668_v40  ;;  %v4850_v40 = vcombine.high %v4811_v41, %v4811_v41 }
  0x9a   :  { %v1221_v38 = vsel %vm945_vm3, %v1126_v6, %v4483_v20 }
  0x9b   :  { %v4821_v53 = vpop.permute.xlu0 %616  ;;  %v611_v61 = vpop.permute.xlu1 %610 }
  0x9c   :  { %v669_v1 = vsel %vm494_vm1, %v615_v27, %v4821_v53  ;;  %v666_v5 = vsel %vm494_vm1, %v611_v61, %v4697_v60  ;;  %v1220_v27 = vsel %vm945_vm3, %v1123_v63, %v4461_v16 }
  0x9d   :  { %v1128_v22 = vsel %vm836_vm2, %v4819_v19, %v669_v1  ;;  %330 = vrot.lane.b32.xlu0 %v4797_v29, %s4393_s22  ;;  %456 = vrot.lane.b32.xlu1 %v4801_v36, %s4394_s23  ;;  %v1120_v11 = vsel %vm836_vm2, %v581_v23, %v666_v5 }
  0x9e   :  { %v1222_v16 = vsel %vm945_vm3, %v1128_v22, %v4464_v17  ;;  %v1219_v22 = vsel %vm945_vm3, %v1120_v11, %v4471_v18 }
  0x9f   :  { %v705_v25 = vpop.permute.xlu0 %704  ;;  %v4842_v60 = vpop.permute.xlu1 %706 }
  0xa0   :  { %v741_v48 = vsel %vm364_vm0, %v4687_v58, %v705_v25  ;;  %v742_v0 = vsel %vm364_vm0, %v705_v25, %v4685_v57  ;;  %v743_v14 = vsel %vm364_vm0, %v4685_v57, %v4842_v60  ;;  %v4881_v25 = vcombine.high %v4783_v12, %v4783_v12 }
  0xa1   :  { %460 = vrot.lane.b32.xlu0 %v4837_v52, %s4394_s23  ;;  %334 = vrot.lane.b32.xlu1 %v4811_v41, %s4393_s22  ;;  %v1269_v50 = vsel %vm1018_vm4, %v1220_v27, %v741_v48  ;;  %v1275_v61 = vsel %vm1018_vm4, %v1222_v16, %v743_v14  ;;  %v1272_v63 = vsel %vm1018_vm4, %v1221_v38, %v742_v0 }
  0xa2   :  { %1520 = vmatprep.subr.bf16.mxu0 %v1269_v50  ;;  %1573 = vmatprep.subr.bf16.mxu1 %v1275_v61  ;;  %v247_v48 = vcombine.high %v4797_v29, %v4797_v29  ;;  %v4905_v0 = vcombine.low %v4797_v29, %v4797_v29  ;;  %v125_v50 = vcombine.high %v4788_v24, %v4788_v24 }
  0xa3   :  { %v703_v6 = vpop.permute.xlu0 %702  ;;  %v4868_v1 = vpop.permute.xlu1 %430  ;;  %1574 = vmatpush1.bf16.msra.mxu1 %v1272_v63 }
  0xa4   :  { %v740_v5 = vsel %vm364_vm0, %v703_v6, %v4687_v58 }
  0xa5   :  { %336 = vrot.lane.b32.xlu0 %v4850_v40, %s4393_s22  ;;  %557 = vrot.lane.b32.xlu1 %v4783_v12, %s4393_s22  ;;  %v1266_v23 = vsel %vm1018_vm4, %v1219_v22, %v740_v5  ;;  %v4919_v5 = vld [vmem:[%s6988_s1] sm:$0xff]  }
  0xa6   :  { %1521 = vmatpush1.bf16.msra.mxu0 %v1266_v23 }
  0xa7   :  { %v4883_v27 = vpop.permute.xlu0 %434  ;;  %v4885_v38 = vpop.permute.xlu1 %618 }
  0xa8   :  { %v810_v18 = vsel %vm494_vm1, %v4885_v38, %v4883_v27  ;;  %v4893_v58 = vsel %vm494_vm1, %v4868_v1, %v4885_v38 }
  0xa9   :  { %559 = vrot.lane.b32.xlu0 %v4881_v25, %s4393_s22  ;;  %638 = vrot.lane.b32.xlu1 %v4797_v29, %s4394_s23  ;;  %v1424_v11 = vsel %vm836_vm2, %v4893_v58, 0 }
  0xaa   :  { %4075 = vmatprep.subr.msk.bf16.mxu1 %vm836_vm2, %v810_v18  ;;  %v499_v18 = vsel %vm494_vm1, %v4747_v15, %v4868_v1 }
  0xab   :  { %1576 = vmatpush1.bf16.msra.mxu1 %v1424_v11  ;;  %v785_v14 = vpop.permute.xlu0 %784  ;;  %v301_v16 = vpop.permute.xlu1 %300 }
  0xac   :  { %v369_v61 = vsel %vm364_vm0, %v4685_v57, %v301_v16  ;;  %v809_v63 = vsel %vm494_vm1, %v785_v14, %v4868_v1  ;;  %v808_v6 = vsel %vm494_vm1, %v4719_v3, %v785_v14  ;;  %v370_v22 = vsel %vm364_vm0, %v301_v16, %v4774_v13 }
  0xad   :  { %v851_v24 = vsel %vm836_vm2, %v4464_v17, %v369_v61  ;;  %640 = vrot.lane.b32.xlu0 %v247_v48, %s4394_s23  ;;  %720 = vrot.lane.b32.xlu1 %v4905_v0, %s4393_s22  ;;  %v1419_v57 = vsel %vm836_vm2, %v808_v6, 0  ;;  %v854_v11 = vsel %vm836_vm2, %v4491_v21, %v370_v22  ;;  %v4944_v61 = vrot.slane %v125_v50, %v4435_v8  ;;  %v4959_v50 = vld [vmem:[%s6987_s0 + $0x30] sm:$0xff] }
  0xae   :  { %4072 = vmatprep.subr.msk.bf16.mxu0 %vm836_vm2, %v809_v63  ;;  %4076 = vmatmul.mubr.msk.bf16.vlgmr.msra.gmra.mrb[0].mxu1 %vm1411_vm5, %v4919_v5  ;;  %v955_v16 = vsel %vm945_vm3, %v851_v24, %v499_v18 }
  0xaf   :  { %1523 = vmatpush1.bf16.msra.mxu0 %v1419_v57  ;;  %v4932_v3 = vpop.permute.xlu0 %306  ;;  %v433_v23 = vpop.permute.xlu1 %432  ;;  %1613 = vmatprep.mubr.bf16.mxu1 %v4395_v28  ;;  %v1031_v57 = vsel %vm1018_vm4, %v955_v16, %v4438_v10  ;;  %v4986_v10 = vld [vmem:[%s6988_s1 + $0x8] sm:$0xff]  }
  0xb0   :  { %v500_v14 = vsel %vm494_vm1, %v4868_v1, %v433_v23  ;;  %v501_v63 = vsel %vm494_vm1, %v433_v23, %v4883_v27  ;;  %v372_v21 = vsel %vm364_vm0, %v4772_v9, %v4932_v3  ;;  %v857_v23 = vsel %vm836_vm2, %v4526_v26, %v4819_v19 }
  0xb1   :  { %722 = vrot.lane.b32.xlu0 %v4837_v52, %s4393_s22  ;;  %462 = vrot.lane.b32.xlu1 %v4811_v41, %s4394_s23  ;;  %v957_v15 = vsel %vm945_vm3, %v854_v11, %v500_v14  ;;  %v860_v18 = vsel %vm836_vm2, %v4574_v35, %v372_v21  ;;  %v959_v11 = vsel %vm945_vm3, %v857_v23, %v501_v63 }
  0xb2   :  { %v1034_v6 = vsel %vm1018_vm4, %v957_v15, %v4483_v20  ;;  %4073 = vmatmul.mubr.msk.bf16.vlgmr.msra.gmra.mrb[0].mxu0 %vm1411_vm5, %v4919_v5  ;;  %v248_v14 = vcombine.low %v4959_v50, %v4959_v50  ;;  %v1036_v15 = vsel %vm1018_vm4, %v959_v11, %v4464_v17  ;;  %v5016_v17 = vcombine.low %v4944_v61, %v4944_v61 }
  0xb3   :  { %v4965_v22 = vpop.permute.xlu0 %436  ;;  %1624 = vmatprep.subr.bf16.mxu0 %v1034_v6  ;;  %v4967_v24 = vpop.permute.xlu1 %310  ;;  %1560 = vmatprep.mubr.bf16.mxu0 %v4395_v28 }
  0xb4   :  { %v502_v20 = vsel %vm494_vm1, %v4883_v27, %v4965_v22  ;;  %1625 = vmatpush1.bf16.msra.mxu0 %v1031_v57  ;;  %v5003_v21 = vrot.slane %v248_v14, %v4435_v8 }
  0xb5   :  { %466 = vrot.lane.b32.xlu0 %v4944_v61, %s4394_s23  ;;  %642 = vrot.lane.b32.xlu1 %v4850_v40, %s4394_s23  ;;  %v961_v19 = vsel %vm945_vm3, %v860_v18, %v502_v20 }
  0xb6   :  { %v1039_v35 = vsel %vm1018_vm4, %v961_v19, %v4584_v37  ;;  %4077 = vmatmul.mubr.msk.bf16.gmra.mrb[4].mxu1 %vm1411_vm5, %v4986_v10  ;;  %v5012_v37 = vrot.slane %v4959_v50, %v4435_v8 }
  0xb7   :  { %v4997_v16 = vpop.permute.xlu0 %312  ;;  %v546_v63 = vpop.permute.xlu1 %545  ;;  %1677 = vmatprep.subr.bf16.mxu1 %v1039_v35  ;;  %1709 = vmatprep.mubr.bf16.mxu1 %v4395_v28 }
  0xb8   :  { %1678 = vmatpush1.bf16.msra.mxu1 %v1036_v15  ;;  %v584_v6 = vsel %vm364_vm0, %v4772_v9, %v546_v63  ;;  %v670_v9 = vsel %vm494_vm1, %v4821_v53, %v4868_v1  ;;  %v5034_v53 = vcombine.low %v5012_v37, %v5012_v37  ;;  %v5046_v35 = vcombine.high %v5012_v37, %v5012_v37 }
  0xb9   :  { %792 = vrot.lane.b32.xlu0 %v4881_v25, %s4394_s23  ;;  %332 = vrot.lane.b32.xlu1 %v247_v48, %s4393_s22  ;;  %v1131_v48 = vsel %vm836_vm2, %v584_v6, %v670_v9 }
  0xba   :  { %4074 = vmatmul.mubr.msk.bf16.gmra.mrb[4].mxu0 %vm1411_vm5, %v4986_v10 }
  0xbb   :  { %v548_v57 = vpop.permute.xlu0 %547  ;;  %v621_v23 = vpop.permute.xlu1 %620  ;;  %1656 = vmatprep.mubr.bf16.mxu0 %v4395_v28 }
  0xbc   :  { %v585_v20 = vsel %vm364_vm0, %v546_v63, %v548_v57  ;;  %v586_v1 = vsel %vm364_vm0, %v548_v57, %v4967_v24  ;;  %v672_v11 = vsel %vm494_vm1, %v4885_v38, %v621_v23  ;;  %v5051_v63 = vsel %vm364_vm0, %v4967_v24, %v4997_v16 }
  0xbd   :  { %v1134_v18 = vsel %vm836_vm2, %v585_v20, %v4893_v58  ;;  %338 = vrot.lane.b32.xlu0 %v5003_v21, %s4393_s22  ;;  %464 = vrot.lane.b32.xlu1 %v5016_v17, %s4394_s23  ;;  %v1224_v58 = vsel %vm945_vm3, %v1131_v48, %v4550_v32  ;;  %v744_v32 = vsel %vm364_vm0, %v4842_v60, %v4774_v13 }
  0xbe   :  { %v1225_v6 = vsel %vm945_vm3, %v1134_v18, %v4526_v26  ;;  %v1278_v26 = vsel %vm1018_vm4, %v1224_v58, %v744_v32 }
  0xbf   :  { %v5040_v14 = vpop.permute.xlu0 %622  ;;  %v709_v19 = vpop.permute.xlu1 %708 }
  0xc0   :  { %v673_v15 = vsel %vm494_vm1, %v621_v23, %v5040_v14  ;;  %v745_v38 = vsel %vm364_vm0, %v4774_v13, %v709_v19  ;;  %v1137_v23 = vsel %vm836_vm2, %v586_v1, %v672_v11  ;;  %v746_v48 = vsel %vm364_vm0, %v709_v19, %v4932_v3 }
  0xc1   :  { %v1139_v9 = vsel %vm836_vm2, %v5051_v63, %v673_v15  ;;  %468 = vrot.lane.b32.xlu0 %v5034_v53, %s4394_s23  ;;  %342 = vrot.lane.b32.xlu1 %v5012_v37, %s4393_s22  ;;  %v1281_v57 = vsel %vm1018_vm4, %v1225_v6, %v745_v38  ;;  %v1226_v11 = vsel %vm945_vm3, %v1137_v23, %v4558_v33 }
  0xc2   :  { %1626 = vmatprep.subr.bf16.mxu0 %v1281_v57  ;;  %v1227_v18 = vsel %vm945_vm3, %v1139_v9, %v4543_v30  ;;  %v5091_v19 = vcombine.high %v4944_v61, %v4944_v61  ;;  %v1284_v58 = vsel %vm1018_vm4, %v1226_v11, %v746_v48  ;;  %v256_v57 = vcombine.high %v5003_v21, %v5003_v21 }
  0xc3   :  { %v5073_v13 = vpop.permute.xlu0 %710  ;;  %1627 = vmatpush1.bf16.msra.mxu0 %v1278_v26  ;;  %v5075_v60 = vpop.permute.xlu1 %438  ;;  %v5116_v23 = vcombine.low %v5003_v21, %v5003_v21 }
  0xc4   :  { %v747_v20 = vsel %vm364_vm0, %v4932_v3, %v5073_v13 }
  0xc5   :  { %344 = vrot.lane.b32.xlu0 %v5046_v35, %s4393_s22  ;;  %561 = vrot.lane.b32.xlu1 %v4944_v61, %s4393_s22  ;;  %v1287_v1 = vsel %vm1018_vm4, %v1227_v18, %v747_v20  ;;  %v142_v20 = vcombine.high %v4959_v50, %v4959_v50 }
  0xc6   :  { %1679 = vmatprep.subr.bf16.mxu1 %v1287_v1 }
  0xc7   :  { %v5094_v15 = vpop.permute.xlu0 %442  ;;  %v5096_v38 = vpop.permute.xlu1 %624  ;;  %1680 = vmatpush1.bf16.msra.mxu1 %v1284_v58 }
  0xc8   :  { %v813_v6 = vsel %vm494_vm1, %v5096_v38, %v5094_v15  ;;  %v5104_v32 = vsel %vm494_vm1, %v5075_v60, %v5096_v38 }
  0xc9   :  { %563 = vrot.lane.b32.xlu0 %v5091_v19, %s4393_s22  ;;  %644 = vrot.lane.b32.xlu1 %v5003_v21, %s4394_s23  ;;  %v1435_v9 = vsel %vm836_vm2, %v5104_v32, 0 }
  0xca   :  { %4081 = vmatprep.subr.msk.bf16.mxu1 %vm836_vm2, %v813_v6 }
  0xcb   :  { %v787_v26 = vpop.permute.xlu0 %786  ;;  %v309_v48 = vpop.permute.xlu1 %308  ;;  %1682 = vmatpush1.bf16.msra.mxu1 %v1435_v9  ;;  %v503_v9 = vsel %vm494_vm1, %v4965_v22, %v5075_v60 }
  0xcc   :  { %v811_v18 = vsel %vm494_vm1, %v4883_v27, %v787_v26  ;;  %v373_v1 = vsel %vm364_vm0, %v4932_v3, %v309_v48  ;;  %v812_v11 = vsel %vm494_vm1, %v787_v26, %v5075_v60  ;;  %v374_v58 = vsel %vm364_vm0, %v309_v48, %v4967_v24 }
  0xcd   :  { %v863_v6 = vsel %vm836_vm2, %v4543_v30, %v373_v1  ;;  %646 = vrot.lane.b32.xlu0 %v256_v57, %s4394_s23  ;;  %724 = vrot.lane.b32.xlu1 %v5116_v23, %s4393_s22  ;;  %v1430_v50 = vsel %vm836_vm2, %v811_v18, 0  ;;  %v866_v26 = vsel %vm836_vm2, %v4566_v34, %v374_v58  ;;  %v5150_v1 = vrot.slane %v142_v20, %v4435_v8  ;;  %v5165_v20 = vld [vmem:[%s6987_s0 + $0x38] sm:$0xff] }
  0xce   :  { %4078 = vmatprep.subr.msk.bf16.mxu0 %vm836_vm2, %v812_v11  ;;  %4082 = vmatmul.mubr.msk.bf16.vlgmr.msra.gmra.mrb[8].mxu1 %vm1411_vm5, %v4919_v5  ;;  %v963_v18 = vsel %vm945_vm3, %v863_v6, %v503_v9  ;;  %v869_v9 = vsel %vm836_vm2, %v4594_v39, %v5051_v63 }
  0xcf   :  { %1629 = vmatpush1.bf16.msra.mxu0 %v1430_v50  ;;  %v5138_v27 = vpop.permute.xlu0 %314  ;;  %v441_v3 = vpop.permute.xlu1 %440  ;;  %1719 = vmatprep.mubr.bf16.mxu1 %v4395_v28 }
  0xd0   :  { %v504_v48 = vsel %vm494_vm1, %v5075_v60, %v441_v3  ;;  %v505_v11 = vsel %vm494_vm1, %v441_v3, %v5094_v15  ;;  %v376_v34 = vsel %vm364_vm0, %v4997_v16, %v5138_v27  ;;  %v1042_v3 = vsel %vm1018_vm4, %v963_v18, %v4546_v31 }
  0xd1   :  { %726 = vrot.lane.b32.xlu0 %v5034_v53, %s4393_s22  ;;  %470 = vrot.lane.b32.xlu1 %v5012_v37, %s4394_s23  ;;  %v965_v22 = vsel %vm945_vm3, %v866_v26, %v504_v48  ;;  %v872_v26 = vsel %vm836_vm2, %v4638_v47, %v376_v34  ;;  %v967_v48 = vsel %vm945_vm3, %v869_v9, %v505_v11 }
  0xd2   :  { %v1045_v58 = vsel %vm1018_vm4, %v965_v22, %v4558_v33  ;;  %4079 = vmatmul.mubr.msk.bf16.vlgmr.msra.gmra.mrb[8].mxu0 %vm1411_vm5, %v4919_v5  ;;  %v257_v22 = vcombine.low %v5165_v20, %v5165_v20  ;;  %v1047_v11 = vsel %vm1018_vm4, %v967_v48, %v4543_v30  ;;  %v5217_v30 = vcombine.low %v5150_v1, %v5150_v1 }
  0xd3   :  { %v5171_v6 = vpop.permute.xlu0 %444  ;;  %1730 = vmatprep.subr.bf16.mxu0 %v1045_v58  ;;  %v5173_v50 = vpop.permute.xlu1 %318  ;;  %1666 = vmatprep.mubr.bf16.mxu0 %v4395_v28 }
  0xd4   :  { %v506_v33 = vsel %vm494_vm1, %v5094_v15, %v5171_v6  ;;  %1731 = vmatpush1.bf16.msra.mxu0 %v1042_v3  ;;  %v5204_v34 = vrot.slane %v257_v22, %v4435_v8 }
  0xd5   :  { %474 = vrot.lane.b32.xlu0 %v5150_v1, %s4394_s23  ;;  %648 = vrot.lane.b32.xlu1 %v5046_v35, %s4394_s23  ;;  %v969_v31 = vsel %vm945_vm3, %v872_v26, %v506_v33 }
  0xd6   :  { %v1050_v63 = vsel %vm1018_vm4, %v969_v31, %v4648_v49  ;;  %4083 = vmatmul.mubr.msk.bf16.gmra.mrb[12].mxu1 %vm1411_vm5, %v4986_v10  ;;  %v5213_v49 = vrot.slane %v5165_v20, %v4435_v8 }
  0xd7   :  { %v5198_v47 = vpop.permute.xlu0 %320  ;;  %v550_v18 = vpop.permute.xlu1 %549  ;;  %1783 = vmatprep.subr.bf16.mxu1 %v1050_v63  ;;  %1815 = vmatprep.mubr.bf16.mxu1 %v4395_v28 }
  0xd8   :  { %1784 = vmatpush1.bf16.msra.mxu1 %v1047_v11  ;;  %v587_v58 = vsel %vm364_vm0, %v4997_v16, %v550_v18  ;;  %v674_v16 = vsel %vm494_vm1, %v5040_v14, %v5075_v60  ;;  %v5235_v14 = vcombine.low %v5213_v49, %v5213_v49  ;;  %v5247_v63 = vcombine.high %v5213_v49, %v5213_v49 }
  0xd9   :  { %794 = vrot.lane.b32.xlu0 %v5091_v19, %s4394_s23  ;;  %340 = vrot.lane.b32.xlu1 %v256_v57, %s4393_s22  ;;  %v1142_v57 = vsel %vm836_vm2, %v587_v58, %v674_v16 }
  0xda   :  { %4080 = vmatmul.mubr.msk.bf16.gmra.mrb[12].mxu0 %vm1411_vm5, %v4986_v10 }
  0xdb   :  { %v552_v3 = vpop.permute.xlu0 %551  ;;  %v627_v9 = vpop.permute.xlu1 %626  ;;  %1762 = vmatprep.mubr.bf16.mxu0 %v4395_v28 }
  0xdc   :  { %v588_v33 = vsel %vm364_vm0, %v550_v18, %v552_v3  ;;  %v589_v60 = vsel %vm364_vm0, %v552_v3, %v5173_v50  ;;  %v676_v48 = vsel %vm494_vm1, %v5096_v38, %v627_v9  ;;  %v5252_v18 = vsel %vm364_vm0, %v5173_v50, %v5198_v47 }
  0xdd   :  { %v1145_v26 = vsel %vm836_vm2, %v588_v33, %v5104_v32  ;;  %346 = vrot.lane.b32.xlu0 %v5204_v34, %s4393_s22  ;;  %472 = vrot.lane.b32.xlu1 %v5217_v30, %s4394_s23  ;;  %v1229_v32 = vsel %vm945_vm3, %v1142_v57, %v4614_v44  ;;  %v748_v44 = vsel %vm364_vm0, %v5073_v13, %v4967_v24 }
  0xde   :  { %v1230_v58 = vsel %vm945_vm3, %v1145_v26, %v4594_v39  ;;  %v1290_v39 = vsel %vm1018_vm4, %v1229_v32, %v748_v44 }
  0xdf   :  { %v5241_v22 = vpop.permute.xlu0 %628  ;;  %v713_v31 = vpop.permute.xlu1 %712 }
  0xe0   :  { %v677_v11 = vsel %vm494_vm1, %v627_v9, %v5241_v22  ;;  %v749_v38 = vsel %vm364_vm0, %v4967_v24, %v713_v31  ;;  %v1148_v9 = vsel %vm836_vm2, %v589_v60, %v676_v48  ;;  %v750_v57 = vsel %vm364_vm0, %v713_v31, %v5138_v27 }
  0xe1   :  { %v1150_v16 = vsel %vm836_vm2, %v5252_v18, %v677_v11  ;;  %476 = vrot.lane.b32.xlu0 %v5235_v14, %s4394_s23  ;;  %350 = vrot.lane.b32.xlu1 %v5213_v49, %s4393_s22  ;;  %v1293_v3 = vsel %vm1018_vm4, %v1230_v58, %v749_v38  ;;  %v1231_v48 = vsel %vm945_vm3, %v1148_v9, %v4622_v45 }
  0xe2   :  { %1732 = vmatprep.subr.bf16.mxu0 %v1293_v3  ;;  %v1232_v26 = vsel %vm945_vm3, %v1150_v16, %v4607_v42  ;;  %v5292_v31 = vcombine.high %v5150_v1, %v5150_v1  ;;  %v1296_v32 = vsel %vm1018_vm4, %v1231_v48, %v750_v57  ;;  %v265_v3 = vcombine.high %v5204_v34, %v5204_v34 }
  0xe3   :  { %v5274_v24 = vpop.permute.xlu0 %714  ;;  %1733 = vmatpush1.bf16.msra.mxu0 %v1290_v39  ;;  %v5276_v13 = vpop.permute.xlu1 %446  ;;  %v5317_v9 = vcombine.low %v5204_v34, %v5204_v34 }
  0xe4   :  { %v751_v33 = vsel %vm364_vm0, %v5138_v27, %v5274_v24 }
  0xe5   :  { %352 = vrot.lane.b32.xlu0 %v5247_v63, %s4393_s22  ;;  %565 = vrot.lane.b32.xlu1 %v5150_v1, %s4393_s22  ;;  %v1299_v60 = vsel %vm1018_vm4, %v1232_v26, %v751_v33  ;;  %v159_v33 = vcombine.high %v5165_v20, %v5165_v20 }
  0xe6   :  { %1785 = vmatprep.subr.bf16.mxu1 %v1299_v60 }
  0xe7   :  { %v5295_v11 = vpop.permute.xlu0 %450  ;;  %v5297_v38 = vpop.permute.xlu1 %630  ;;  %1786 = vmatpush1.bf16.msra.mxu1 %v1296_v32 }
  0xe8   :  { %v816_v58 = vsel %vm494_vm1, %v5297_v38, %v5295_v11  ;;  %v5305_v44 = vsel %vm494_vm1, %v5276_v13, %v5297_v38 }
  0xe9   :  { %567 = vrot.lane.b32.xlu0 %v5292_v31, %s4393_s22  ;;  %650 = vrot.lane.b32.xlu1 %v5204_v34, %s4394_s23  ;;  %v1446_v16 = vsel %vm836_vm2, %v5305_v44, 0 }
  0xea   :  { %4087 = vmatprep.subr.msk.bf16.mxu1 %vm836_vm2, %v816_v58 }
  0xeb   :  { %v789_v39 = vpop.permute.xlu0 %788  ;;  %v317_v57 = vpop.permute.xlu1 %316  ;;  %1788 = vmatpush1.bf16.msra.mxu1 %v1446_v16  ;;  %v507_v16 = vsel %vm494_vm1, %v5171_v6, %v5276_v13 }
  0xec   :  { %v814_v26 = vsel %vm494_vm1, %v5094_v15, %v789_v39  ;;  %v377_v60 = vsel %vm364_vm0, %v5138_v27, %v317_v57  ;;  %v815_v48 = vsel %vm494_vm1, %v789_v39, %v5276_v13  ;;  %v378_v32 = vsel %vm364_vm0, %v317_v57, %v5173_v50 }
  0xed   :  { %v875_v58 = vsel %vm836_vm2, %v4607_v42, %v377_v60  ;;  %652 = vrot.lane.b32.xlu0 %v265_v3, %s4394_s23  ;;  %728 = vrot.lane.b32.xlu1 %v5317_v9, %s4393_s22  ;;  %v1441_v20 = vsel %vm836_vm2, %v814_v26, 0  ;;  %v878_v39 = vsel %vm836_vm2, %v4630_v46, %v378_v32  ;;  %v5351_v60 = vrot.slane %v159_v33, %v4435_v8  ;;  %v5366_v33 = vld [vmem:[%s6987_s0 + $0x40] sm:$0xff] }
  0xee   :  { %4084 = vmatprep.subr.msk.bf16.mxu0 %vm836_vm2, %v815_v48  ;;  %4088 = vmatmul.mubr.msk.bf16.vlgmr.msra.gmra.mrb[16].mxu1 %vm1411_vm5, %v4919_v5  ;;  %v971_v26 = vsel %vm945_vm3, %v875_v58, %v507_v16  ;;  %v881_v16 = vsel %vm836_vm2, %v4658_v51, %v5252_v18 }
  0xef   :  { %1735 = vmatpush1.bf16.msra.mxu0 %v1441_v20  ;;  %v5339_v15 = vpop.permute.xlu0 %322  ;;  %v449_v27 = vpop.permute.xlu1 %448  ;;  %1825 = vmatprep.mubr.bf16.mxu1 %v4395_v28 }
  0xf0   :  { %v508_v57 = vsel %vm494_vm1, %v5276_v13, %v449_v27  ;;  %v509_v48 = vsel %vm494_vm1, %v449_v27, %v5295_v11  ;;  %v380_v46 = vsel %vm364_vm0, %v5198_v47, %v5339_v15  ;;  %v1053_v27 = vsel %vm1018_vm4, %v971_v26, %v4610_v43 }
  0xf1   :  { %730 = vrot.lane.b32.xlu0 %v5235_v14, %s4393_s22  ;;  %478 = vrot.lane.b32.xlu1 %v5213_v49, %s4394_s23  ;;  %v973_v6 = vsel %vm945_vm3, %v878_v39, %v508_v57  ;;  %v975_v57 = vsel %vm945_vm3, %v881_v16, %v509_v48 }
  0xf2   :  { %4085 = vmatmul.mubr.msk.bf16.vlgmr.msra.gmra.mrb[16].mxu0 %vm1411_vm5, %v4919_v5  ;;  %v1056_v32 = vsel %vm1018_vm4, %v973_v6, %v4622_v45  ;;  %v884_v45 = vsel %vm836_vm2, %v4717_v2, %v380_v46  ;;  %v266_v6 = vcombine.low %v5366_v33, %v5366_v33  ;;  %v1058_v48 = vsel %vm1018_vm4, %v975_v57, %v4607_v42 }
  0xf3   :  { %v5372_v58 = vpop.permute.xlu0 %452  ;;  %1836 = vmatprep.subr.bf16.mxu0 %v1056_v32  ;;  %v5374_v20 = vpop.permute.xlu1 %326  ;;  %1772 = vmatprep.mubr.bf16.mxu0 %v4395_v28  ;;  %v5418_v42 = vcombine.low %v5351_v60, %v5351_v60 }
  0xf4   :  { %v510_v39 = vsel %vm494_vm1, %v5295_v11, %v5372_v58  ;;  %1837 = vmatpush1.bf16.msra.mxu0 %v1053_v27  ;;  %v5405_v46 = vrot.slane %v266_v6, %v4435_v8 }
  0xf5   :  { %482 = vrot.lane.b32.xlu0 %v5351_v60, %s4394_s23  ;;  %654 = vrot.lane.b32.xlu1 %v5247_v63, %s4394_s23  ;;  %v977_v43 = vsel %vm945_vm3, %v884_v45, %v510_v39 }
  0xf6   :  { %v1061_v18 = vsel %vm1018_vm4, %v977_v43, %v4725_v7  ;;  %4089 = vmatmul.mubr.msk.bf16.gmra.mrb[20].mxu1 %vm1411_vm5, %v4986_v10  ;;  %v5414_v7 = vrot.slane %v5366_v33, %v4435_v8 }
  0xf7   :  { %v5399_v2 = vpop.permute.xlu0 %328  ;;  %v554_v26 = vpop.permute.xlu1 %553  ;;  %1889 = vmatprep.subr.bf16.mxu1 %v1061_v18  ;;  %1921 = vmatprep.mubr.bf16.mxu1 %v4395_v28 }
  0xf8   :  { %1890 = vmatpush1.bf16.msra.mxu1 %v1058_v48  ;;  %v590_v32 = vsel %vm364_vm0, %v5198_v47, %v554_v26  ;;  %v678_v47 = vsel %vm494_vm1, %v5241_v22, %v5276_v13  ;;  %v5436_v22 = vcombine.low %v5414_v7, %v5414_v7  ;;  %v5448_v18 = vcombine.high %v5414_v7, %v5414_v7 }
  0xf9   :  { %796 = vrot.lane.b32.xlu0 %v5292_v31, %s4394_s23  ;;  %348 = vrot.lane.b32.xlu1 %v265_v3, %s4393_s22  ;;  %v1153_v3 = vsel %vm836_vm2, %v590_v32, %v678_v47 }
  0xfa   :  { %4086 = vmatmul.mubr.msk.bf16.gmra.mrb[20].mxu0 %vm1411_vm5, %v4986_v10 }
  0xfb   :  { %v556_v27 = vpop.permute.xlu0 %555  ;;  %v633_v16 = vpop.permute.xlu1 %632  ;;  %1868 = vmatprep.mubr.bf16.mxu0 %v4395_v28 }
  0xfc   :  { %v591_v39 = vsel %vm364_vm0, %v554_v26, %v556_v27  ;;  %v592_v13 = vsel %vm364_vm0, %v556_v27, %v5374_v20  ;;  %v680_v57 = vsel %vm494_vm1, %v5297_v38, %v633_v16  ;;  %v5453_v26 = vsel %vm364_vm0, %v5374_v20, %v5399_v2 }
  0xfd   :  { %v1156_v45 = vsel %vm836_vm2, %v591_v39, %v5305_v44  ;;  %354 = vrot.lane.b32.xlu0 %v5405_v46, %s4393_s22  ;;  %480 = vrot.lane.b32.xlu1 %v5418_v42, %s4394_s23  ;;  %v1234_v44 = vsel %vm945_vm3, %v1153_v3, %v4683_v56  ;;  %v752_v56 = vsel %vm364_vm0, %v5274_v24, %v5173_v50 }
  0xfe   :  { %v1235_v32 = vsel %vm945_vm3, %v1156_v45, %v4658_v51  ;;  %v1302_v51 = vsel %vm1018_vm4, %v1234_v44, %v752_v56 }
  0xff   :  { %v5442_v6 = vpop.permute.xlu0 %634  ;;  %v717_v43 = vpop.permute.xlu1 %716 }
 0x100   :  { %v681_v48 = vsel %vm494_vm1, %v633_v16, %v5442_v6  ;;  %v753_v38 = vsel %vm364_vm0, %v5173_v50, %v717_v43  ;;  %v1159_v16 = vsel %vm836_vm2, %v592_v13, %v680_v57  ;;  %v754_v3 = vsel %vm364_vm0, %v717_v43, %v5339_v15 }
 0x101   :  { %v1161_v47 = vsel %vm836_vm2, %v5453_v26, %v681_v48  ;;  %484 = vrot.lane.b32.xlu0 %v5436_v22, %s4394_s23  ;;  %358 = vrot.lane.b32.xlu1 %v5414_v7, %s4393_s22  ;;  %v1305_v27 = vsel %vm1018_vm4, %v1235_v32, %v753_v38  ;;  %v1236_v57 = vsel %vm945_vm3, %v1159_v16, %v4695_v59 }
 0x102   :  { %1838 = vmatprep.subr.bf16.mxu0 %v1305_v27  ;;  %v1237_v45 = vsel %vm945_vm3, %v1161_v47, %v4676_v54  ;;  %v5493_v43 = vcombine.high %v5351_v60, %v5351_v60  ;;  %v1308_v44 = vsel %vm1018_vm4, %v1236_v57, %v754_v3  ;;  %v274_v27 = vcombine.high %v5405_v46, %v5405_v46 }
 0x103   :  { %v5475_v50 = vpop.permute.xlu0 %718  ;;  %1839 = vmatpush1.bf16.msra.mxu0 %v1302_v51  ;;  %v5477_v24 = vpop.permute.xlu1 %454  ;;  %v5518_v16 = vcombine.low %v5405_v46, %v5405_v46 }
 0x104   :  { %v755_v39 = vsel %vm364_vm0, %v5339_v15, %v5475_v50 }
 0x105   :  { %360 = vrot.lane.b32.xlu0 %v5448_v18, %s4393_s22  ;;  %569 = vrot.lane.b32.xlu1 %v5351_v60, %s4393_s22  ;;  %v1311_v13 = vsel %vm1018_vm4, %v1237_v45, %v755_v39  ;;  %v176_v39 = vcombine.high %v5366_v33, %v5366_v33  ;;  %v511_v33 = vsel %vm494_vm1, %v5372_v58, %v5477_v24 }
 0x106   :  { %1891 = vmatprep.subr.bf16.mxu1 %v1311_v13 }
 0x107   :  { %v5496_v48 = vpop.permute.xlu0 %458  ;;  %v5498_v38 = vpop.permute.xlu1 %636  ;;  %1892 = vmatpush1.bf16.msra.mxu1 %v1308_v44 }
 0x108   :  { %v5503_v32 = vsel %vm494_vm1, %v5477_v24, %v5498_v38  ;;  %v819_v56 = vsel %vm494_vm1, %v5498_v38, %v5496_v48 }
 0x109   :  { %571 = vrot.lane.b32.xlu0 %v5493_v43, %s4393_s22  ;;  %656 = vrot.lane.b32.xlu1 %v5405_v46, %s4394_s23  ;;  %v1457_v47 = vsel %vm836_vm2, %v5503_v32, 0 }
 0x10a   :  { %4093 = vmatprep.subr.msk.bf16.mxu1 %vm836_vm2, %v819_v56 }
 0x10b   :  { %v791_v51 = vpop.permute.xlu0 %790  ;;  %v325_v3 = vpop.permute.xlu1 %324  ;;  %1894 = vmatpush1.bf16.msra.mxu1 %v1457_v47 }
 0x10c   :  { %v817_v45 = vsel %vm494_vm1, %v5295_v11, %v791_v51  ;;  %v818_v13 = vsel %vm494_vm1, %v791_v51, %v5477_v24  ;;  %v381_v57 = vsel %vm364_vm0, %v5339_v15, %v325_v3  ;;  %v382_v56 = vsel %vm364_vm0, %v325_v3, %v5374_v20 }
 0x10d   :  { %v1452_v44 = vsel %vm836_vm2, %v817_v45, 0  ;;  %v887_v47 = vsel %vm836_vm2, %v4676_v54, %v381_v57  ;;  %658 = vrot.lane.b32.xlu0 %v274_v27, %s4394_s23  ;;  %732 = vrot.lane.b32.xlu1 %v5518_v16, %s4393_s22  ;;  %v890_v51 = vsel %vm836_vm2, %v4705_v62, %v382_v56  ;;  %v893_v56 = vsel %vm836_vm2, %v4783_v12, %v5453_v26 }
 0x10e   :  { %4090 = vmatprep.subr.msk.bf16.mxu0 %vm836_vm2, %v818_v13  ;;  %4094 = vmatmul.mubr.msk.bf16.vlgmr.msra.gmra.mrb[24].mxu1 %vm1411_vm5, %v4919_v5  ;;  %v979_v45 = vsel %vm945_vm3, %v887_v47, %v511_v33  ;;  %v5552_v13 = vrot.slane %v176_v39, %v4435_v8  ;;  %v5567_v39 = vld [vmem:[%s6987_s0 + $0x48] sm:$0x3f] }
 0x10f   :  { %1841 = vmatpush1.bf16.msra.mxu0 %v1452_v44  ;;  %v5540_v11 = vpop.permute.xlu0 %330  ;;  %v457_v15 = vpop.permute.xlu1 %456  ;;  %1931 = vmatprep.mubr.bf16.mxu1 %v4395_v28  ;;  %v1064_v33 = vsel %vm1018_vm4, %v979_v45, %v4679_v55 }
 0x110   :  { %v512_v3 = vsel %vm494_vm1, %v5477_v24, %v457_v15  ;;  %v384_v57 = vsel %vm364_vm0, %v5399_v2, %v5540_v11  ;;  %v513_v58 = vsel %vm494_vm1, %v457_v15, %v5496_v48 }
 0x111   :  { %734 = vrot.lane.b32.xlu0 %v5436_v22, %s4393_s22  ;;  %486 = vrot.lane.b32.xlu1 %v5414_v7, %s4394_s23  ;;  %v981_v62 = vsel %vm945_vm3, %v890_v51, %v512_v3  ;;  %v983_v51 = vsel %vm945_vm3, %v893_v56, %v513_v58  ;;  %v896_v26 = vsel %vm836_vm2, %v4881_v25, %v384_v57 }
 0x112   :  { %4091 = vmatmul.mubr.msk.bf16.vlgmr.msra.gmra.mrb[24].mxu0 %vm1411_vm5, %v4919_v5  ;;  %v1067_v44 = vsel %vm1018_vm4, %v981_v62, %v4695_v59  ;;  %v275_v3 = vcombine.low %v5567_v39, %v5567_v39  ;;  %v1069_v57 = vsel %vm1018_vm4, %v983_v51, %v4676_v54  ;;  %v5619_v54 = vcombine.low %v5552_v13, %v5552_v13 }
 0x113   :  { %v5576_v47 = vpop.permute.xlu0 %460  ;;  %1942 = vmatprep.subr.bf16.mxu0 %v1067_v44  ;;  %v5578_v15 = vpop.permute.xlu1 %334  ;;  %1878 = vmatprep.mubr.bf16.mxu0 %v4395_v28 }
 0x114   :  { %v514_v59 = vsel %vm494_vm1, %v5496_v48, %v5576_v47  ;;  %1943 = vmatpush1.bf16.msra.mxu0 %v1064_v33  ;;  %v5606_v62 = vrot.slane %v275_v3, %v4435_v8 }
 0x115   :  { %490 = vrot.lane.b32.xlu0 %v5552_v13, %s4394_s23  ;;  %660 = vrot.lane.b32.xlu1 %v5448_v18, %s4394_s23  ;;  %v985_v55 = vsel %vm945_vm3, %v896_v26, %v514_v59 }
 0x116   :  { %4095 = vmatmul.mubr.msk.bf16.gmra.mrb[28].mxu1 %vm1411_vm5, %v4986_v10  ;;  %v1072_v45 = vsel %vm1018_vm4, %v985_v55, %v4905_v0  ;;  %v5615_v0 = vrot.slane %v5567_v39, %v4435_v8 }
 0x117   :  { %v5600_v58 = vpop.permute.xlu0 %336  ;;  %v558_v25 = vpop.permute.xlu1 %557  ;;  %1995 = vmatprep.subr.bf16.mxu1 %v1072_v45  ;;  %2027 = vmatprep.mubr.bf16.mxu1 %v4395_v28  ;;  %v5649_v45 = vcombine.high %v5552_v13, %v5552_v13 }
 0x118   :  { %1996 = vmatpush1.bf16.msra.mxu1 %v1069_v57  ;;  %v593_v44 = vsel %vm364_vm0, %v5399_v2, %v558_v25  ;;  %v682_v2 = vsel %vm494_vm1, %v5442_v6, %v5477_v24  ;;  %v5637_v6 = vcombine.low %v5615_v0, %v5615_v0 }
 0x119   :  { %798 = vrot.lane.b32.xlu0 %v5493_v43, %s4394_s23  ;;  %356 = vrot.lane.b32.xlu1 %v274_v27, %s4393_s22  ;;  %v1164_v27 = vsel %vm836_vm2, %v593_v44, %v682_v2 }
 0x11a   :  { %4092 = vmatmul.mubr.msk.bf16.gmra.mrb[28].mxu0 %vm1411_vm5, %v4986_v10 }
 0x11b   :  { %v560_v56 = vpop.permute.xlu0 %559  ;;  %v639_v33 = vpop.permute.xlu1 %638  ;;  %1974 = vmatprep.mubr.bf16.mxu0 %v4395_v28 }
 0x11c   :  { %v594_v51 = vsel %vm364_vm0, %v558_v25, %v560_v56  ;;  %v595_v24 = vsel %vm364_vm0, %v560_v56, %v5578_v15  ;;  %v684_v26 = vsel %vm494_vm1, %v5498_v38, %v639_v33  ;;  %v5654_v25 = vsel %vm364_vm0, %v5578_v15, %v5600_v58 }
 0x11d   :  { %v1167_v59 = vsel %vm836_vm2, %v594_v51, %v5503_v32  ;;  %362 = vrot.lane.b32.xlu0 %v5606_v62, %s4393_s22  ;;  %488 = vrot.lane.b32.xlu1 %v5619_v54, %s4394_s23  ;;  %v1239_v32 = vsel %vm945_vm3, %v1164_v27, %v4801_v36  ;;  %v756_v36 = vsel %vm364_vm0, %v5475_v50, %v5374_v20 }
 0x11e   :  { %v1240_v44 = vsel %vm945_vm3, %v1167_v59, %v4783_v12  ;;  %v1314_v12 = vsel %vm1018_vm4, %v1239_v32, %v756_v36 }
 0x11f   :  { %v5643_v3 = vpop.permute.xlu0 %640  ;;  %v721_v55 = vpop.permute.xlu1 %720 }
 0x120   :  { %v685_v57 = vsel %vm494_vm1, %v639_v33, %v5643_v3  ;;  %v757_v38 = vsel %vm364_vm0, %v5374_v20, %v721_v55  ;;  %v1170_v33 = vsel %vm836_vm2, %v595_v24, %v684_v26  ;;  %v758_v27 = vsel %vm364_vm0, %v721_v55, %v5540_v11 }
 0x121   :  { %v1172_v2 = vsel %vm836_vm2, %v5654_v25, %v685_v57  ;;  %492 = vrot.lane.b32.xlu0 %v5637_v6, %s4394_s23  ;;  %573 = vrot.lane.b32.xlu1 %v5552_v13, %s4393_s22  ;;  %v1317_v56 = vsel %vm1018_vm4, %v1240_v44, %v757_v38  ;;  %v1241_v26 = vsel %vm945_vm3, %v1170_v33, %v4837_v52 }
 0x122   :  { %1944 = vmatprep.subr.bf16.mxu0 %v1317_v56  ;;  %v1242_v59 = vsel %vm945_vm3, %v1172_v2, %v4811_v41  ;;  %v540_v55 = vcombine.high %v5615_v0, %v5615_v0  ;;  %v1320_v32 = vsel %vm1018_vm4, %v1241_v26, %v758_v27  ;;  %v609_v56 = vcombine.high %v5606_v62, %v5606_v62 }
 0x123   :  { %v5676_v20 = vpop.permute.xlu0 %722  ;;  %1945 = vmatpush1.bf16.msra.mxu0 %v1314_v12  ;;  %v5678_v50 = vpop.permute.xlu1 %462  ;;  %v5716_v33 = vcombine.low %v5606_v62, %v5606_v62 }
 0x124   :  { %v759_v51 = vsel %vm364_vm0, %v5540_v11, %v5676_v20 }
 0x125   :  { %575 = vrot.lane.b32.xlu0 %v5649_v45, %s4393_s22  ;;  %577 = vrot.lane.b32.xlu1 %v5615_v0, %s4393_s22  ;;  %v1323_v24 = vsel %vm1018_vm4, %v1242_v59, %v759_v51 }
 0x126   :  { %1997 = vmatprep.subr.bf16.mxu1 %v1323_v24 }
 0x127   :  { %v5695_v57 = vpop.permute.xlu0 %466  ;;  %v5697_v38 = vpop.permute.xlu1 %642  ;;  %1998 = vmatpush1.bf16.msra.mxu1 %v1320_v32 }
 0x128   :  { %v5702_v44 = vsel %vm494_vm1, %v5678_v50, %v5697_v38  ;;  %v822_v36 = vsel %vm494_vm1, %v5697_v38, %v5695_v57 }
 0x129   :  { %579 = vrot.lane.b32.xlu0 %v540_v55, %s4393_s22  ;;  %662 = vrot.lane.b32.xlu1 %v5606_v62, %s4394_s23  ;;  %v1468_v2 = vsel %vm836_vm2, %v5702_v44, 0 }
 0x12a   :  { %4099 = vmatprep.subr.msk.bf16.mxu1 %vm836_vm2, %v822_v36  ;;  %v515_v36 = vsel %vm494_vm1, %v5576_v47, %v5678_v50 }
 0x12b   :  { %v793_v12 = vpop.permute.xlu0 %792  ;;  %v333_v27 = vpop.permute.xlu1 %332  ;;  %2000 = vmatpush1.bf16.msra.mxu1 %v1468_v2 }
 0x12c   :  { %v820_v51 = vsel %vm494_vm1, %v5496_v48, %v793_v12  ;;  %v821_v59 = vsel %vm494_vm1, %v793_v12, %v5678_v50  ;;  %v385_v24 = vsel %vm364_vm0, %v5540_v11, %v333_v27  ;;  %v386_v62 = vsel %vm364_vm0, %v333_v27, %v5578_v15 }
 0x12d   :  { %v1463_v26 = vsel %vm836_vm2, %v820_v51, 0  ;;  %v899_v32 = vsel %vm836_vm2, %v4811_v41, %v385_v24  ;;  %664 = vrot.lane.b32.xlu0 %v609_v56, %s4394_s23  ;;  %736 = vrot.lane.b32.xlu1 %v5716_v33, %s4393_s22  ;;  %v902_v2 = vsel %vm836_vm2, %v4850_v40, %v386_v62  ;;  %v776_v27 = vcombine.high %v5567_v39, %v5567_v39 }
 0x12e   :  { %4096 = vmatprep.subr.msk.bf16.mxu0 %vm836_vm2, %v821_v59  ;;  %4100 = vmatmul.mubr.msk.bf16.vlgmr.msra.gmra.mrb[32].mxu1 %vm1411_vm5, %v4919_v5  ;;  %v987_v12 = vsel %vm945_vm3, %v899_v32, %v515_v36  ;;  %v905_v59 = vsel %vm836_vm2, %v4944_v61, %v5654_v25  ;;  %v1377_v36 = vld [vmem:[%s6989_s2] sm:$0xff] }
 0x12f   :  { %1947 = vmatpush1.bf16.msra.mxu0 %v1463_v26  ;;  %v5736_v48 = vpop.permute.xlu0 %338  ;;  %v465_v11 = vpop.permute.xlu1 %464  ;;  %2037 = vmatprep.mubr.bf16.mxu1 %v4395_v28  ;;  %v1075_v62 = vsel %vm1018_vm4, %v987_v12, %v4797_v29  ;;  %v783_v29 = vrot.slane %v776_v27, %v4435_v8 }
 0x130   :  { %v516_v56 = vsel %vm494_vm1, %v5678_v50, %v465_v11  ;;  %v388_v51 = vsel %vm364_vm0, %v5600_v58, %v5736_v48  ;;  %v517_v47 = vsel %vm494_vm1, %v465_v11, %v5695_v57 }
 0x131   :  { %738 = vrot.lane.b32.xlu0 %v5637_v6, %s4393_s22  ;;  %800 = vrot.lane.b32.xlu1 %v5649_v45, %s4394_s23  ;;  %v989_v40 = vsel %vm945_vm3, %v902_v2, %v516_v56  ;;  %v991_v32 = vsel %vm945_vm3, %v905_v59, %v517_v47  ;;  %v686_v56 = vsel %vm494_vm1, %v5643_v3, %v5678_v50  ;;  %v1380_v47 = vld [vmem:[%s6989_s2 + $0x18] sm:$0xff] }
 0x132   :  { %4097 = vmatmul.mubr.msk.bf16.vlgmr.msra.gmra.mrb[32].mxu0 %vm1411_vm5, %v4919_v5  ;;  %v1078_v39 = vsel %vm1018_vm4, %v989_v40, %v4837_v52  ;;  %v908_v5 = vsel %vm836_vm2, %v5091_v19, %v388_v51 }
 0x133   :  { %v5766_v24 = vpop.permute.xlu0 %468  ;;  %2048 = vmatprep.subr.bf16.mxu0 %v1078_v39  ;;  %v5768_v26 = vpop.permute.xlu1 %342  ;;  %1984 = vmatprep.mubr.bf16.mxu0 %v4395_v28 }
 0x134   :  { %v518_v52 = vsel %vm494_vm1, %v5695_v57, %v5766_v24  ;;  %2049 = vmatpush1.bf16.msra.mxu0 %v1075_v62 }
 0x135   :  { %802 = vrot.lane.b32.xlu0 %v5615_v0, %s4394_s23  ;;  %804 = vrot.lane.b32.xlu1 %v540_v55, %s4394_s23  ;;  %v993_v25 = vsel %vm945_vm3, %v908_v5, %v518_v52  ;;  %v1080_v55 = vsel %vm1018_vm4, %v991_v32, %v4811_v41  ;;  %v1379_v41 = vld [vmem:[%s6989_s2 + $0x10] sm:$0xff] }
 0x136   :  { %4101 = vmatmul.mubr.msk.bf16.gmra.mrb[36].mxu1 %vm1411_vm5, %v4986_v10  ;;  %v1083_v11 = vsel %vm1018_vm4, %v993_v25, %v5116_v23  ;;  %v1378_v23 = vld [vmem:[%s6989_s2 + $0x8] sm:$0xff] }
 0x137   :  { %v5791_v19 = vpop.permute.xlu0 %344  ;;  %v562_v2 = vpop.permute.xlu1 %561  ;;  %2101 = vmatprep.subr.bf16.mxu1 %v1083_v11  ;;  %2133 = vmatprep.mubr.bf16.mxu1 %v4395_v28 }
 0x138   :  { %2102 = vmatpush1.bf16.msra.mxu1 %v1080_v55  ;;  %v596_v8 = vsel %vm364_vm0, %v5600_v58, %v562_v2 }
 0x139   :  { %806 = vrot.lane.b32.xlu0 %v783_v29, %s4394_s23  ;;  %1383 = vperm.xlu1 %4221, %v1377_v36   ;;  %v1175_v27 = vsel %vm836_vm2, %v596_v8, %v686_v56 }
 0x13a   :  { %4098 = vmatmul.mubr.msk.bf16.gmra.mrb[36].mxu0 %vm1411_vm5, %v4986_v10  ;;  %v1244_v59 = vsel %vm945_vm3, %v1175_v27, %v5016_v17  ;;  %v2690_v27 = vld [vmem:[%s6990_s4] sm:$0xff] }
 0x13b   :  { %v564_v12 = vpop.permute.xlu0 %563  ;;  %v645_v58 = vpop.permute.xlu1 %644  ;;  %2080 = vmatprep.mubr.bf16.mxu0 %v4395_v28 }
 0x13c   :  { %v597_v10 = vsel %vm364_vm0, %v562_v2, %v564_v12  ;;  %v598_v3 = vsel %vm364_vm0, %v564_v12, %v5768_v26  ;;  %v688_v50 = vsel %vm494_vm1, %v5697_v38, %v645_v58  ;;  %v760_v38 = vsel %vm364_vm0, %v5676_v20, %v5578_v15 }
 0x13d   :  { %v1178_v51 = vsel %vm836_vm2, %v597_v10, %v5702_v44  ;;  %1388 = vperm.xlu0 %4222, %v1378_v23   ;;  %1393 = vperm.xlu1 %4221, %v1379_v41   ;;  %v391_v44 = vsel %vm364_vm0, %v5768_v26, %v5791_v19  ;;  %v1181_v25 = vsel %vm836_vm2, %v598_v3, %v688_v50  ;;  %v2691_v10 = vld [vmem:[%s6990_s4 + $0x8] sm:$0xff] }
 0x13e   :  { %v1245_v52 = vsel %vm945_vm3, %v1178_v51, %v4944_v61  ;;  %v1326_v29 = vsel %vm1018_vm4, %v1244_v59, %v760_v38  ;;  %v1246_v55 = vsel %vm945_vm3, %v1181_v25, %v5034_v53 }
 0x13f   :  { %v5822_v40 = vpop.permute.xlu0 %646  ;;  %v725_v39 = vpop.permute.xlu1 %724 }
 0x140   :  { %v689_v62 = vsel %vm494_vm1, %v645_v58, %v5822_v40  ;;  %v761_v32 = vsel %vm364_vm0, %v5578_v15, %v725_v39  ;;  %v762_v11 = vsel %vm364_vm0, %v725_v39, %v5736_v48 }
 0x141   :  { %v1183_v5 = vsel %vm836_vm2, %v391_v44, %v689_v62  ;;  %1398 = vperm.xlu1 %4221, %v1380_v47   ;;  %v1329_v17 = vsel %vm1018_vm4, %v1245_v52, %v761_v32  ;;  %v1332_v8 = vsel %vm1018_vm4, %v1246_v55, %v762_v11  ;;  %2694 = vperm.xlu0 %4222, %v2690_v27  }
 0x142   :  { %2050 = vmatprep.subr.bf16.mxu0 %v1329_v17  ;;  %v1247_v20 = vsel %vm945_vm3, %v1183_v5, %v5012_v37 }
 0x143   :  { %v5844_v36 = vpop.permute.xlu0 %726  ;;  %2051 = vmatpush1.bf16.msra.mxu0 %v1326_v29  ;;  %v5846_v61 = vpop.permute.xlu1 %470 }
 0x144   :  { %v763_v15 = vsel %vm364_vm0, %v5736_v48, %v5844_v36  ;;  %v519_v38 = vsel %vm494_vm1, %v5766_v24, %v5846_v61 }
 0x145   :  { %v1335_v2 = vsel %vm1018_vm4, %v1247_v20, %v763_v15  ;;  %2699 = vperm.xlu1 %4221, %v2691_v10   ;;  %v917_v15 = vsel %vm836_vm2, %v5150_v1, %v391_v44 }
 0x146   :  { %2103 = vmatprep.subr.bf16.mxu1 %v1335_v2 }
 0x147   :  { %v5857_v23 = vpop.permute.xlu0 %474  ;;  %v5859_v41 = vpop.permute.xlu1 %648  ;;  %2104 = vmatpush1.bf16.msra.mxu1 %v1332_v8 }
 0x148   :  { %v5864_v56 = vsel %vm494_vm1, %v5846_v61, %v5859_v41  ;;  %v825_v12 = vsel %vm494_vm1, %v5859_v41, %v5857_v23 }
 0x149   :  { %4105 = vmatprep.subr.msk.bf16.mxu1 %vm836_vm2, %v825_v12  ;;  %v1479_v58 = vsel %vm836_vm2, %v5864_v56, 0 }
 0x14b   :  { %v795_v51 = vpop.permute.xlu0 %794  ;;  %v341_v47 = vpop.permute.xlu1 %340  ;;  %2106 = vmatpush1.bf16.msra.mxu1 %v1479_v58  ;;  %v5937_v58 = vld [vmem:[%s6988_s1 + $0x8] sm:$0xff]  }
 0x14c   :  { %v823_v3 = vsel %vm494_vm1, %v5695_v57, %v795_v51  ;;  %v824_v50 = vsel %vm494_vm1, %v795_v51, %v5846_v61  ;;  %v389_v39 = vsel %vm364_vm0, %v5736_v48, %v341_v47  ;;  %v390_v62 = vsel %vm364_vm0, %v341_v47, %v5768_v26  ;;  %v5893_v57 = vld [vmem:[%s6988_s1] sm:$0xff]  }
 0x14d   :  { %v1474_v59 = vsel %vm836_vm2, %v823_v3, 0  ;;  %v911_v32 = vsel %vm836_vm2, %v5012_v37, %v389_v39  ;;  %4102 = vmatprep.subr.msk.bf16.mxu0 %vm836_vm2, %v824_v50  ;;  %v914_v5 = vsel %vm836_vm2, %v5046_v35, %v390_v62 }
 0x14e   :  { %2053 = vmatpush1.bf16.msra.mxu0 %v1474_v59  ;;  %4106 = vmatmul.mubr.msk.bf16.vlgmr.msra.gmra.mrb[40].mxu1 %vm1411_vm5, %v5893_v57  ;;  %v995_v25 = vsel %vm945_vm3, %v911_v32, %v519_v38 }
 0x14f   :  { %v5897_v48 = vpop.permute.xlu0 %346  ;;  %v473_v52 = vpop.permute.xlu1 %472  ;;  %2143 = vmatprep.mubr.bf16.mxu1 %v4395_v28  ;;  %v1086_v55 = vsel %vm1018_vm4, %v995_v25, %v5003_v21 }
 0x150   :  { %v520_v17 = vsel %vm494_vm1, %v5846_v61, %v473_v52  ;;  %v392_v29 = vsel %vm364_vm0, %v5791_v19, %v5897_v48  ;;  %v521_v11 = vsel %vm494_vm1, %v473_v52, %v5857_v23 }
 0x151   :  { %4103 = vmatmul.mubr.msk.bf16.vlgmr.msra.gmra.mrb[40].mxu0 %vm1411_vm5, %v5893_v57  ;;  %v997_v24 = vsel %vm945_vm3, %v914_v5, %v520_v17  ;;  %v999_v8 = vsel %vm945_vm3, %v917_v15, %v521_v11 }
 0x152   :  { %v1089_v35 = vsel %vm1018_vm4, %v997_v24, %v5034_v53  ;;  %2090 = vmatprep.mubr.bf16.mxu0 %v4395_v28  ;;  %v920_v53 = vsel %vm836_vm2, %v5292_v31, %v392_v29  ;;  %v1091_v31 = vsel %vm1018_vm4, %v999_v8, %v5012_v37 }
 0x153   :  { %v5921_v20 = vpop.permute.xlu0 %476  ;;  %2154 = vmatprep.subr.bf16.mxu0 %v1089_v35  ;;  %v5923_v2 = vpop.permute.xlu1 %350 }
 0x154   :  { %v522_v12 = vsel %vm494_vm1, %v5857_v23, %v5921_v20  ;;  %2155 = vmatpush1.bf16.msra.mxu0 %v1086_v55 }
 0x155   :  { %v1001_v44 = vsel %vm945_vm3, %v920_v53, %v522_v12 }
 0x156   :  { %4107 = vmatmul.mubr.msk.bf16.gmra.mrb[44].mxu1 %vm1411_vm5, %v5937_v58  ;;  %v1094_v21 = vsel %vm1018_vm4, %v1001_v44, %v5317_v9  ;;  %v690_v9 = vsel %vm494_vm1, %v5822_v40, %v5846_v61 }
 0x157   :  { %v5943_v27 = vpop.permute.xlu0 %352  ;;  %v566_v10 = vpop.permute.xlu1 %565  ;;  %2207 = vmatprep.subr.bf16.mxu1 %v1094_v21  ;;  %2239 = vmatprep.mubr.bf16.mxu1 %v4395_v28 }
 0x158   :  { %2208 = vmatpush1.bf16.msra.mxu1 %v1091_v31  ;;  %v599_v51 = vsel %vm364_vm0, %v5791_v19, %v566_v10  ;;  %v395_v61 = vsel %vm364_vm0, %v5923_v2, %v5943_v27 }
 0x159   :  { %4104 = vmatmul.mubr.msk.bf16.gmra.mrb[44].mxu0 %vm1411_vm5, %v5937_v58  ;;  %v1186_v50 = vsel %vm836_vm2, %v599_v51, %v690_v9 }
 0x15a   :  { %2186 = vmatprep.mubr.bf16.mxu0 %v4395_v28  ;;  %v1249_v40 = vsel %vm945_vm3, %v1186_v50, %v5217_v30 }
 0x15b   :  { %v568_v47 = vpop.permute.xlu0 %567  ;;  %v651_v3 = vpop.permute.xlu1 %650 }
 0x15c   :  { %v600_v37 = vsel %vm364_vm0, %v566_v10, %v568_v47  ;;  %v601_v19 = vsel %vm364_vm0, %v568_v47, %v5923_v2  ;;  %v692_v59 = vsel %vm494_vm1, %v5859_v41, %v651_v3  ;;  %v764_v41 = vsel %vm364_vm0, %v5844_v36, %v5768_v26 }
 0x15d   :  { %v1189_v39 = vsel %vm836_vm2, %v600_v37, %v5864_v56  ;;  %v1192_v17 = vsel %vm836_vm2, %v601_v19, %v692_v59  ;;  %v1338_v25 = vsel %vm1018_vm4, %v1249_v40, %v764_v41 }
 0x15e   :  { %v1250_v38 = vsel %vm945_vm3, %v1189_v39, %v5150_v1  ;;  %v1251_v35 = vsel %vm945_vm3, %v1192_v17, %v5235_v14 }
 0x15f   :  { %v5964_v62 = vpop.permute.xlu0 %652  ;;  %v729_v32 = vpop.permute.xlu1 %728 }
 0x160   :  { %v693_v52 = vsel %vm494_vm1, %v651_v3, %v5964_v62  ;;  %v765_v56 = vsel %vm364_vm0, %v5768_v26, %v729_v32  ;;  %v766_v29 = vsel %vm364_vm0, %v729_v32, %v5897_v48 }
 0x161   :  { %v1194_v5 = vsel %vm836_vm2, %v395_v61, %v693_v52  ;;  %v1341_v30 = vsel %vm1018_vm4, %v1250_v38, %v765_v56  ;;  %v1344_v15 = vsel %vm1018_vm4, %v1251_v35, %v766_v29 }
 0x162   :  { %2156 = vmatprep.subr.bf16.mxu0 %v1341_v30  ;;  %v1252_v36 = vsel %vm945_vm3, %v1194_v5, %v5213_v49 }
 0x163   :  { %v5986_v11 = vpop.permute.xlu0 %730  ;;  %2157 = vmatpush1.bf16.msra.mxu0 %v1338_v25  ;;  %v479_v1 = vpop.permute.xlu1 %478 }
 0x164   :  { %v767_v26 = vsel %vm364_vm0, %v5897_v48, %v5986_v11 }
 0x165   :  { %v1347_v24 = vsel %vm1018_vm4, %v1252_v36, %v767_v26 }
 0x166   :  { %2209 = vmatprep.subr.bf16.mxu1 %v1347_v24 }
 0x167   :  { %v5997_v55 = vpop.permute.xlu0 %482  ;;  %v655_v8 = vpop.permute.xlu1 %654  ;;  %2210 = vmatpush1.bf16.msra.mxu1 %v1344_v15 }
 0x168   :  { %v695_v12 = vsel %vm494_vm1, %v479_v1, %v655_v8  ;;  %v828_v53 = vsel %vm494_vm1, %v655_v8, %v5997_v55 }
 0x169   :  { %4111 = vmatprep.subr.msk.bf16.mxu1 %vm836_vm2, %v828_v53  ;;  %v1490_v44 = vsel %vm836_vm2, %v695_v12, 0 }
 0x16b   :  { %v797_v21 = vpop.permute.xlu0 %796  ;;  %v349_v10 = vpop.permute.xlu1 %348  ;;  %2212 = vmatpush1.bf16.msra.mxu1 %v1490_v44 }
 0x16c   :  { %v826_v31 = vsel %vm494_vm1, %v5857_v23, %v797_v21  ;;  %v827_v51 = vsel %vm494_vm1, %v797_v21, %v479_v1  ;;  %v393_v9 = vsel %vm364_vm0, %v5897_v48, %v349_v10  ;;  %v394_v3 = vsel %vm364_vm0, %v349_v10, %v5923_v2 }
 0x16d   :  { %v1485_v47 = vsel %vm836_vm2, %v826_v31, 0  ;;  %v923_v50 = vsel %vm836_vm2, %v5213_v49, %v393_v9  ;;  %4108 = vmatprep.subr.msk.bf16.mxu0 %vm836_vm2, %v827_v51  ;;  %v523_v48 = vsel %vm494_vm1, %v5921_v20, %v479_v1  ;;  %v926_v39 = vsel %vm836_vm2, %v5247_v63, %v394_v3 }
 0x16e   :  { %2159 = vmatpush1.bf16.msra.mxu0 %v1485_v47  ;;  %4112 = vmatmul.mubr.msk.bf16.vlgmr.msra.gmra.mrb[48].mxu1 %vm1411_vm5, %v5893_v57  ;;  %v1003_v59 = vsel %vm945_vm3, %v923_v50, %v523_v48  ;;  %v929_v63 = vsel %vm836_vm2, %v5351_v60, %v395_v61  ;;  %v768_v10 = vsel %vm364_vm0, %v5986_v11, %v5923_v2 }
 0x16f   :  { %v6017_v23 = vpop.permute.xlu0 %354  ;;  %v481_v37 = vpop.permute.xlu1 %480  ;;  %2249 = vmatprep.mubr.bf16.mxu1 %v4395_v28  ;;  %v1097_v41 = vsel %vm1018_vm4, %v1003_v59, %v5204_v34 }
 0x170   :  { %v524_v19 = vsel %vm494_vm1, %v479_v1, %v481_v37  ;;  %v396_v32 = vsel %vm364_vm0, %v5943_v27, %v6017_v23  ;;  %v525_v40 = vsel %vm494_vm1, %v481_v37, %v5997_v55 }
 0x171   :  { %4109 = vmatmul.mubr.msk.bf16.vlgmr.msra.gmra.mrb[48].mxu0 %vm1411_vm5, %v5893_v57  ;;  %v1005_v20 = vsel %vm945_vm3, %v926_v39, %v524_v19  ;;  %v1007_v5 = vsel %vm945_vm3, %v929_v63, %v525_v40 }
 0x172   :  { %v1100_v52 = vsel %vm1018_vm4, %v1005_v20, %v5235_v14  ;;  %2196 = vmatprep.mubr.bf16.mxu0 %v4395_v28  ;;  %v932_v14 = vsel %vm836_vm2, %v5493_v43, %v396_v32  ;;  %v1102_v29 = vsel %vm1018_vm4, %v1007_v5, %v5213_v49 }
 0x173   :  { %v6039_v56 = vpop.permute.xlu0 %484  ;;  %2260 = vmatprep.subr.bf16.mxu0 %v1100_v52  ;;  %v6041_v38 = vpop.permute.xlu1 %358 }
 0x174   :  { %v526_v30 = vsel %vm494_vm1, %v5997_v55, %v6039_v56  ;;  %2261 = vmatpush1.bf16.msra.mxu0 %v1097_v41 }
 0x175   :  { %v1009_v61 = vsel %vm945_vm3, %v932_v14, %v526_v30 }
 0x176   :  { %4113 = vmatmul.mubr.msk.bf16.gmra.mrb[52].mxu1 %vm1411_vm5, %v5937_v58  ;;  %v1105_v17 = vsel %vm1018_vm4, %v1009_v61, %v5518_v16  ;;  %v694_v16 = vsel %vm494_vm1, %v5964_v62, %v479_v1 }
 0x177   :  { %v6056_v25 = vpop.permute.xlu0 %360  ;;  %v570_v34 = vpop.permute.xlu1 %569  ;;  %2313 = vmatprep.subr.bf16.mxu1 %v1105_v17  ;;  %2345 = vmatprep.mubr.bf16.mxu1 %v4395_v28 }
 0x178   :  { %2314 = vmatpush1.bf16.msra.mxu1 %v1102_v29  ;;  %v602_v43 = vsel %vm364_vm0, %v5943_v27, %v570_v34  ;;  %v6081_v62 = vsel %vm364_vm0, %v6041_v38, %v6056_v25 }
 0x179   :  { %4110 = vmatmul.mubr.msk.bf16.gmra.mrb[52].mxu0 %vm1411_vm5, %v5937_v58  ;;  %v1197_v24 = vsel %vm836_vm2, %v602_v43, %v694_v16 }
 0x17a   :  { %2292 = vmatprep.mubr.bf16.mxu0 %v4395_v28  ;;  %v1254_v21 = vsel %vm945_vm3, %v1197_v24, %v5418_v42 }
 0x17b   :  { %v572_v26 = vpop.permute.xlu0 %571  ;;  %v657_v36 = vpop.permute.xlu1 %656  ;;  %v1350_v47 = vsel %vm1018_vm4, %v1254_v21, %v768_v10 }
 0x17c   :  { %v603_v49 = vsel %vm364_vm0, %v570_v34, %v572_v26  ;;  %v604_v15 = vsel %vm364_vm0, %v572_v26, %v6041_v38  ;;  %v696_v27 = vsel %vm494_vm1, %v655_v8, %v657_v36 }
 0x17d   :  { %v1200_v35 = vsel %vm836_vm2, %v603_v49, %v695_v12  ;;  %v1203_v9 = vsel %vm836_vm2, %v604_v15, %v696_v27 }
 0x17e   :  { %v1255_v8 = vsel %vm945_vm3, %v1200_v35, %v5351_v60  ;;  %v1256_v19 = vsel %vm945_vm3, %v1203_v9, %v5436_v22 }
 0x17f   :  { %v6074_v53 = vpop.permute.xlu0 %658  ;;  %v733_v44 = vpop.permute.xlu1 %732 }
 0x180   :  { %v697_v1 = vsel %vm494_vm1, %v657_v36, %v6074_v53  ;;  %v769_v12 = vsel %vm364_vm0, %v5923_v2, %v733_v44  ;;  %v770_v60 = vsel %vm364_vm0, %v733_v44, %v6017_v23 }
 0x181   :  { %v1205_v42 = vsel %vm836_vm2, %v6081_v62, %v697_v1  ;;  %v1353_v31 = vsel %vm1018_vm4, %v1255_v8, %v769_v12  ;;  %v6095_v51 = vpop.f32.mrb[0].mxu1  ;;  %v1356_v40 = vsel %vm1018_vm4, %v1256_v19, %v770_v60  ;;  %v941_v60 = vsel %vm836_vm2, %v5552_v13, %v6081_v62 }
 0x182   :  { %2262 = vmatprep.subr.bf16.mxu0 %v1353_v31  ;;  %v6099_v3 = vpop.f32.mrb[1].mxu1  ;;  %v1257_v37 = vsel %vm945_vm3, %v1205_v42, %v5414_v7 }
 0x183   :  { %v6103_v50 = vpop.permute.xlu0 %734  ;;  %2263 = vmatpush1.bf16.msra.mxu0 %v1350_v47  ;;  %v6105_v2 = vpop.permute.xlu1 %486 }
 0x184   :  { %v771_v11 = vsel %vm364_vm0, %v6017_v23, %v6103_v50  ;;  %v6112_v48 = vpop.f32.mrb[2].mxu1  ;;  %v527_v1 = vsel %vm494_vm1, %v6039_v56, %v6105_v2 }
 0x185   :  { %v1359_v39 = vsel %vm1018_vm4, %v1257_v37, %v771_v11  ;;  %v6117_v59 = vpop.f32.mrb[0].mxu0  ;;  %v6119_v32 = vpop.f32.mrb[3].mxu1 }
 0x186   :  { %2315 = vmatprep.subr.bf16.mxu1 %v1359_v39  ;;  %v6122_v20 = vpop.f32.mrb[1].mxu0 }
 0x187   :  { %v6124_v52 = vpop.permute.xlu0 %490  ;;  %v6126_v63 = vpop.permute.xlu1 %660  ;;  %2316 = vmatpush1.bf16.msra.mxu1 %v1356_v40 }
 0x188   :  { %v6131_v41 = vsel %vm494_vm1, %v6105_v2, %v6126_v63  ;;  %v831_v5 = vsel %vm494_vm1, %v6126_v63, %v6124_v52  ;;  %v6136_v30 = vpop.f32.mrb[2].mxu0 }
 0x189   :  { %4117 = vmatprep.subr.msk.bf16.mxu1 %vm836_vm2, %v831_v5  ;;  %v1501_v14 = vsel %vm836_vm2, %v6131_v41, 0  ;;  %v6141_v61 = vpop.f32.mrb[3].mxu0  ;;  %v6143_v17 = vpop.f32.mrb[4].mxu1 }
 0x18a   :  { %v6145_v34 = vpop.f32.mrb[5].mxu1 }
 0x18b   :  { %v799_v29 = vpop.permute.xlu0 %798  ;;  %v357_v43 = vpop.permute.xlu1 %356  ;;  %2318 = vmatpush1.bf16.msra.mxu1 %v1501_v14 }
 0x18c   :  { %v829_v16 = vsel %vm494_vm1, %v5997_v55, %v799_v29  ;;  %v830_v26 = vsel %vm494_vm1, %v799_v29, %v6105_v2  ;;  %v397_v36 = vsel %vm364_vm0, %v6017_v23, %v357_v43  ;;  %v6153_v24 = vpop.f32.mrb[6].mxu1  ;;  %v398_v35 = vsel %vm364_vm0, %v357_v43, %v6041_v38 }
 0x18d   :  { %v1496_v49 = vsel %vm836_vm2, %v829_v16, 0  ;;  %v935_v15 = vsel %vm836_vm2, %v5414_v7, %v397_v36  ;;  %4114 = vmatprep.subr.msk.bf16.mxu0 %vm836_vm2, %v830_v26  ;;  %v6161_v27 = vpop.f32.mrb[4].mxu0  ;;  %v6163_v55 = vpop.f32.mrb[7].mxu1  ;;  %v938_v12 = vsel %vm836_vm2, %v5448_v18, %v398_v35 }
 0x18e   :  { %2265 = vmatpush1.bf16.msra.mxu0 %v1496_v49  ;;  %4118 = vmatmul.mubr.msk.bf16.vlgmr.msra.gmra.mrb[56].mxu1 %vm1411_vm5, %v5893_v57  ;;  %v6167_v23 = vpop.f32.mrb[5].mxu0  ;;  %v1011_v10 = vsel %vm945_vm3, %v935_v15, %v527_v1 }
 0x18f   :  { %v6169_v44 = vpop.permute.xlu0 %362  ;;  %v489_v21 = vpop.permute.xlu1 %488  ;;  %2355 = vmatprep.mubr.bf16.mxu1 %v4395_v28  ;;  %v1108_v39 = vsel %vm1018_vm4, %v1011_v10, %v5405_v46 }
 0x190   :  { %v528_v8 = vsel %vm494_vm1, %v6105_v2, %v489_v21  ;;  %v6180_v42 = vpop.f32.mrb[6].mxu0  ;;  %v400_v31 = vsel %vm364_vm0, %v6056_v25, %v6169_v44  ;;  %v529_v9 = vsel %vm494_vm1, %v489_v21, %v6124_v52 }
 0x191   :  { %4115 = vmatmul.mubr.msk.bf16.vlgmr.msra.gmra.mrb[56].mxu0 %vm1411_vm5, %v5893_v57  ;;  %v1013_v56 = vsel %vm945_vm3, %v938_v12, %v528_v8  ;;  %v6190_v18 = vpop.f32.mrb[7].mxu0  ;;  %v944_v19 = vsel %vm836_vm2, %v5649_v45, %v400_v31  ;;  %v1015_v40 = vsel %vm945_vm3, %v941_v60, %v529_v9 }
 0x192   :  { %v1111_v47 = vsel %vm1018_vm4, %v1013_v56, %v5436_v22  ;;  %2302 = vmatprep.mubr.bf16.mxu0 %v4395_v28  ;;  %v1113_v46 = vsel %vm1018_vm4, %v1015_v40, %v5414_v7 }
 0x193   :  { %v493_v11 = vpop.permute.xlu0 %492  ;;  %2366 = vmatprep.subr.bf16.mxu0 %v1111_v47  ;;  %v574_v37 = vpop.permute.xlu1 %573 }
 0x194   :  { %v530_v22 = vsel %vm494_vm1, %v6124_v52, %v493_v11  ;;  %2367 = vmatpush1.bf16.msra.mxu0 %v1108_v39  ;;  %v605_v45 = vsel %vm364_vm0, %v6056_v25, %v574_v37 }
 0x195   :  { %v1017_v5 = vsel %vm945_vm3, %v944_v19, %v530_v22 }
 0x196   :  { %4119 = vmatmul.mubr.msk.bf16.gmra.mrb[60].mxu1 %vm1411_vm5, %v5937_v58  ;;  %v1116_v62 = vsel %vm1018_vm4, %v1017_v5, %v5716_v33  ;;  %v698_v33 = vsel %vm494_vm1, %v6074_v53, %v6105_v2 }
 0x197   :  { %v576_v14 = vpop.permute.xlu0 %575  ;;  %v578_v29 = vpop.permute.xlu1 %577  ;;  %2419 = vmatprep.subr.bf16.mxu1 %v1116_v62  ;;  %2451 = vmatprep.mubr.bf16.mxu1 %v4395_v28  ;;  %v1208_v7 = vsel %vm836_vm2, %v605_v45, %v698_v33 }
 0x198   :  { %2420 = vmatpush1.bf16.msra.mxu1 %v1113_v46  ;;  %v606_v43 = vsel %vm364_vm0, %v574_v37, %v576_v14  ;;  %v1259_v15 = vsel %vm945_vm3, %v1208_v7, %v5619_v54 }
 0x199   :  { %4116 = vmatmul.mubr.msk.bf16.gmra.mrb[60].mxu0 %vm1411_vm5, %v5937_v58  ;;  %v1211_v36 = vsel %vm836_vm2, %v606_v43, %v6131_v41  ;;  %v772_v41 = vsel %vm364_vm0, %v6103_v50, %v6041_v38 }
 0x19a   :  { %2398 = vmatprep.mubr.bf16.mxu0 %v4395_v28  ;;  %v1260_v2 = vsel %vm945_vm3, %v1211_v36, %v5552_v13  ;;  %v1362_v31 = vsel %vm1018_vm4, %v1259_v15, %v772_v41 }
 0x19b   :  { %v580_v16 = vpop.permute.xlu0 %579  ;;  %v663_v26 = vpop.permute.xlu1 %662 }
 0x19c   :  { %v700_v25 = vsel %vm494_vm1, %v6126_v63, %v663_v26  ;;  %v608_v21 = vsel %vm364_vm0, %v578_v29, %v580_v16  ;;  %v607_v63 = vsel %vm364_vm0, %v576_v14, %v578_v29 }
 0x19d   :  { %v1214_v10 = vsel %vm836_vm2, %v607_v63, %v700_v25 }
 0x19e   :  { %v1262_v37 = vsel %vm945_vm3, %v1214_v10, %v5637_v6 }
 0x19f   :  { %v665_v49 = vpop.permute.xlu0 %664  ;;  %v737_v35 = vpop.permute.xlu1 %736 }
 0x1a0   :  { %v701_v1 = vsel %vm494_vm1, %v663_v26, %v665_v49  ;;  %v773_v53 = vsel %vm364_vm0, %v6041_v38, %v737_v35  ;;  %v774_v13 = vsel %vm364_vm0, %v737_v35, %v6169_v44 }
 0x1a1   :  { %v1217_v12 = vsel %vm836_vm2, %v608_v21, %v701_v1  ;;  %v1365_v54 = vsel %vm1018_vm4, %v1260_v2, %v773_v53  ;;  %v1711_v8 = vpop.f32.mrb[8].mxu1  ;;  %v1368_v22 = vsel %vm1018_vm4, %v1262_v37, %v774_v13 }
 0x1a2   :  { %2368 = vmatprep.subr.bf16.mxu0 %v1365_v54  ;;  %v1713_v9 = vpop.f32.mrb[9].mxu1  ;;  %v1264_v50 = vsel %vm945_vm3, %v1217_v12, %v5615_v0 }
 0x1a3   :  { %v739_v56 = vpop.permute.xlu0 %738  ;;  %2369 = vmatpush1.bf16.msra.mxu0 %v1362_v31  ;;  %v801_v47 = vpop.permute.xlu1 %800 }
 0x1a4   :  { %v775_v38 = vsel %vm364_vm0, %v6169_v44, %v739_v56  ;;  %v6249_v60 = vpop.f32.mrb[10].mxu1  ;;  %v832_v40 = vsel %vm494_vm1, %v6124_v52, %v801_v47 }
 0x1a5   :  { %v1371_v11 = vsel %vm1018_vm4, %v1264_v50, %v775_v38  ;;  %v1658_v39 = vpop.f32.mrb[8].mxu0  ;;  %v6254_v19 = vpop.f32.mrb[11].mxu1  ;;  %v1507_v29 = vsel %vm836_vm2, %v832_v40, 0 }
 0x1a6   :  { %2421 = vmatprep.subr.bf16.mxu1 %v1371_v11  ;;  %v1660_v44 = vpop.f32.mrb[9].mxu0 }
 0x1a7   :  { %v803_v5 = vpop.permute.xlu0 %802  ;;  %v805_v62 = vpop.permute.xlu1 %804  ;;  %2422 = vmatpush1.bf16.msra.mxu1 %v1368_v22 }
 0x1a8   :  { %v833_v0 = vsel %vm494_vm1, %v801_v47, %v803_v5  ;;  %v1662_v14 = vpop.f32.mrb[10].mxu0  ;;  %v834_v52 = vsel %vm494_vm1, %v803_v5, %v805_v62 }
 0x1a9   :  { %4120 = vmatprep.subr.msk.bf16.mxu0 %vm836_vm2, %v833_v0  ;;  %v6262_v6 = vpop.f32.mrb[11].mxu0  ;;  %v6264_v46 = vpop.f32.mrb[12].mxu1  ;;  %v1513_v7 = vsel %vm836_vm2, %v834_v52, 0 }
 0x1aa   :  { %2371 = vmatpush1.bf16.msra.mxu0 %v1507_v29  ;;  %v6267_v45 = vpop.f32.mrb[13].mxu1 }
 0x1ab   :  { %v807_v43 = vpop.permute.xlu0 %806  ;;  %v6269_v33 = vpop.f32.mrb[14].mxu1 }
 0x1ac   :  { %v835_v16 = vsel %vm494_vm1, %v805_v62, %v807_v43  ;;  %v6272_v26 = vpop.f32.mrb[15].mxu1 }
 0x1ad   :  { %4121 = vmatmul.mubr.msk.bf16.vlgmr.msra.gmra.mrb[64].mxu0 %vm1411_vm5, %v5893_v57  ;;  %4123 = vmatprep.subr.msk.bf16.mxu1 %vm836_vm2, %v835_v16  ;;  %v6278_v36 = vpop.f32.mrb[12].mxu0 }
 0x1ae   :  { %2424 = vmatpush1.bf16.msra.mxu1 %v1513_v7  ;;  %2408 = vmatprep.mubr.bf16.mxu0 %v4395_v28  ;;  %v6281_v25 = vpop.f32.mrb[13].mxu0 }
 0x1af   :  { %v6283_v49 = vpop.f32.mrb[14].mxu0 }
 0x1b0   :  { %v6285_v35 = vpop.f32.mrb[15].mxu0 }
 0x1b1   :  { %4124 = vmatmul.mubr.msk.bf16.vlgmr.msra.gmra.mrb[64].mxu1 %vm1411_vm5, %v5893_v57 }
 0x1b2   :  { %2461 = vmatprep.mubr.bf16.mxu1 %v4395_v28 }
 0x1b5   :  { %4122 = vmatmul.mubr.msk.bf16.gmra.mrb[68].mxu0 %vm1411_vm5, %v5937_v58 }
 0x1b6   :  { %2743 = vmatprep.mubr.bf16.mxu0 %v4395_v28 }
 0x1b8   :  { %v6293_v15 = vpop.permute.xlu1 %1383 }
 0x1b9   :  { %v6297_v21 = vadd.f32 %v6117_v59, %v6293_v15  ;;  %v6301_v1 = vadd.f32 %v6095_v51, %v6293_v15  ;;  %4125 = vmatmul.mubr.msk.bf16.gmra.mrb[68].mxu1 %vm1411_vm5, %v5937_v58  ;;  %v1555_v57 = vadd.f32 %v6122_v20, %v6293_v15  ;;  %v1608_v53 = vadd.f32 %v6099_v3, %v6293_v15 }
 0x1ba   :  { %v1659_v2 = vadd.f32 %v1658_v39, %v6293_v15  ;;  %v1712_v41 = vadd.f32 %v1711_v8, %v6293_v15  ;;  %v1661_v59 = vadd.f32 %v1660_v44, %v6293_v15  ;;  %v1714_v63 = vadd.f32 %v1713_v9, %v6293_v15  ;;  %2786 = vmatprep.mubr.bf16.mxu1 %v4395_v28 }
 0x1bb   :  { %v2472_v51 = vmax.f32 %v6297_v21, 0.0  ;;  %v2474_v58 = vmax.f32 %v6301_v1, 0.0  ;;  %v2473_v12 = vmax.f32 %v1555_v57, 0.0  ;;  %v2475_v54 = vmax.f32 %v1608_v53, 0.0 }
 0x1bc   :  { %v6316_v20 = vpop.permute.xlu0 %1388  ;;  %v6318_v10 = vpop.permute.xlu1 %1393  ;;  %v2476_v3 = vmax.f32 %v1659_v2, 0.0  ;;  %v2478_v31 = vmax.f32 %v1712_v41, 0.0  ;;  %v2477_v13 = vmax.f32 %v1661_v59, 0.0  ;;  %v2479_v8 = vmax.f32 %v1714_v63, 0.0 }
 0x1bd   :  { %v1559_v56 = vadd.f32 %v6141_v61, %v6316_v20  ;;  %v1612_v9 = vadd.f32 %v6119_v32, %v6316_v20  ;;  %v6326_v47 = vadd.f32 %v6161_v27, %v6318_v10  ;;  %v6330_v38 = vadd.f32 %v6143_v17, %v6318_v10 }
 0x1be   :  { %v6334_v50 = vadd.f32 %v6167_v23, %v6318_v10  ;;  %v1618_v11 = vadd.f32 %v6145_v34, %v6318_v10  ;;  %v1663_v61 = vadd.f32 %v1662_v14, %v6316_v20  ;;  %v1716_v32 = vadd.f32 %v6249_v60, %v6316_v20 }
 0x1bf   :  { %v2509_v37 = vmax.f32 %v1559_v56, 0.0  ;;  %v2511_v39 = vmax.f32 %v1612_v9, 0.0  ;;  %v2544_v27 = vmax.f32 %v6326_v47, 0.0  ;;  %v2546_v40 = vmax.f32 %v6330_v38, 0.0  ;;  %v6409_v38 = vld [vmem:[%s6991_s3] sm:$0xff]  }
 0x1c0   :  { %v2545_v17 = vmax.f32 %v6334_v50, 0.0  ;;  %v2547_v22 = vmax.f32 %v1618_v11, 0.0  ;;  %v6344_v44 = vpop.permute.xlu1 %1398  ;;  %v2512_v23 = vmax.f32 %v1663_v61, 0.0  ;;  %v2514_v5 = vmax.f32 %v1716_v32, 0.0 }
 0x1c1   :  { %v2617_v62 = vpack.c.bf16 %v2509_v37, %v2473_v12  ;;  %v2619_v34 = vpack.c.bf16 %v2511_v39, %v2475_v54  ;;  %v1622_v0 = vadd.f32 %v6163_v55, %v6344_v44  ;;  %v1665_v60 = vadd.f32 %v6262_v6, %v6316_v20  ;;  %v6350_v14 = vpop.f32.mrb[16].mxu1 }
 0x1c2   :  { %v6352_v29 = vpack.c.bf16 %v2512_v23, %v2476_v3  ;;  %v6354_v52 = vpack.c.bf16 %v2514_v5, %v2478_v31  ;;  %v1718_v43 = vadd.f32 %v6254_v19, %v6316_v20  ;;  %v1557_v16 = vadd.f32 %v6136_v30, %v6316_v20  ;;  %v6360_v7 = vpop.f32.mrb[17].mxu1 }
 0x1c3   :  { %v2583_v21 = vmax.f32 %v1622_v0, 0.0  ;;  %2711 = vmatprep.subr.bf16.mxu0 %v2617_v62  ;;  %2754 = vmatprep.subr.bf16.mxu1 %v2619_v34  ;;  %v2513_v55 = vmax.f32 %v1665_v60, 0.0  ;;  %v1610_v6 = vadd.f32 %v6112_v48, %v6316_v20  ;;  %v1669_v1 = vadd.f32 %v6278_v36, %v6318_v10  ;;  %v1821_v57 = vpop.f32.mrb[18].mxu1 }
 0x1c4   :  { %v2515_v53 = vmax.f32 %v1718_v43, 0.0  ;;  %v2508_v2 = vmax.f32 %v1557_v16, 0.0  ;;  %v1722_v19 = vadd.f32 %v6264_v46, %v6318_v10  ;;  %v1671_v30 = vadd.f32 %v6281_v25, %v6318_v10  ;;  %v1823_v41 = vpop.f32.mrb[19].mxu1 }
 0x1c5   :  { %v2655_v59 = vpack.c.bf16 %v2583_v21, %v2547_v22  ;;  %v6370_v63 = vpack.c.bf16 %v2513_v55, %v2477_v13  ;;  %v2510_v12 = vmax.f32 %v1610_v6, 0.0  ;;  %v2548_v54 = vmax.f32 %v1669_v1, 0.0  ;;  %v1764_v3 = vpop.f32.mrb[16].mxu0 }
 0x1c6   :  { %v2623_v48 = vpack.c.bf16 %v2515_v53, %v2479_v8  ;;  %v2616_v31 = vpack.c.bf16 %v2508_v2, %v2472_v51  ;;  %v2550_v56 = vmax.f32 %v1722_v19, 0.0  ;;  %v2549_v36 = vmax.f32 %v1671_v30, 0.0  ;;  %v1766_v9 = vpop.f32.mrb[17].mxu0 }
 0x1c7   :  { %v2618_v11 = vpack.c.bf16 %v2510_v12, %v2474_v58  ;;  %v1724_v61 = vadd.f32 %v6267_v45, %v6318_v10  ;;  %v1673_v46 = vadd.f32 %v6283_v49, %v6344_v44  ;;  %v1726_v25 = vadd.f32 %v6269_v33, %v6344_v44  ;;  %v1768_v13 = vpop.f32.mrb[18].mxu0 }
 0x1c8   :  { %2712 = vmatpush1.bf16.msra.mxu0 %v2616_v31  ;;  %v1569_v8 = vadd.f32 %v6190_v18, %v6344_v44  ;;  %v1675_v51 = vadd.f32 %v6285_v35, %v6344_v44  ;;  %v1728_v58 = vadd.f32 %v6272_v26, %v6344_v44  ;;  %v1567_v45 = vadd.f32 %v6180_v42, %v6344_v44  ;;  %v1770_v32 = vpop.f32.mrb[19].mxu0 }
 0x1c9   :  { %2755 = vmatpush1.bf16.msra.mxu1 %v2618_v11  ;;  %v2551_v49 = vmax.f32 %v1724_v61, 0.0  ;;  %v2584_v37 = vmax.f32 %v1673_v46, 0.0  ;;  %v2586_v33 = vmax.f32 %v1726_v25, 0.0  ;;  %v1620_v39 = vadd.f32 %v6153_v24, %v6344_v44  ;;  %v1827_v22 = vpop.f32.mrb[20].mxu1 }
 0x1ca   :  { %v2581_v23 = vmax.f32 %v1569_v8, 0.0  ;;  %2756 = vmatprep.subr.bf16.mxu1 %v2655_v59  ;;  %v2585_v18 = vmax.f32 %v1675_v51, 0.0  ;;  %v2587_v5 = vmax.f32 %v1728_v58, 0.0  ;;  %v2580_v35 = vmax.f32 %v1567_v45, 0.0  ;;  %v1829_v62 = vpop.f32.mrb[21].mxu1 }
 0x1cb   :  { %v6388_v34 = vpack.c.bf16 %v2584_v37, %v2548_v54  ;;  %v6390_v26 = vpack.c.bf16 %v2586_v33, %v2550_v56  ;;  %v2582_v42 = vmax.f32 %v1620_v39, 0.0  ;;  %v1765_v0 = vadd.f32 %v1764_v3, %v6293_v15  ;;  %v1831_v60 = vpop.f32.mrb[22].mxu1 }
 0x1cc   :  { %v2653_v43 = vpack.c.bf16 %v2581_v23, %v2545_v17  ;;  %v2657_v16 = vpack.c.bf16 %v2585_v18, %v2549_v36  ;;  %v2659_v24 = vpack.c.bf16 %v2587_v5, %v2551_v49  ;;  %v2652_v21 = vpack.c.bf16 %v2580_v35, %v2544_v27  ;;  %v1833_v55 = vpop.f32.mrb[23].mxu1 }
 0x1cd   :  { %v2654_v6 = vpack.c.bf16 %v2582_v42, %v2546_v40  ;;  %v2480_v1 = vmax.f32 %v1765_v0, 0.0  ;;  %v1818_v53 = vadd.f32 %v6350_v14, %v6293_v15  ;;  %v1767_v2 = vadd.f32 %v1766_v9, %v6293_v15  ;;  %v1774_v19 = vpop.f32.mrb[20].mxu0 }
 0x1ce   :  { %2713 = vmatprep.subr.bf16.mxu0 %v2653_v43  ;;  %v1820_v50 = vadd.f32 %v6360_v7, %v6293_v15  ;;  %v1769_v17 = vadd.f32 %v1768_v13, %v6316_v20  ;;  %v1822_v47 = vadd.f32 %v1821_v57, %v6316_v20  ;;  %v1771_v27 = vadd.f32 %v1770_v32, %v6316_v20  ;;  %v1776_v40 = vpop.f32.mrb[21].mxu0 }
 0x1cf   :  { %2714 = vmatpush1.bf16.msra.mxu0 %v2652_v21  ;;  %2757 = vmatpush1.bf16.msra.mxu1 %v2654_v6  ;;  %v2482_v14 = vmax.f32 %v1818_v53, 0.0  ;;  %v2481_v30 = vmax.f32 %v1767_v2, 0.0  ;;  %v1824_v59 = vadd.f32 %v1823_v41, %v6316_v20  ;;  %v1775_v7 = vadd.f32 %v1774_v19, %v6318_v10  ;;  %v1778_v12 = vpop.f32.mrb[22].mxu0 }
 0x1d0   :  { %v2483_v54 = vmax.f32 %v1820_v50, 0.0  ;;  %v2516_v3 = vmax.f32 %v1769_v17, 0.0  ;;  %v2518_v57 = vmax.f32 %v1822_v47, 0.0  ;;  %2797 = vmatprep.subr.bf16.mxu0 %v6370_v63  ;;  %2840 = vmatprep.subr.bf16.mxu1 %v2623_v48  ;;  %v2517_v31 = vmax.f32 %v1771_v27, 0.0  ;;  %v1780_v56 = vpop.f32.mrb[23].mxu0 }
 0x1d1   :  { %v2519_v36 = vmax.f32 %v1824_v59, 0.0  ;;  %v1828_v9 = vadd.f32 %v1827_v22, %v6318_v10  ;;  %v1777_v11 = vadd.f32 %v1776_v40, %v6318_v10  ;;  %v2552_v63 = vmax.f32 %v1775_v7, 0.0 }
 0x1d2   :  { %v2624_v61 = vpack.c.bf16 %v2516_v3, %v2480_v1  ;;  %v2626_v46 = vpack.c.bf16 %v2518_v57, %v2482_v14  ;;  %4127 = vmatmul.mubr.msk.bf16.vlgmr.msra.gmra.mrb[72].mxu0 %vm2707_vm6, %v6409_v38  ;;  %4128 = vmatmul.mubr.msk.bf16.vlgmr.msra.gmra.mrb[72].mxu1 %vm2707_vm6, %v6409_v38  ;;  %v2625_v41 = vpack.c.bf16 %v2517_v31, %v2481_v30 }
 0x1d3   :  { %v2627_v25 = vpack.c.bf16 %v2519_v36, %v2483_v54  ;;  %2798 = vmatpush1.bf16.msra.mxu0 %v6352_v29  ;;  %2841 = vmatpush1.bf16.msra.mxu1 %v6354_v52  ;;  %v2554_v48 = vmax.f32 %v1828_v9, 0.0  ;;  %v1830_v13 = vadd.f32 %v1829_v62, %v6318_v10  ;;  %v2553_v8 = vmax.f32 %v1777_v11, 0.0 }
 0x1d4   :  { %v1779_v51 = vadd.f32 %v1778_v12, %v6344_v44  ;;  %v1832_v58 = vadd.f32 %v1831_v60, %v6344_v44  ;;  %2799 = vmatprep.subr.bf16.mxu0 %v2657_v16  ;;  %2842 = vmatprep.subr.bf16.mxu1 %v2659_v24  ;;  %v1781_v45 = vadd.f32 %v1780_v56, %v6344_v44 }
 0x1d5   :  { %v2555_v32 = vmax.f32 %v1830_v13, 0.0  ;;  %v1834_v49 = vadd.f32 %v1833_v55, %v6344_v44  ;;  %2829 = vmatprep.mubr.bf16.mxu0 %v4395_v28  ;;  %2872 = vmatprep.mubr.bf16.mxu1 %v4395_v28 }
 0x1d6   :  { %v2588_v29 = vmax.f32 %v1779_v51, 0.0  ;;  %v2590_v52 = vmax.f32 %v1832_v58, 0.0  ;;  %v2589_v37 = vmax.f32 %v1781_v45, 0.0 }
 0x1d7   :  { %v2591_v33 = vmax.f32 %v1834_v49, 0.0  ;;  %2800 = vmatpush1.bf16.msra.mxu0 %v6388_v34  ;;  %2843 = vmatpush1.bf16.msra.mxu1 %v6390_v26 }
 0x1d8   :  { %v2660_v39 = vpack.c.bf16 %v2588_v29, %v2552_v63  ;;  %v2662_v22 = vpack.c.bf16 %v2590_v52, %v2554_v48  ;;  %v2661_v23 = vpack.c.bf16 %v2589_v37, %v2553_v8  ;;  %2883 = vmatprep.subr.bf16.mxu0 %v2625_v41  ;;  %2926 = vmatprep.subr.bf16.mxu1 %v2627_v25 }
 0x1d9   :  { %v2663_v18 = vpack.c.bf16 %v2591_v33, %v2555_v32 }
 0x1da   :  { %4129 = vmatmul.mubr.msk.bf16.vlgmr.msra.gmra.mrb[76].mxu0 %vm2707_vm6, %v6409_v38  ;;  %4130 = vmatmul.mubr.msk.bf16.vlgmr.msra.gmra.mrb[76].mxu1 %vm2707_vm6, %v6409_v38 }
 0x1db   :  { %2884 = vmatpush1.bf16.msra.mxu0 %v2624_v61  ;;  %2927 = vmatpush1.bf16.msra.mxu1 %v2626_v46 }
 0x1dc   :  { %2885 = vmatprep.subr.bf16.mxu0 %v2661_v23  ;;  %2928 = vmatprep.subr.bf16.mxu1 %v2663_v18 }
 0x1dd   :  { %2915 = vmatprep.mubr.bf16.mxu0 %v4395_v28  ;;  %2958 = vmatprep.mubr.bf16.mxu1 %v4395_v28 }
 0x1df   :  { %2886 = vmatpush1.bf16.msra.mxu0 %v2660_v39  ;;  %2929 = vmatpush1.bf16.msra.mxu1 %v2662_v22 }
 0x1e1   :  { %v1923_v5 = vpop.f32.mrb[24].mxu1 }
 0x1e2   :  { %4131 = vmatmul.mubr.msk.bf16.vlgmr.msra.gmra.mrb[80].mxu0 %vm2707_vm6, %v6409_v38  ;;  %4132 = vmatmul.mubr.msk.bf16.vlgmr.msra.gmra.mrb[80].mxu1 %vm2707_vm6, %v6409_v38  ;;  %v1924_v35 = vadd.f32 %v1923_v5, %v6293_v15  ;;  %v1925_v62 = vpop.f32.mrb[25].mxu1 }
 0x1e3   :  { %v1926_v34 = vadd.f32 %v1925_v62, %v6293_v15  ;;  %v1927_v26 = vpop.f32.mrb[26].mxu1  ;;  %3044 = vmatprep.mubr.bf16.mxu1 %v4395_v28  ;;  %3001 = vmatprep.mubr.bf16.mxu0 %v4395_v28 }
 0x1e4   :  { %v2486_v42 = vmax.f32 %v1924_v35, 0.0  ;;  %v1928_v0 = vadd.f32 %v1927_v26, %v6316_v20  ;;  %v1929_v60 = vpop.f32.mrb[27].mxu1 }
 0x1e5   :  { %v2487_v43 = vmax.f32 %v1926_v34, 0.0  ;;  %v1870_v16 = vpop.f32.mrb[24].mxu0  ;;  %v1930_v24 = vadd.f32 %v1929_v60, %v6316_v20 }
 0x1e6   :  { %v2522_v21 = vmax.f32 %v1928_v0, 0.0  ;;  %v1871_v55 = vadd.f32 %v1870_v16, %v6293_v15  ;;  %v1872_v6 = vpop.f32.mrb[25].mxu0 }
 0x1e7   :  { %v2523_v1 = vmax.f32 %v1930_v24, 0.0  ;;  %v1873_v53 = vadd.f32 %v1872_v6, %v6293_v15  ;;  %v1874_v2 = vpop.f32.mrb[26].mxu0 }
 0x1e8   :  { %v2630_v19 = vpack.c.bf16 %v2522_v21, %v2486_v42  ;;  %v2484_v50 = vmax.f32 %v1871_v55, 0.0  ;;  %v1875_v17 = vadd.f32 %v1874_v2, %v6316_v20  ;;  %v1876_v47 = vpop.f32.mrb[27].mxu0 }
 0x1e9   :  { %v2631_v27 = vpack.c.bf16 %v2523_v1, %v2487_v43  ;;  %v2485_v40 = vmax.f32 %v1873_v53, 0.0  ;;  %v1933_v14 = vpop.f32.mrb[28].mxu1  ;;  %v1877_v30 = vadd.f32 %v1876_v47, %v6316_v20 }
 0x1ea   :  { %v1934_v59 = vadd.f32 %v1933_v14, %v6318_v10  ;;  %v2520_v7 = vmax.f32 %v1875_v17, 0.0  ;;  %v1935_v12 = vpop.f32.mrb[29].mxu1 }
 0x1eb   :  { %v1936_v54 = vadd.f32 %v1935_v12, %v6318_v10  ;;  %v2521_v3 = vmax.f32 %v1877_v30, 0.0  ;;  %v1937_v57 = vpop.f32.mrb[30].mxu1  ;;  %3012 = vmatprep.subr.bf16.mxu1 %v2631_v27 }
 0x1ec   :  { %v2558_v31 = vmax.f32 %v1934_v59, 0.0  ;;  %v2628_v56 = vpack.c.bf16 %v2520_v7, %v2484_v50  ;;  %v1938_v36 = vadd.f32 %v1937_v57, %v6344_v44  ;;  %v1939_v9 = vpop.f32.mrb[31].mxu1  ;;  %3013 = vmatpush1.bf16.msra.mxu1 %v2630_v19 }
 0x1ed   :  { %v2559_v11 = vmax.f32 %v1936_v54, 0.0  ;;  %v2629_v61 = vpack.c.bf16 %v2521_v3, %v2485_v40  ;;  %v1880_v46 = vpop.f32.mrb[28].mxu0  ;;  %v1940_v41 = vadd.f32 %v1939_v9, %v6344_v44 }
 0x1ee   :  { %v2594_v25 = vmax.f32 %v1938_v36, 0.0  ;;  %v1881_v63 = vadd.f32 %v1880_v46, %v6318_v10  ;;  %v1882_v48 = vpop.f32.mrb[29].mxu0 }
 0x1ef   :  { %v2595_v13 = vmax.f32 %v1940_v41, 0.0  ;;  %v1883_v8 = vadd.f32 %v1882_v48, %v6318_v10  ;;  %v1884_v51 = vpop.f32.mrb[30].mxu0  ;;  %2969 = vmatprep.subr.bf16.mxu0 %v2629_v61 }
 0x1f0   :  { %v2666_v58 = vpack.c.bf16 %v2594_v25, %v2558_v31  ;;  %v2556_v45 = vmax.f32 %v1881_v63, 0.0  ;;  %v1885_v32 = vadd.f32 %v1884_v51, %v6344_v44  ;;  %v1886_v49 = vpop.f32.mrb[31].mxu0  ;;  %2970 = vmatpush1.bf16.msra.mxu0 %v2628_v56 }
 0x1f1   :  { %v2667_v29 = vpack.c.bf16 %v2595_v13, %v2559_v11  ;;  %v2557_v52 = vmax.f32 %v1883_v8, 0.0  ;;  %v1887_v37 = vadd.f32 %v1886_v49, %v6344_v44 }
 0x1f2   :  { %v2592_v33 = vmax.f32 %v1885_v32, 0.0 }
 0x1f3   :  { %v2593_v39 = vmax.f32 %v1887_v37, 0.0  ;;  %3014 = vmatprep.subr.bf16.mxu1 %v2667_v29 }
 0x1f4   :  { %v2664_v22 = vpack.c.bf16 %v2592_v33, %v2556_v45  ;;  %3015 = vmatpush1.bf16.msra.mxu1 %v2666_v58 }
 0x1f5   :  { %v2665_v23 = vpack.c.bf16 %v2593_v39, %v2557_v52 }
 0x1f7   :  { %2971 = vmatprep.subr.bf16.mxu0 %v2665_v23  ;;  %4134 = vmatmul.mubr.msk.bf16.vlgmr.msra.gmra.mrb[84].mxu1 %vm2707_vm6, %v6409_v38 }
 0x1f8   :  { %2972 = vmatpush1.bf16.msra.mxu0 %v2664_v22  ;;  %3130 = vmatprep.mubr.bf16.mxu1 %v4395_v28 }
 0x1fb   :  { %4133 = vmatmul.mubr.msk.bf16.vlgmr.msra.gmra.mrb[84].mxu0 %vm2707_vm6, %v6409_v38 }
 0x1fc   :  { %3087 = vmatprep.mubr.bf16.mxu0 %v4395_v28 }
 0x201   :  { %v2029_v18 = vpop.f32.mrb[32].mxu1 }
 0x202   :  { %v2030_v5 = vadd.f32 %v2029_v18, %v6293_v15  ;;  %v2031_v35 = vpop.f32.mrb[33].mxu1 }
 0x203   :  { %v2032_v62 = vadd.f32 %v2031_v35, %v6293_v15  ;;  %v2033_v34 = vpop.f32.mrb[34].mxu1 }
 0x204   :  { %v2490_v26 = vmax.f32 %v2030_v5, 0.0  ;;  %v2034_v42 = vadd.f32 %v2033_v34, %v6316_v20  ;;  %v2035_v0 = vpop.f32.mrb[35].mxu1 }
 0x205   :  { %v2491_v60 = vmax.f32 %v2032_v62, 0.0  ;;  %v1976_v43 = vpop.f32.mrb[32].mxu0  ;;  %v2036_v16 = vadd.f32 %v2035_v0, %v6316_v20 }
 0x206   :  { %v2526_v24 = vmax.f32 %v2034_v42, 0.0  ;;  %v1977_v21 = vadd.f32 %v1976_v43, %v6293_v15  ;;  %v1978_v55 = vpop.f32.mrb[33].mxu0 }
 0x207   :  { %v2527_v6 = vmax.f32 %v2036_v16, 0.0  ;;  %v1979_v1 = vadd.f32 %v1978_v55, %v6293_v15  ;;  %v1980_v53 = vpop.f32.mrb[34].mxu0 }
 0x208   :  { %v2634_v2 = vpack.c.bf16 %v2526_v24, %v2490_v26  ;;  %v2488_v19 = vmax.f32 %v1977_v21, 0.0  ;;  %v1981_v50 = vadd.f32 %v1980_v53, %v6316_v20  ;;  %v1982_v17 = vpop.f32.mrb[35].mxu0 }
 0x209   :  { %v2635_v47 = vpack.c.bf16 %v2527_v6, %v2491_v60  ;;  %v2489_v27 = vmax.f32 %v1979_v1, 0.0  ;;  %v2039_v40 = vpop.f32.mrb[36].mxu1  ;;  %v1983_v14 = vadd.f32 %v1982_v17, %v6316_v20 }
 0x20a   :  { %v2040_v30 = vadd.f32 %v2039_v40, %v6318_v10  ;;  %v2524_v59 = vmax.f32 %v1981_v50, 0.0  ;;  %v2041_v7 = vpop.f32.mrb[37].mxu1 }
 0x20b   :  { %v2042_v12 = vadd.f32 %v2041_v7, %v6318_v10  ;;  %v2525_v54 = vmax.f32 %v1983_v14, 0.0  ;;  %v2043_v3 = vpop.f32.mrb[38].mxu1  ;;  %3098 = vmatprep.subr.bf16.mxu1 %v2635_v47 }
 0x20c   :  { %v2562_v57 = vmax.f32 %v2040_v30, 0.0  ;;  %v2632_v31 = vpack.c.bf16 %v2524_v59, %v2488_v19  ;;  %v2044_v56 = vadd.f32 %v2043_v3, %v6344_v44  ;;  %v2045_v36 = vpop.f32.mrb[39].mxu1  ;;  %3099 = vmatpush1.bf16.msra.mxu1 %v2634_v2 }
 0x20d   :  { %v2563_v9 = vmax.f32 %v2042_v12, 0.0  ;;  %v2633_v11 = vpack.c.bf16 %v2525_v54, %v2489_v27  ;;  %v1986_v61 = vpop.f32.mrb[36].mxu0  ;;  %v2046_v46 = vadd.f32 %v2045_v36, %v6344_v44 }
 0x20e   :  { %v2598_v41 = vmax.f32 %v2044_v56, 0.0  ;;  %v1987_v25 = vadd.f32 %v1986_v61, %v6318_v10  ;;  %v1988_v63 = vpop.f32.mrb[37].mxu0 }
 0x20f   :  { %v2599_v48 = vmax.f32 %v2046_v46, 0.0  ;;  %v1989_v13 = vadd.f32 %v1988_v63, %v6318_v10  ;;  %v1990_v8 = vpop.f32.mrb[38].mxu0  ;;  %3055 = vmatprep.subr.bf16.mxu0 %v2633_v11 }
 0x210   :  { %v2670_v51 = vpack.c.bf16 %v2598_v41, %v2562_v57  ;;  %v2560_v58 = vmax.f32 %v1987_v25, 0.0  ;;  %v1991_v45 = vadd.f32 %v1990_v8, %v6344_v44  ;;  %v1992_v32 = vpop.f32.mrb[39].mxu0  ;;  %3056 = vmatpush1.bf16.msra.mxu0 %v2632_v31 }
 0x211   :  { %v2671_v49 = vpack.c.bf16 %v2599_v48, %v2563_v9  ;;  %v2561_v29 = vmax.f32 %v1989_v13, 0.0  ;;  %v1993_v52 = vadd.f32 %v1992_v32, %v6344_v44 }
 0x212   :  { %v2596_v37 = vmax.f32 %v1991_v45, 0.0 }
 0x213   :  { %v2597_v33 = vmax.f32 %v1993_v52, 0.0  ;;  %3100 = vmatprep.subr.bf16.mxu1 %v2671_v49 }
 0x214   :  { %v2668_v39 = vpack.c.bf16 %v2596_v37, %v2560_v58  ;;  %3101 = vmatpush1.bf16.msra.mxu1 %v2670_v51 }
 0x215   :  { %v2669_v22 = vpack.c.bf16 %v2597_v33, %v2561_v29 }
 0x217   :  { %3057 = vmatprep.subr.bf16.mxu0 %v2669_v22  ;;  %4136 = vmatmul.mubr.msk.bf16.vlgmr.msra.gmra.mrb[88].mxu1 %vm2707_vm6, %v6409_v38 }
 0x218   :  { %3058 = vmatpush1.bf16.msra.mxu0 %v2668_v39  ;;  %3216 = vmatprep.mubr.bf16.mxu1 %v4395_v28 }
 0x21b   :  { %4135 = vmatmul.mubr.msk.bf16.vlgmr.msra.gmra.mrb[88].mxu0 %vm2707_vm6, %v6409_v38 }
 0x21c   :  { %3173 = vmatprep.mubr.bf16.mxu0 %v4395_v28 }
 0x221   :  { %v2135_v23 = vpop.f32.mrb[40].mxu1 }
 0x222   :  { %v2136_v18 = vadd.f32 %v2135_v23, %v6293_v15  ;;  %v2137_v5 = vpop.f32.mrb[41].mxu1 }
 0x223   :  { %v2138_v35 = vadd.f32 %v2137_v5, %v6293_v15  ;;  %v2139_v62 = vpop.f32.mrb[42].mxu1 }
 0x224   :  { %v2494_v34 = vmax.f32 %v2136_v18, 0.0  ;;  %v2140_v26 = vadd.f32 %v2139_v62, %v6316_v20  ;;  %v2082_v42 = vpop.f32.mrb[40].mxu0  ;;  %v2141_v0 = vpop.f32.mrb[43].mxu1 }
 0x225   :  { %v2495_v60 = vmax.f32 %v2138_v35, 0.0  ;;  %v2083_v43 = vadd.f32 %v2082_v42, %v6293_v15  ;;  %v2142_v16 = vadd.f32 %v2141_v0, %v6316_v20  ;;  %v2084_v24 = vpop.f32.mrb[41].mxu0 }
 0x226   :  { %v2530_v21 = vmax.f32 %v2140_v26, 0.0  ;;  %v2085_v55 = vadd.f32 %v2084_v24, %v6293_v15  ;;  %v2086_v6 = vpop.f32.mrb[42].mxu0 }
 0x227   :  { %v2492_v1 = vmax.f32 %v2083_v43, 0.0  ;;  %v2531_v53 = vmax.f32 %v2142_v16, 0.0  ;;  %v2087_v2 = vadd.f32 %v2086_v6, %v6316_v20  ;;  %v2088_v19 = vpop.f32.mrb[43].mxu0 }
 0x228   :  { %v2638_v50 = vpack.c.bf16 %v2530_v21, %v2494_v34  ;;  %v2493_v17 = vmax.f32 %v2085_v55, 0.0  ;;  %v2089_v47 = vadd.f32 %v2088_v19, %v6316_v20 }
 0x229   :  { %v2639_v27 = vpack.c.bf16 %v2531_v53, %v2495_v60  ;;  %v2145_v40 = vpop.f32.mrb[44].mxu1  ;;  %v2528_v14 = vmax.f32 %v2087_v2, 0.0 }
 0x22a   :  { %v2146_v30 = vadd.f32 %v2145_v40, %v6318_v10  ;;  %v2147_v59 = vpop.f32.mrb[45].mxu1  ;;  %v2529_v7 = vmax.f32 %v2089_v47, 0.0 }
 0x22b   :  { %v2636_v12 = vpack.c.bf16 %v2528_v14, %v2492_v1  ;;  %v2148_v54 = vadd.f32 %v2147_v59, %v6318_v10  ;;  %v2149_v3 = vpop.f32.mrb[46].mxu1  ;;  %3184 = vmatprep.subr.bf16.mxu1 %v2639_v27 }
 0x22c   :  { %v2566_v57 = vmax.f32 %v2146_v30, 0.0  ;;  %v2637_v31 = vpack.c.bf16 %v2529_v7, %v2493_v17  ;;  %v2150_v56 = vadd.f32 %v2149_v3, %v6344_v44  ;;  %v2092_v36 = vpop.f32.mrb[44].mxu0  ;;  %v2151_v9 = vpop.f32.mrb[47].mxu1  ;;  %3185 = vmatpush1.bf16.msra.mxu1 %v2638_v50 }
 0x22d   :  { %v2567_v11 = vmax.f32 %v2148_v54, 0.0  ;;  %v2093_v61 = vadd.f32 %v2092_v36, %v6318_v10  ;;  %v2152_v46 = vadd.f32 %v2151_v9, %v6344_v44  ;;  %v2094_v41 = vpop.f32.mrb[45].mxu0 }
 0x22e   :  { %v2602_v25 = vmax.f32 %v2150_v56, 0.0  ;;  %v2095_v63 = vadd.f32 %v2094_v41, %v6318_v10  ;;  %v2096_v48 = vpop.f32.mrb[46].mxu0  ;;  %3141 = vmatprep.subr.bf16.mxu0 %v2637_v31 }
 0x22f   :  { %v2564_v13 = vmax.f32 %v2093_v61, 0.0  ;;  %v2603_v8 = vmax.f32 %v2152_v46, 0.0  ;;  %v2097_v51 = vadd.f32 %v2096_v48, %v6344_v44  ;;  %v2098_v58 = vpop.f32.mrb[47].mxu0  ;;  %3142 = vmatpush1.bf16.msra.mxu0 %v2636_v12 }
 0x230   :  { %v2674_v45 = vpack.c.bf16 %v2602_v25, %v2566_v57  ;;  %v2565_v32 = vmax.f32 %v2095_v63, 0.0  ;;  %v2099_v49 = vadd.f32 %v2098_v58, %v6344_v44 }
 0x231   :  { %v2675_v29 = vpack.c.bf16 %v2603_v8, %v2567_v11  ;;  %v2600_v52 = vmax.f32 %v2097_v51, 0.0 }
 0x232   :  { %v2601_v37 = vmax.f32 %v2099_v49, 0.0 }
 0x233   :  { %v2672_v33 = vpack.c.bf16 %v2600_v52, %v2564_v13  ;;  %3186 = vmatprep.subr.bf16.mxu1 %v2675_v29 }
 0x234   :  { %v2673_v39 = vpack.c.bf16 %v2601_v37, %v2565_v32  ;;  %3187 = vmatpush1.bf16.msra.mxu1 %v2674_v45 }
 0x236   :  { %3143 = vmatprep.subr.bf16.mxu0 %v2673_v39 }
 0x237   :  { %3144 = vmatpush1.bf16.msra.mxu0 %v2672_v33  ;;  %4138 = vmatmul.mubr.msk.bf16.vlgmr.msra.gmra.mrb[92].mxu1 %vm2707_vm6, %v6409_v38 }
 0x238   :  { %3302 = vmatprep.mubr.bf16.mxu1 %v4395_v28 }
 0x23a   :  { %4137 = vmatmul.mubr.msk.bf16.vlgmr.msra.gmra.mrb[92].mxu0 %vm2707_vm6, %v6409_v38 }
 0x23b   :  { %3259 = vmatprep.mubr.bf16.mxu0 %v4395_v28 }
 0x241   :  { %v2241_v22 = vpop.f32.mrb[48].mxu1 }
 0x242   :  { %v2242_v23 = vadd.f32 %v2241_v22, %v6293_v15  ;;  %v2243_v18 = vpop.f32.mrb[49].mxu1 }
 0x243   :  { %v2244_v5 = vadd.f32 %v2243_v18, %v6293_v15  ;;  %v2245_v35 = vpop.f32.mrb[50].mxu1 }
 0x244   :  { %v2498_v62 = vmax.f32 %v2242_v23, 0.0  ;;  %v2246_v34 = vadd.f32 %v2245_v35, %v6316_v20  ;;  %v2188_v26 = vpop.f32.mrb[48].mxu0  ;;  %v2247_v42 = vpop.f32.mrb[51].mxu1 }
 0x245   :  { %v2499_v0 = vmax.f32 %v2244_v5, 0.0  ;;  %v2189_v60 = vadd.f32 %v2188_v26, %v6293_v15  ;;  %v2248_v43 = vadd.f32 %v2247_v42, %v6316_v20  ;;  %v2190_v16 = vpop.f32.mrb[49].mxu0 }
 0x246   :  { %v2534_v24 = vmax.f32 %v2246_v34, 0.0  ;;  %v2191_v21 = vadd.f32 %v2190_v16, %v6293_v15  ;;  %v2192_v55 = vpop.f32.mrb[50].mxu0 }
 0x247   :  { %v2496_v6 = vmax.f32 %v2189_v60, 0.0  ;;  %v2535_v1 = vmax.f32 %v2248_v43, 0.0  ;;  %v2193_v53 = vadd.f32 %v2192_v55, %v6316_v20  ;;  %v2194_v2 = vpop.f32.mrb[51].mxu0 }
 0x248   :  { %v2642_v19 = vpack.c.bf16 %v2534_v24, %v2498_v62  ;;  %v2497_v50 = vmax.f32 %v2191_v21, 0.0  ;;  %v2195_v17 = vadd.f32 %v2194_v2, %v6316_v20 }
 0x249   :  { %v2643_v47 = vpack.c.bf16 %v2535_v1, %v2499_v0  ;;  %v2532_v27 = vmax.f32 %v2193_v53, 0.0  ;;  %v2251_v40 = vpop.f32.mrb[52].mxu1 }
 0x24a   :  { %v2533_v14 = vmax.f32 %v2195_v17, 0.0  ;;  %v2252_v30 = vadd.f32 %v2251_v40, %v6318_v10  ;;  %v2253_v59 = vpop.f32.mrb[53].mxu1 }
 0x24b   :  { %v2640_v7 = vpack.c.bf16 %v2532_v27, %v2496_v6  ;;  %v2254_v12 = vadd.f32 %v2253_v59, %v6318_v10  ;;  %v2255_v54 = vpop.f32.mrb[54].mxu1  ;;  %3270 = vmatprep.subr.bf16.mxu1 %v2643_v47 }
 0x24c   :  { %v2641_v3 = vpack.c.bf16 %v2533_v14, %v2497_v50  ;;  %v2256_v57 = vadd.f32 %v2255_v54, %v6344_v44  ;;  %v2198_v31 = vpop.f32.mrb[52].mxu0  ;;  %v2257_v56 = vpop.f32.mrb[55].mxu1  ;;  %3271 = vmatpush1.bf16.msra.mxu1 %v2642_v19  ;;  %v2570_v61 = vmax.f32 %v2252_v30, 0.0 }
 0x24d   :  { %v2199_v36 = vadd.f32 %v2198_v31, %v6318_v10  ;;  %v2258_v9 = vadd.f32 %v2257_v56, %v6344_v44  ;;  %v2200_v11 = vpop.f32.mrb[53].mxu0  ;;  %v2571_v63 = vmax.f32 %v2254_v12, 0.0 }
 0x24e   :  { %v2606_v46 = vmax.f32 %v2256_v57, 0.0  ;;  %v2201_v41 = vadd.f32 %v2200_v11, %v6318_v10  ;;  %v2202_v25 = vpop.f32.mrb[54].mxu0  ;;  %3227 = vmatprep.subr.bf16.mxu0 %v2641_v3 }
 0x24f   :  { %v2607_v48 = vmax.f32 %v2258_v9, 0.0  ;;  %v2203_v13 = vadd.f32 %v2202_v25, %v6344_v44  ;;  %v2204_v8 = vpop.f32.mrb[55].mxu0  ;;  %3228 = vmatpush1.bf16.msra.mxu0 %v2640_v7  ;;  %v2568_v45 = vmax.f32 %v2199_v36, 0.0 }
 0x250   :  { %v2678_v51 = vpack.c.bf16 %v2606_v46, %v2570_v61  ;;  %v2205_v58 = vadd.f32 %v2204_v8, %v6344_v44  ;;  %v2569_v29 = vmax.f32 %v2201_v41, 0.0 }
 0x251   :  { %v2679_v32 = vpack.c.bf16 %v2607_v48, %v2571_v63  ;;  %v2604_v49 = vmax.f32 %v2203_v13, 0.0 }
 0x252   :  { %v2605_v52 = vmax.f32 %v2205_v58, 0.0 }
 0x253   :  { %v2676_v37 = vpack.c.bf16 %v2604_v49, %v2568_v45  ;;  %3272 = vmatprep.subr.bf16.mxu1 %v2679_v32 }
 0x254   :  { %v2677_v33 = vpack.c.bf16 %v2605_v52, %v2569_v29  ;;  %3273 = vmatpush1.bf16.msra.mxu1 %v2678_v51 }
 0x256   :  { %3229 = vmatprep.subr.bf16.mxu0 %v2677_v33 }
 0x257   :  { %3230 = vmatpush1.bf16.msra.mxu0 %v2676_v37  ;;  %4140 = vmatmul.mubr.msk.bf16.vlgmr.msra.gmra.mrb[96].mxu1 %vm2707_vm6, %v6409_v38 }
 0x258   :  { %3388 = vmatprep.mubr.bf16.mxu1 %v4395_v28 }
 0x25a   :  { %4139 = vmatmul.mubr.msk.bf16.vlgmr.msra.gmra.mrb[96].mxu0 %vm2707_vm6, %v6409_v38 }
 0x25b   :  { %3345 = vmatprep.mubr.bf16.mxu0 %v4395_v28 }
 0x261   :  { %v2347_v39 = vpop.f32.mrb[56].mxu1 }
 0x262   :  { %v2348_v22 = vadd.f32 %v2347_v39, %v6293_v15  ;;  %v2349_v23 = vpop.f32.mrb[57].mxu1 }
 0x263   :  { %v2350_v18 = vadd.f32 %v2349_v23, %v6293_v15  ;;  %v2351_v5 = vpop.f32.mrb[58].mxu1 }
 0x264   :  { %v2352_v35 = vadd.f32 %v2351_v5, %v6316_v20  ;;  %v2294_v62 = vpop.f32.mrb[56].mxu0  ;;  %v2353_v34 = vpop.f32.mrb[59].mxu1  ;;  %v2502_v60 = vmax.f32 %v2348_v22, 0.0 }
 0x265   :  { %v2295_v26 = vadd.f32 %v2294_v62, %v6293_v15  ;;  %v2354_v42 = vadd.f32 %v2353_v34, %v6316_v20  ;;  %v2296_v0 = vpop.f32.mrb[57].mxu0  ;;  %v2503_v21 = vmax.f32 %v2350_v18, 0.0 }
 0x266   :  { %v2538_v43 = vmax.f32 %v2352_v35, 0.0  ;;  %v2297_v16 = vadd.f32 %v2296_v0, %v6293_v15  ;;  %v2298_v24 = vpop.f32.mrb[58].mxu0 }
 0x267   :  { %v2539_v55 = vmax.f32 %v2354_v42, 0.0  ;;  %v2299_v6 = vadd.f32 %v2298_v24, %v6316_v20  ;;  %v2300_v1 = vpop.f32.mrb[59].mxu0  ;;  %v2500_v19 = vmax.f32 %v2295_v26, 0.0 }
 0x268   :  { %v2646_v53 = vpack.c.bf16 %v2538_v43, %v2502_v60  ;;  %v2301_v2 = vadd.f32 %v2300_v1, %v6316_v20  ;;  %v2501_v27 = vmax.f32 %v2297_v16, 0.0 }
 0x269   :  { %v2647_v50 = vpack.c.bf16 %v2539_v55, %v2503_v21  ;;  %v2536_v17 = vmax.f32 %v2299_v6, 0.0  ;;  %v2357_v47 = vpop.f32.mrb[60].mxu1 }
 0x26a   :  { %v2537_v40 = vmax.f32 %v2301_v2, 0.0  ;;  %v2358_v14 = vadd.f32 %v2357_v47, %v6318_v10  ;;  %v2359_v30 = vpop.f32.mrb[61].mxu1 }
 0x26b   :  { %v2644_v59 = vpack.c.bf16 %v2536_v17, %v2500_v19  ;;  %v2360_v7 = vadd.f32 %v2359_v30, %v6318_v10  ;;  %v2361_v12 = vpop.f32.mrb[62].mxu1  ;;  %3356 = vmatprep.subr.bf16.mxu1 %v2647_v50 }
 0x26c   :  { %v2645_v54 = vpack.c.bf16 %v2537_v40, %v2501_v27  ;;  %v2362_v3 = vadd.f32 %v2361_v12, %v6344_v44  ;;  %v2304_v57 = vpop.f32.mrb[60].mxu0  ;;  %v2363_v31 = vpop.f32.mrb[63].mxu1  ;;  %3357 = vmatpush1.bf16.msra.mxu1 %v2646_v53  ;;  %v2574_v11 = vmax.f32 %v2358_v14, 0.0 }
 0x26d   :  { %v2305_v56 = vadd.f32 %v2304_v57, %v6318_v10  ;;  %v2364_v36 = vadd.f32 %v2363_v31, %v6344_v44  ;;  %v2306_v9 = vpop.f32.mrb[61].mxu0  ;;  %v2575_v25 = vmax.f32 %v2360_v7, 0.0 }
 0x26e   :  { %v2610_v61 = vmax.f32 %v2362_v3, 0.0  ;;  %v2307_v46 = vadd.f32 %v2306_v9, %v6318_v10  ;;  %v2308_v41 = vpop.f32.mrb[62].mxu0  ;;  %3313 = vmatprep.subr.bf16.mxu0 %v2645_v54 }
 0x26f   :  { %v2611_v63 = vmax.f32 %v2364_v36, 0.0  ;;  %v2309_v48 = vadd.f32 %v2308_v41, %v6344_v44  ;;  %v2310_v13 = vpop.f32.mrb[63].mxu0  ;;  %3314 = vmatpush1.bf16.msra.mxu0 %v2644_v59  ;;  %v2572_v58 = vmax.f32 %v2305_v56, 0.0 }
 0x270   :  { %v2682_v8 = vpack.c.bf16 %v2610_v61, %v2574_v11  ;;  %v2311_v51 = vadd.f32 %v2310_v13, %v6344_v44  ;;  %v2573_v49 = vmax.f32 %v2307_v46, 0.0 }
 0x271   :  { %v2683_v45 = vpack.c.bf16 %v2611_v63, %v2575_v25  ;;  %v2608_v32 = vmax.f32 %v2309_v48, 0.0 }
 0x272   :  { %v2609_v29 = vmax.f32 %v2311_v51, 0.0 }
 0x273   :  { %v2680_v52 = vpack.c.bf16 %v2608_v32, %v2572_v58  ;;  %3358 = vmatprep.subr.bf16.mxu1 %v2683_v45 }
 0x274   :  { %v2681_v37 = vpack.c.bf16 %v2609_v29, %v2573_v49  ;;  %3359 = vmatpush1.bf16.msra.mxu1 %v2682_v8  ;;  %v6576_v49 = vpop.permute.xlu1 %2699 }
 0x276   :  { %3315 = vmatprep.subr.bf16.mxu0 %v2681_v37 }
 0x277   :  { %3316 = vmatpush1.bf16.msra.mxu0 %v2680_v52  ;;  %4142 = vmatmul.mubr.msk.bf16.vlgmr.msra.gmra.mrb[100].mxu1 %vm2707_vm6, %v6409_v38 }
 0x278   :  { %3474 = vmatprep.mubr.bf16.mxu1 %v4395_v28 }
 0x27a   :  { %4141 = vmatmul.mubr.msk.bf16.vlgmr.msra.gmra.mrb[100].mxu0 %vm2707_vm6, %v6409_v38 }
 0x27b   :  { %3431 = vmatprep.mubr.bf16.mxu0 %v4395_v28 }
 0x280   :  { %v2400_v33 = vpop.f32.mrb[64].mxu0 }
 0x281   :  { %v2401_v39 = vadd.f32 %v2400_v33, %v6293_v15  ;;  %v2402_v22 = vpop.f32.mrb[65].mxu0 }
 0x282   :  { %v2403_v23 = vadd.f32 %v2402_v22, %v6293_v15  ;;  %v2404_v18 = vpop.f32.mrb[66].mxu0 }
 0x283   :  { %v2405_v5 = vadd.f32 %v2404_v18, %v6316_v20  ;;  %v2406_v35 = vpop.f32.mrb[67].mxu0  ;;  %v2504_v26 = vmax.f32 %v2401_v39, 0.0 }
 0x284   :  { %v2407_v62 = vadd.f32 %v2406_v35, %v6316_v20  ;;  %v2453_v34 = vpop.f32.mrb[64].mxu1  ;;  %v2505_v43 = vmax.f32 %v2403_v23, 0.0 }
 0x285   :  { %v2540_v42 = vmax.f32 %v2405_v5, 0.0  ;;  %v2454_v0 = vadd.f32 %v2453_v34, %v6293_v15  ;;  %v2455_v60 = vpop.f32.mrb[65].mxu1 }
 0x286   :  { %v2541_v28 = vmax.f32 %v2407_v62, 0.0  ;;  %v2456_v16 = vadd.f32 %v2455_v60, %v6293_v15  ;;  %v2457_v24 = vpop.f32.mrb[66].mxu1 }
 0x287   :  { %v2648_v21 = vpack.c.bf16 %v2540_v42, %v2504_v26  ;;  %v2458_v55 = vadd.f32 %v2457_v24, %v6316_v20  ;;  %v2459_v6 = vpop.f32.mrb[67].mxu1  ;;  %v2506_v19 = vmax.f32 %v2454_v0, 0.0 }
 0x288   :  { %v2649_v1 = vpack.c.bf16 %v2541_v28, %v2505_v43  ;;  %v2460_v53 = vadd.f32 %v2459_v6, %v6316_v20  ;;  %v2410_v2 = vpop.f32.mrb[68].mxu0  ;;  %v2507_v27 = vmax.f32 %v2456_v16, 0.0 }
 0x289   :  { %v2542_v50 = vmax.f32 %v2458_v55, 0.0  ;;  %v2411_v17 = vadd.f32 %v2410_v2, %v6318_v10  ;;  %v2412_v47 = vpop.f32.mrb[69].mxu0 }
 0x28a   :  { %v2543_v40 = vmax.f32 %v2460_v53, 0.0  ;;  %v2413_v14 = vadd.f32 %v2412_v47, %v6318_v10  ;;  %v2414_v30 = vpop.f32.mrb[70].mxu0  ;;  %3399 = vmatprep.subr.bf16.mxu0 %v2649_v1 }
 0x28b   :  { %v2650_v15 = vpack.c.bf16 %v2542_v50, %v2506_v19  ;;  %v2415_v59 = vadd.f32 %v2414_v30, %v6344_v44  ;;  %v2416_v7 = vpop.f32.mrb[71].mxu0  ;;  %3400 = vmatpush1.bf16.msra.mxu0 %v2648_v21  ;;  %v2576_v3 = vmax.f32 %v2411_v17, 0.0 }
 0x28c   :  { %v2651_v12 = vpack.c.bf16 %v2543_v40, %v2507_v27  ;;  %v2417_v20 = vadd.f32 %v2416_v7, %v6344_v44  ;;  %v2463_v54 = vpop.f32.mrb[68].mxu1  ;;  %v2577_v36 = vmax.f32 %v2413_v14, 0.0 }
 0x28d   :  { %v2612_v57 = vmax.f32 %v2415_v59, 0.0  ;;  %v2464_v31 = vadd.f32 %v2463_v54, %v6318_v10  ;;  %v2465_v56 = vpop.f32.mrb[69].mxu1 }
 0x28e   :  { %v2613_v9 = vmax.f32 %v2417_v20, 0.0  ;;  %v2466_v11 = vadd.f32 %v2465_v56, %v6318_v10  ;;  %v2467_v61 = vpop.f32.mrb[70].mxu1  ;;  %3442 = vmatprep.subr.bf16.mxu1 %v2651_v12  ;;  %v6574_v10 = vpop.permute.xlu0 %2694 }
 0x28f   :  { %v2684_v46 = vpack.c.bf16 %v2612_v57, %v2576_v3  ;;  %v2468_v41 = vadd.f32 %v2467_v61, %v6344_v44  ;;  %v2469_v25 = vpop.f32.mrb[71].mxu1  ;;  %3443 = vmatpush1.bf16.msra.mxu1 %v2650_v15  ;;  %v2578_v13 = vmax.f32 %v2464_v31, 0.0 }
 0x290   :  { %v2685_v63 = vpack.c.bf16 %v2613_v9, %v2577_v36  ;;  %v2470_v48 = vadd.f32 %v2469_v25, %v6344_v44  ;;  %v2579_v51 = vmax.f32 %v2466_v11, 0.0 }
 0x291   :  { %v2614_v8 = vmax.f32 %v2468_v41, 0.0 }
 0x292   :  { %v2615_v58 = vmax.f32 %v2470_v48, 0.0  ;;  %3401 = vmatprep.subr.bf16.mxu0 %v2685_v63 }
 0x293   :  { %v2686_v45 = vpack.c.bf16 %v2614_v8, %v2578_v13  ;;  %3402 = vmatpush1.bf16.msra.mxu0 %v2684_v46 }
 0x294   :  { %v2687_v32 = vpack.c.bf16 %v2615_v58, %v2579_v51 }
 0x296   :  { %4143 = vmatmul.mubr.msk.bf16.vlgmr.msra.gmra.mrb[104].mxu0 %vm2707_vm6, %v6409_v38  ;;  %3444 = vmatprep.subr.bf16.mxu1 %v2687_v32 }
 0x297   :  { %3445 = vmatpush1.bf16.msra.mxu1 %v2686_v45 }
 0x29a   :  { %4144 = vmatmul.mubr.msk.bf16.vlgmr.msra.gmra.mrb[104].mxu1 %vm2707_vm6, %v6409_v38 }
 0x2a5   :  { %v2745_v44 = vpop.f32.mrb[72].mxu0  ;;  %v2788_v29 = vpop.f32.mrb[72].mxu1 }
 0x2a6   :  { %v6579_v52 = vadd.f32 %v2745_v44, %v6574_v10  ;;  %v6582_v37 = vadd.f32 %v2788_v29, %v6574_v10  ;;  %v2747_v33 = vpop.f32.mrb[73].mxu0  ;;  %v2790_v39 = vpop.f32.mrb[73].mxu1 }
 0x2a7   :  { %v6585_v22 = vadd.f32 %v2747_v33, %v6574_v10  ;;  %v6588_v23 = vadd.f32 %v2790_v39, %v6574_v10  ;;  %v2749_v38 = vpop.f32.mrb[74].mxu0  ;;  %v2792_v18 = vpop.f32.mrb[74].mxu1 }
 0x2a8   :  { %v4145_v5 = vmul.f32 -1.442695, %v6579_v52  ;;  %v4147_v35 = vmul.f32 -1.442695, %v6582_v37  ;;  %v2750_v62 = vadd.f32 %v2749_v38, %v6576_v49  ;;  %v2793_v34 = vadd.f32 %v2792_v18, %v6576_v49  ;;  %v2751_v26 = vpop.f32.mrb[75].mxu0  ;;  %v2794_v42 = vpop.f32.mrb[75].mxu1 }
 0x2a9   :  { %v4146_v0 = vmul.f32 -1.442695, %v6585_v22  ;;  %v4148_v60 = vmul.f32 -1.442695, %v6588_v23  ;;  %v2752_v43 = vadd.f32 %v2751_v26, %v6576_v49  ;;  %v2795_v28 = vadd.f32 %v2794_v42, %v6576_v49 }
 0x2aa   :  { %4246 = vpow2.f32 %v4145_v5  ;;  %4030 = vst [vmem:[%s6992_s5 + $0x120] sm:$0xff] %v2750_v62  ;;  %4032 = vst [vmem:[%s6992_s5 + $0x130] sm:$0xff] %v2793_v34 }
 0x2ab   :  { %4248 = vpow2.f32 %v4147_v35  ;;  %4031 = vst [vmem:[%s6992_s5 + $0x128] sm:$0xff] %v2752_v43  ;;  %4033 = vst [vmem:[%s6992_s5 + $0x138] sm:$0xff] %v2795_v28 }
 0x2ac   :  { %4250 = vpow2.f32 %v4146_v0 }
 0x2ad   :  { %4252 = vpow2.f32 %v4148_v60  ;;  %v2831_v16 = vpop.f32.mrb[76].mxu0  ;;  %v2874_v24 = vpop.f32.mrb[76].mxu1 }
 0x2ae   :  { %v6611_v21 = vadd.f32 %v2831_v16, %v6574_v10  ;;  %v6614_v55 = vadd.f32 %v2874_v24, %v6574_v10  ;;  %v2833_v6 = vpop.f32.mrb[77].mxu0  ;;  %v2876_v1 = vpop.f32.mrb[77].mxu1 }
 0x2af   :  { %v6617_v53 = vadd.f32 %v2833_v6, %v6574_v10  ;;  %v6620_v2 = vadd.f32 %v2876_v1, %v6574_v10  ;;  %v2835_v19 = vpop.f32.mrb[78].mxu0  ;;  %v2878_v50 = vpop.f32.mrb[78].mxu1 }
 0x2b0   :  { %v4149_v17 = vmul.f32 -1.442695, %v6611_v21  ;;  %v4151_v47 = vmul.f32 -1.442695, %v6614_v55  ;;  %v2836_v27 = vadd.f32 %v2835_v19, %v6576_v49  ;;  %v2879_v40 = vadd.f32 %v2878_v50, %v6576_v49  ;;  %v2837_v14 = vpop.f32.mrb[79].mxu0  ;;  %v2880_v30 = vpop.f32.mrb[79].mxu1 }
 0x2b1   :  { %v4150_v15 = vmul.f32 -1.442695, %v6617_v53  ;;  %v4152_v59 = vmul.f32 -1.442695, %v6620_v2  ;;  %v2838_v7 = vadd.f32 %v2837_v14, %v6576_v49  ;;  %v2881_v12 = vadd.f32 %v2880_v30, %v6576_v49 }
 0x2b2   :  { %4254 = vpow2.f32 %v4149_v17  ;;  %4034 = vst [vmem:[%s6992_s5 + $0x140] sm:$0xff] %v2836_v27  ;;  %4036 = vst [vmem:[%s6992_s5 + $0x150] sm:$0xff] %v2879_v40 }
 0x2b3   :  { %4256 = vpow2.f32 %v4151_v47  ;;  %4035 = vst [vmem:[%s6992_s5 + $0x148] sm:$0xff] %v2838_v7  ;;  %4037 = vst [vmem:[%s6992_s5 + $0x158] sm:$0xff] %v2881_v12 }
 0x2b4   :  { %v4247_v20 = vpop.eup %4246  ;;  %4258 = vpow2.f32 %v4150_v15 }
 0x2b5   :  { %v4249_v54 = vpop.eup %4248  ;;  %v3706_v3 = vadd.f32 1.0, %v4247_v20  ;;  %4260 = vpow2.f32 %v4152_v59  ;;  %v2917_v57 = vpop.f32.mrb[80].mxu0 }
 0x2b6   :  { %v2960_v31 = vpop.f32.mrb[80].mxu1  ;;  %v4251_v56 = vpop.eup %4250  ;;  %v3708_v36 = vadd.f32 1.0, %v4249_v54  ;;  %v6643_v9 = vadd.f32 %v2917_v57, %v6574_v10 }
 0x2b7   :  { %v6646_v11 = vadd.f32 %v2960_v31, %v6574_v10  ;;  %v2919_v61 = vpop.f32.mrb[81].mxu0  ;;  %v2962_v46 = vpop.f32.mrb[81].mxu1  ;;  %4262 = vrcp.f32 %v3706_v3  ;;  %v3707_v25 = vadd.f32 1.0, %v4251_v56 }
 0x2b8   :  { %v4253_v41 = vpop.eup %4252  ;;  %v6649_v63 = vadd.f32 %v2919_v61, %v6574_v10  ;;  %v6652_v48 = vadd.f32 %v2962_v46, %v6574_v10  ;;  %v2921_v13 = vpop.f32.mrb[82].mxu0  ;;  %4264 = vrcp.f32 %v3708_v36  ;;  %v4153_v58 = vmul.f32 -1.442695, %v6643_v9 }
 0x2b9   :  { %v2964_v8 = vpop.f32.mrb[82].mxu1  ;;  %v3709_v51 = vadd.f32 1.0, %v4253_v41  ;;  %v4155_v45 = vmul.f32 -1.442695, %v6646_v11  ;;  %v2923_v32 = vpop.f32.mrb[83].mxu0  ;;  %4266 = vrcp.f32 %v3707_v25  ;;  %v2922_v33 = vadd.f32 %v2921_v13, %v6576_v49 }
 0x2ba   :  { %v4154_v44 = vmul.f32 -1.442695, %v6649_v63  ;;  %v4156_v29 = vmul.f32 -1.442695, %v6652_v48  ;;  %v2966_v39 = vpop.f32.mrb[83].mxu1  ;;  %v2965_v38 = vadd.f32 %v2964_v8, %v6576_v49  ;;  %v2924_v18 = vadd.f32 %v2923_v32, %v6576_v49 }
 0x2bb   :  { %4268 = vrcp.f32 %v3709_v51  ;;  %v2967_v5 = vadd.f32 %v2966_v39, %v6576_v49  ;;  %4038 = vst [vmem:[%s6992_s5 + $0x160] sm:$0xff] %v2922_v33 }
 0x2bc   :  { %4270 = vpow2.f32 %v4153_v58  ;;  %v4255_v35 = vpop.eup %4254  ;;  %4040 = vst [vmem:[%s6992_s5 + $0x170] sm:$0xff] %v2965_v38  ;;  %4039 = vst [vmem:[%s6992_s5 + $0x168] sm:$0xff] %v2924_v18 }
 0x2bd   :  { %4272 = vpow2.f32 %v4155_v45  ;;  %4041 = vst [vmem:[%s6992_s5 + $0x178] sm:$0xff] %v2967_v5  ;;  %v4257_v62 = vpop.eup %4256  ;;  %v3710_v34 = vadd.f32 1.0, %v4255_v35 }
 0x2be   :  { %4274 = vpow2.f32 %v4154_v44  ;;  %v4259_v26 = vpop.eup %4258  ;;  %v3712_v42 = vadd.f32 1.0, %v4257_v62 }
 0x2bf   :  { %4276 = vpow2.f32 %v4156_v29  ;;  %v4261_v0 = vpop.eup %4260  ;;  %v3711_v60 = vadd.f32 1.0, %v4259_v26 }
 0x2c0   :  { %4278 = vrcp.f32 %v3710_v34  ;;  %v3713_v43 = vadd.f32 1.0, %v4261_v0 }
 0x2c1   :  { %4280 = vrcp.f32 %v3712_v42  ;;  %v4263_v28 = vpop.eup %4262 }
 0x2c2   :  { %4282 = vrcp.f32 %v3711_v60  ;;  %v4265_v16 = vpop.eup %4264  ;;  %v3922_v24 = vsel %vm3488_vm7, %v4263_v28, %v6579_v52 }
 0x2c3   :  { %4284 = vrcp.f32 %v3713_v43  ;;  %v4267_v6 = vpop.eup %4266  ;;  %3994 = vst [vmem:[%s6992_s5] sm:$0xff] %v3922_v24  ;;  %v3924_v1 = vsel %vm3488_vm7, %v4265_v16, %v6582_v37 }
 0x2c4   :  { %3996 = vst [vmem:[%s6992_s5 + $0x10] sm:$0xff] %v3924_v1  ;;  %v3923_v50 = vsel %vm3488_vm7, %v4267_v6, %v6585_v22 }
 0x2c5   :  { %v4269_v19 = vpop.eup %4268  ;;  %3995 = vst [vmem:[%s6992_s5 + $0x8] sm:$0xff] %v3923_v50 }
 0x2c6   :  { %v4271_v52 = vpop.eup %4270  ;;  %v3925_v17 = vsel %vm3488_vm7, %v4269_v19, %v6588_v23 }
 0x2c7   :  { %v4273_v47 = vpop.eup %4272  ;;  %3997 = vst [vmem:[%s6992_s5 + $0x18] sm:$0xff] %v3925_v17  ;;  %v3714_v37 = vadd.f32 1.0, %v4271_v52 }
 0x2c8   :  { %v4275_v27 = vpop.eup %4274  ;;  %v3716_v40 = vadd.f32 1.0, %v4273_v47 }
 0x2c9   :  { %v4277_v14 = vpop.eup %4276  ;;  %4286 = vrcp.f32 %v3714_v37  ;;  %v3715_v22 = vadd.f32 1.0, %v4275_v27 }
 0x2ca   :  { %v4279_v30 = vpop.eup %4278  ;;  %4288 = vrcp.f32 %v3716_v40  ;;  %v3717_v15 = vadd.f32 1.0, %v4277_v14  ;;  %v3046_v23 = vpop.f32.mrb[84].mxu1 }
 0x2cb   :  { %v4281_v59 = vpop.eup %4280  ;;  %v3926_v7 = vsel %vm3488_vm7, %v4279_v30, %v6611_v21  ;;  %4290 = vrcp.f32 %v3715_v22  ;;  %v3047_v54 = vadd.f32 %v3046_v23, %v6574_v10  ;;  %v3048_v3 = vpop.f32.mrb[85].mxu1 }
 0x2cc   :  { %v4283_v12 = vpop.eup %4282  ;;  %3998 = vst [vmem:[%s6992_s5 + $0x20] sm:$0xff] %v3926_v7  ;;  %v3928_v20 = vsel %vm3488_vm7, %v4281_v59, %v6614_v55  ;;  %4292 = vrcp.f32 %v3717_v15  ;;  %v3049_v31 = vadd.f32 %v3048_v3, %v6574_v10  ;;  %v3050_v56 = vpop.f32.mrb[86].mxu1 }
 0x2cd   :  { %v4285_v57 = vpop.eup %4284  ;;  %4000 = vst [vmem:[%s6992_s5 + $0x30] sm:$0xff] %v3928_v20  ;;  %v3927_v21 = vsel %vm3488_vm7, %v4283_v12, %v6617_v53  ;;  %v4159_v36 = vmul.f32 -1.442695, %v3047_v54  ;;  %v3051_v61 = vadd.f32 %v3050_v56, %v6576_v49  ;;  %v3052_v46 = vpop.f32.mrb[87].mxu1 }
 0x2ce   :  { %3999 = vst [vmem:[%s6992_s5 + $0x28] sm:$0xff] %v3927_v21  ;;  %v3929_v55 = vsel %vm3488_vm7, %v4285_v57, %v6620_v2  ;;  %v4160_v53 = vmul.f32 -1.442695, %v3049_v31  ;;  %v3003_v41 = vpop.f32.mrb[84].mxu0  ;;  %v3053_v25 = vadd.f32 %v3052_v46, %v6576_v49 }
 0x2cf   :  { %4001 = vst [vmem:[%s6992_s5 + $0x38] sm:$0xff] %v3929_v55  ;;  %4294 = vpow2.f32 %v4159_v36  ;;  %4044 = vst [vmem:[%s6992_s5 + $0x190] sm:$0xff] %v3051_v61  ;;  %v3004_v13 = vadd.f32 %v3003_v41, %v6574_v10  ;;  %v3005_v2 = vpop.f32.mrb[85].mxu0 }
 0x2d0   :  { %4296 = vpow2.f32 %v4160_v53  ;;  %4045 = vst [vmem:[%s6992_s5 + $0x198] sm:$0xff] %v3053_v25  ;;  %v3006_v8 = vadd.f32 %v3005_v2, %v6574_v10  ;;  %v3007_v51 = vpop.f32.mrb[86].mxu0 }
 0x2d1   :  { %v4157_v58 = vmul.f32 -1.442695, %v3004_v13  ;;  %v3008_v45 = vadd.f32 %v3007_v51, %v6576_v49  ;;  %v3009_v32 = vpop.f32.mrb[87].mxu0 }
 0x2d2   :  { %v4158_v29 = vmul.f32 -1.442695, %v3006_v8  ;;  %v3010_v33 = vadd.f32 %v3009_v32, %v6576_v49 }
 0x2d3   :  { %v4287_v44 = vpop.eup %4286  ;;  %4298 = vpow2.f32 %v4157_v58  ;;  %4042 = vst [vmem:[%s6992_s5 + $0x180] sm:$0xff] %v3008_v45 }
 0x2d4   :  { %v4289_v39 = vpop.eup %4288  ;;  %v3930_v38 = vsel %vm3488_vm7, %v4287_v44, %v6643_v9  ;;  %4300 = vpow2.f32 %v4158_v29  ;;  %4043 = vst [vmem:[%s6992_s5 + $0x188] sm:$0xff] %v3010_v33 }
 0x2d5   :  { %v4291_v18 = vpop.eup %4290  ;;  %4002 = vst [vmem:[%s6992_s5 + $0x40] sm:$0xff] %v3930_v38  ;;  %v3932_v5 = vsel %vm3488_vm7, %v4289_v39, %v6646_v11 }
 0x2d6   :  { %v4293_v9 = vpop.eup %4292  ;;  %4004 = vst [vmem:[%s6992_s5 + $0x50] sm:$0xff] %v3932_v5  ;;  %v3931_v35 = vsel %vm3488_vm7, %v4291_v18, %v6649_v63 }
 0x2d7   :  { %4003 = vst [vmem:[%s6992_s5 + $0x48] sm:$0xff] %v3931_v35  ;;  %v3933_v11 = vsel %vm3488_vm7, %v4293_v9, %v6652_v48 }
 0x2d8   :  { %4005 = vst [vmem:[%s6992_s5 + $0x58] sm:$0xff] %v3933_v11 }
 0x2d9   :  { %v4295_v62 = vpop.eup %4294 }
 0x2da   :  { %v4297_v34 = vpop.eup %4296  ;;  %v3720_v26 = vadd.f32 1.0, %v4295_v62 }
 0x2db   :  { %v3721_v42 = vadd.f32 1.0, %v4297_v34 }
 0x2dc   :  { %4302 = vrcp.f32 %v3720_v26 }
 0x2dd   :  { %v4299_v0 = vpop.eup %4298  ;;  %4304 = vrcp.f32 %v3721_v42 }
 0x2de   :  { %v4301_v63 = vpop.eup %4300  ;;  %v3718_v60 = vadd.f32 1.0, %v4299_v0 }
 0x2df   :  { %v3719_v43 = vadd.f32 1.0, %v4301_v63 }
 0x2e0   :  { %4306 = vrcp.f32 %v3718_v60 }
 0x2e1   :  { %4308 = vrcp.f32 %v3719_v43 }
 0x2e6   :  { %v4303_v28 = vpop.eup %4302 }
 0x2e7   :  { %v4305_v16 = vpop.eup %4304  ;;  %v3936_v48 = vsel %vm3488_vm7, %v4303_v28, %v3047_v54 }
 0x2e8   :  { %4008 = vst [vmem:[%s6992_s5 + $0x70] sm:$0xff] %v3936_v48  ;;  %v3937_v24 = vsel %vm3488_vm7, %v4305_v16, %v3049_v31 }
 0x2e9   :  { %4009 = vst [vmem:[%s6992_s5 + $0x78] sm:$0xff] %v3937_v24 }
 0x2ea   :  { %v4307_v6 = vpop.eup %4306  ;;  %v3132_v1 = vpop.f32.mrb[88].mxu1 }
 0x2eb   :  { %v4309_v19 = vpop.eup %4308  ;;  %v3934_v50 = vsel %vm3488_vm7, %v4307_v6, %v3004_v13  ;;  %v3133_v52 = vadd.f32 %v3132_v1, %v6574_v10  ;;  %v3134_v17 = vpop.f32.mrb[89].mxu1 }
 0x2ec   :  { %4006 = vst [vmem:[%s6992_s5 + $0x60] sm:$0xff] %v3934_v50  ;;  %v3935_v47 = vsel %vm3488_vm7, %v4309_v19, %v3006_v8  ;;  %v3135_v37 = vadd.f32 %v3134_v17, %v6574_v10  ;;  %v3136_v27 = vpop.f32.mrb[90].mxu1 }
 0x2ed   :  { %4007 = vst [vmem:[%s6992_s5 + $0x68] sm:$0xff] %v3935_v47  ;;  %v4163_v40 = vmul.f32 -1.442695, %v3133_v52  ;;  %v3137_v14 = vadd.f32 %v3136_v27, %v6576_v49  ;;  %v3138_v22 = vpop.f32.mrb[91].mxu1 }
 0x2ee   :  { %v4164_v30 = vmul.f32 -1.442695, %v3135_v37  ;;  %v3089_v15 = vpop.f32.mrb[88].mxu0  ;;  %v3139_v59 = vadd.f32 %v3138_v22, %v6576_v49 }
 0x2ef   :  { %4310 = vpow2.f32 %v4163_v40  ;;  %4048 = vst [vmem:[%s6992_s5 + $0x1b0] sm:$0xff] %v3137_v14  ;;  %v3090_v7 = vadd.f32 %v3089_v15, %v6574_v10  ;;  %v3091_v23 = vpop.f32.mrb[89].mxu0 }
 0x2f0   :  { %4312 = vpow2.f32 %v4164_v30  ;;  %4049 = vst [vmem:[%s6992_s5 + $0x1b8] sm:$0xff] %v3139_v59  ;;  %v3092_v12 = vadd.f32 %v3091_v23, %v6574_v10  ;;  %v3093_v20 = vpop.f32.mrb[90].mxu0 }
 0x2f1   :  { %v4161_v54 = vmul.f32 -1.442695, %v3090_v7  ;;  %v3094_v3 = vadd.f32 %v3093_v20, %v6576_v49  ;;  %v3095_v57 = vpop.f32.mrb[91].mxu0 }
 0x2f2   :  { %v4162_v21 = vmul.f32 -1.442695, %v3092_v12  ;;  %v3096_v31 = vadd.f32 %v3095_v57, %v6576_v49 }
 0x2f3   :  { %4314 = vpow2.f32 %v4161_v54  ;;  %4046 = vst [vmem:[%s6992_s5 + $0x1a0] sm:$0xff] %v3094_v3 }
 0x2f4   :  { %4316 = vpow2.f32 %v4162_v21  ;;  %4047 = vst [vmem:[%s6992_s5 + $0x1a8] sm:$0xff] %v3096_v31 }
 0x2f9   :  { %v4311_v56 = vpop.eup %4310 }
 0x2fa   :  { %v4313_v55 = vpop.eup %4312  ;;  %v3724_v36 = vadd.f32 1.0, %v4311_v56 }
 0x2fb   :  { %v3725_v61 = vadd.f32 1.0, %v4313_v55 }
 0x2fc   :  { %4318 = vrcp.f32 %v3724_v36 }
 0x2fd   :  { %v4315_v46 = vpop.eup %4314  ;;  %4320 = vrcp.f32 %v3725_v61 }
 0x2fe   :  { %v4317_v53 = vpop.eup %4316  ;;  %v3722_v41 = vadd.f32 1.0, %v4315_v46 }
 0x2ff   :  { %v3723_v25 = vadd.f32 1.0, %v4317_v53 }
 0x300   :  { %4322 = vrcp.f32 %v3722_v41 }
 0x301   :  { %4324 = vrcp.f32 %v3723_v25 }
 0x306   :  { %v4319_v13 = vpop.eup %4318 }
 0x307   :  { %v4321_v2 = vpop.eup %4320  ;;  %v3940_v8 = vsel %vm3488_vm7, %v4319_v13, %v3133_v52 }
 0x308   :  { %4012 = vst [vmem:[%s6992_s5 + $0x90] sm:$0xff] %v3940_v8  ;;  %v3941_v51 = vsel %vm3488_vm7, %v4321_v2, %v3135_v37 }
 0x309   :  { %4013 = vst [vmem:[%s6992_s5 + $0x98] sm:$0xff] %v3941_v51 }
 0x30a   :  { %v4323_v58 = vpop.eup %4322  ;;  %v3218_v45 = vpop.f32.mrb[92].mxu1 }
 0x30b   :  { %v4325_v32 = vpop.eup %4324  ;;  %v3938_v44 = vsel %vm3488_vm7, %v4323_v58, %v3090_v7  ;;  %v3219_v29 = vadd.f32 %v3218_v45, %v6574_v10  ;;  %v3220_v33 = vpop.f32.mrb[93].mxu1 }
 0x30c   :  { %4010 = vst [vmem:[%s6992_s5 + $0x80] sm:$0xff] %v3938_v44  ;;  %v3939_v39 = vsel %vm3488_vm7, %v4325_v32, %v3092_v12  ;;  %v3221_v38 = vadd.f32 %v3220_v33, %v6574_v10  ;;  %v3222_v18 = vpop.f32.mrb[94].mxu1 }
 0x30d   :  { %4011 = vst [vmem:[%s6992_s5 + $0x88] sm:$0xff] %v3939_v39  ;;  %v4167_v5 = vmul.f32 -1.442695, %v3219_v29  ;;  %v3223_v9 = vadd.f32 %v3222_v18, %v6576_v49  ;;  %v3175_v35 = vpop.f32.mrb[92].mxu0  ;;  %v3224_v11 = vpop.f32.mrb[95].mxu1 }
 0x30e   :  { %v4168_v62 = vmul.f32 -1.442695, %v3221_v38  ;;  %v3176_v34 = vadd.f32 %v3175_v35, %v6574_v10  ;;  %v3225_v26 = vadd.f32 %v3224_v11, %v6576_v49  ;;  %v3177_v42 = vpop.f32.mrb[93].mxu0 }
 0x30f   :  { %4326 = vpow2.f32 %v4167_v5  ;;  %4052 = vst [vmem:[%s6992_s5 + $0x1d0] sm:$0xff] %v3223_v9  ;;  %v3178_v0 = vadd.f32 %v3177_v42, %v6574_v10  ;;  %v3179_v63 = vpop.f32.mrb[94].mxu0 }
 0x310   :  { %4328 = vpow2.f32 %v4168_v62  ;;  %v4165_v60 = vmul.f32 -1.442695, %v3176_v34  ;;  %4053 = vst [vmem:[%s6992_s5 + $0x1d8] sm:$0xff] %v3225_v26  ;;  %v3180_v43 = vadd.f32 %v3179_v63, %v6576_v49  ;;  %v3181_v28 = vpop.f32.mrb[95].mxu0 }
 0x311   :  { %v4166_v16 = vmul.f32 -1.442695, %v3178_v0  ;;  %v3182_v48 = vadd.f32 %v3181_v28, %v6576_v49 }
 0x312   :  { %4330 = vpow2.f32 %v4165_v60  ;;  %4050 = vst [vmem:[%s6992_s5 + $0x1c0] sm:$0xff] %v3180_v43 }
 0x313   :  { %4332 = vpow2.f32 %v4166_v16  ;;  %4051 = vst [vmem:[%s6992_s5 + $0x1c8] sm:$0xff] %v3182_v48 }
 0x319   :  { %v4327_v24 = vpop.eup %4326 }
 0x31a   :  { %v4329_v6 = vpop.eup %4328  ;;  %v3728_v1 = vadd.f32 1.0, %v4327_v24 }
 0x31b   :  { %v3729_v19 = vadd.f32 1.0, %v4329_v6 }
 0x31c   :  { %v4331_v50 = vpop.eup %4330  ;;  %4334 = vrcp.f32 %v3728_v1 }
 0x31d   :  { %v4333_v52 = vpop.eup %4332  ;;  %4336 = vrcp.f32 %v3729_v19  ;;  %v3726_v17 = vadd.f32 1.0, %v4331_v50 }
 0x31e   :  { %v3727_v47 = vadd.f32 1.0, %v4333_v52 }
 0x31f   :  { %4338 = vrcp.f32 %v3726_v17 }
 0x320   :  { %4340 = vrcp.f32 %v3727_v47 }
 0x326   :  { %v4335_v37 = vpop.eup %4334 }
 0x327   :  { %v4337_v27 = vpop.eup %4336  ;;  %v3944_v40 = vsel %vm3488_vm7, %v4335_v37, %v3219_v29 }
 0x328   :  { %4016 = vst [vmem:[%s6992_s5 + $0xb0] sm:$0xff] %v3944_v40  ;;  %v3945_v14 = vsel %vm3488_vm7, %v4337_v27, %v3221_v38 }
 0x329   :  { %v4339_v22 = vpop.eup %4338  ;;  %4017 = vst [vmem:[%s6992_s5 + $0xb8] sm:$0xff] %v3945_v14 }
 0x32a   :  { %v4341_v30 = vpop.eup %4340  ;;  %v3942_v15 = vsel %vm3488_vm7, %v4339_v22, %v3176_v34  ;;  %v3304_v59 = vpop.f32.mrb[96].mxu1 }
 0x32b   :  { %4014 = vst [vmem:[%s6992_s5 + $0xa0] sm:$0xff] %v3942_v15  ;;  %v3943_v7 = vsel %vm3488_vm7, %v4341_v30, %v3178_v0  ;;  %v3305_v23 = vadd.f32 %v3304_v59, %v6574_v10  ;;  %v3306_v12 = vpop.f32.mrb[97].mxu1 }
 0x32c   :  { %4015 = vst [vmem:[%s6992_s5 + $0xa8] sm:$0xff] %v3943_v7  ;;  %v3307_v20 = vadd.f32 %v3306_v12, %v6574_v10  ;;  %v3308_v54 = vpop.f32.mrb[98].mxu1 }
 0x32d   :  { %v4171_v3 = vmul.f32 -1.442695, %v3305_v23  ;;  %v3309_v57 = vadd.f32 %v3308_v54, %v6576_v49  ;;  %v3261_v21 = vpop.f32.mrb[96].mxu0  ;;  %v3310_v31 = vpop.f32.mrb[99].mxu1 }
 0x32e   :  { %v4172_v56 = vmul.f32 -1.442695, %v3307_v20  ;;  %v3262_v55 = vadd.f32 %v3261_v21, %v6574_v10  ;;  %v3311_v36 = vadd.f32 %v3310_v31, %v6576_v49  ;;  %v3263_v61 = vpop.f32.mrb[97].mxu0 }
 0x32f   :  { %4342 = vpow2.f32 %v4171_v3  ;;  %4056 = vst [vmem:[%s6992_s5 + $0x1f0] sm:$0xff] %v3309_v57  ;;  %v3264_v46 = vadd.f32 %v3263_v61, %v6574_v10  ;;  %v3265_v53 = vpop.f32.mrb[98].mxu0 }
 0x330   :  { %4344 = vpow2.f32 %v4172_v56  ;;  %v4169_v41 = vmul.f32 -1.442695, %v3262_v55  ;;  %4057 = vst [vmem:[%s6992_s5 + $0x1f8] sm:$0xff] %v3311_v36  ;;  %v3266_v25 = vadd.f32 %v3265_v53, %v6576_v49  ;;  %v3267_v13 = vpop.f32.mrb[99].mxu0 }
 0x331   :  { %v4170_v2 = vmul.f32 -1.442695, %v3264_v46  ;;  %v3268_v8 = vadd.f32 %v3267_v13, %v6576_v49 }
 0x332   :  { %4346 = vpow2.f32 %v4169_v41  ;;  %4054 = vst [vmem:[%s6992_s5 + $0x1e0] sm:$0xff] %v3266_v25 }
 0x333   :  { %4348 = vpow2.f32 %v4170_v2  ;;  %4055 = vst [vmem:[%s6992_s5 + $0x1e8] sm:$0xff] %v3268_v8 }
 0x339   :  { %v4343_v51 = vpop.eup %4342 }
 0x33a   :  { %v4345_v58 = vpop.eup %4344  ;;  %v3732_v45 = vadd.f32 1.0, %v4343_v51 }
 0x33b   :  { %v3733_v32 = vadd.f32 1.0, %v4345_v58 }
 0x33c   :  { %v4347_v44 = vpop.eup %4346  ;;  %4350 = vrcp.f32 %v3732_v45 }
 0x33d   :  { %v4349_v29 = vpop.eup %4348  ;;  %4352 = vrcp.f32 %v3733_v32  ;;  %v3730_v33 = vadd.f32 1.0, %v4347_v44 }
 0x33e   :  { %v3731_v39 = vadd.f32 1.0, %v4349_v29 }
 0x33f   :  { %4354 = vrcp.f32 %v3730_v33 }
 0x340   :  { %4356 = vrcp.f32 %v3731_v39 }
 0x346   :  { %v4351_v38 = vpop.eup %4350 }
 0x347   :  { %v4353_v18 = vpop.eup %4352  ;;  %v3948_v5 = vsel %vm3488_vm7, %v4351_v38, %v3305_v23 }
 0x348   :  { %4020 = vst [vmem:[%s6992_s5 + $0xd0] sm:$0xff] %v3948_v5  ;;  %v3949_v9 = vsel %vm3488_vm7, %v4353_v18, %v3307_v20 }
 0x349   :  { %v4355_v35 = vpop.eup %4354  ;;  %4021 = vst [vmem:[%s6992_s5 + $0xd8] sm:$0xff] %v3949_v9 }
 0x34a   :  { %v4357_v11 = vpop.eup %4356  ;;  %v3946_v62 = vsel %vm3488_vm7, %v4355_v35, %v3262_v55  ;;  %v3390_v34 = vpop.f32.mrb[100].mxu1 }
 0x34b   :  { %4018 = vst [vmem:[%s6992_s5 + $0xc0] sm:$0xff] %v3946_v62  ;;  %v3947_v26 = vsel %vm3488_vm7, %v4357_v11, %v3264_v46  ;;  %v3391_v42 = vadd.f32 %v3390_v34, %v6574_v10  ;;  %v3392_v0 = vpop.f32.mrb[101].mxu1 }
 0x34c   :  { %4019 = vst [vmem:[%s6992_s5 + $0xc8] sm:$0xff] %v3947_v26  ;;  %v3393_v63 = vadd.f32 %v3392_v0, %v6574_v10  ;;  %v3394_v60 = vpop.f32.mrb[102].mxu1 }
 0x34d   :  { %v4175_v43 = vmul.f32 -1.442695, %v3391_v42  ;;  %v3395_v28 = vadd.f32 %v3394_v60, %v6576_v49  ;;  %v3347_v16 = vpop.f32.mrb[100].mxu0  ;;  %v3396_v48 = vpop.f32.mrb[103].mxu1 }
 0x34e   :  { %v4176_v24 = vmul.f32 -1.442695, %v3393_v63  ;;  %v3348_v6 = vadd.f32 %v3347_v16, %v6574_v10  ;;  %v3397_v1 = vadd.f32 %v3396_v48, %v6576_v49  ;;  %v3349_v19 = vpop.f32.mrb[101].mxu0 }
 0x34f   :  { %4358 = vpow2.f32 %v4175_v43  ;;  %4060 = vst [vmem:[%s6992_s5 + $0x210] sm:$0xff] %v3395_v28  ;;  %v3350_v50 = vadd.f32 %v3349_v19, %v6574_v10  ;;  %v3351_v52 = vpop.f32.mrb[102].mxu0 }
 0x350   :  { %4360 = vpow2.f32 %v4176_v24  ;;  %v4173_v17 = vmul.f32 -1.442695, %v3348_v6  ;;  %4061 = vst [vmem:[%s6992_s5 + $0x218] sm:$0xff] %v3397_v1  ;;  %v3352_v47 = vadd.f32 %v3351_v52, %v6576_v49  ;;  %v3353_v37 = vpop.f32.mrb[103].mxu0 }
 0x351   :  { %v4174_v27 = vmul.f32 -1.442695, %v3350_v50  ;;  %v3354_v40 = vadd.f32 %v3353_v37, %v6576_v49 }
 0x352   :  { %4362 = vpow2.f32 %v4173_v17  ;;  %4058 = vst [vmem:[%s6992_s5 + $0x200] sm:$0xff] %v3352_v47 }
 0x353   :  { %4364 = vpow2.f32 %v4174_v27  ;;  %4059 = vst [vmem:[%s6992_s5 + $0x208] sm:$0xff] %v3354_v40 }
 0x359   :  { %v4359_v14 = vpop.eup %4358 }
 0x35a   :  { %v4361_v22 = vpop.eup %4360  ;;  %v3736_v30 = vadd.f32 1.0, %v4359_v14 }
 0x35b   :  { %v3737_v15 = vadd.f32 1.0, %v4361_v22 }
 0x35c   :  { %v4363_v59 = vpop.eup %4362  ;;  %4366 = vrcp.f32 %v3736_v30 }
 0x35d   :  { %v4365_v7 = vpop.eup %4364  ;;  %4368 = vrcp.f32 %v3737_v15  ;;  %v3734_v23 = vadd.f32 1.0, %v4363_v59 }
 0x35e   :  { %v3735_v12 = vadd.f32 1.0, %v4365_v7 }
 0x35f   :  { %4370 = vrcp.f32 %v3734_v23 }
 0x360   :  { %4372 = vrcp.f32 %v3735_v12 }
 0x366   :  { %v4367_v20 = vpop.eup %4366 }
 0x367   :  { %v4369_v54 = vpop.eup %4368  ;;  %v3952_v3 = vsel %vm3488_vm7, %v4367_v20, %v3391_v42 }
 0x368   :  { %4024 = vst [vmem:[%s6992_s5 + $0xf0] sm:$0xff] %v3952_v3  ;;  %v3953_v57 = vsel %vm3488_vm7, %v4369_v54, %v3393_v63 }
 0x369   :  { %v4371_v21 = vpop.eup %4370  ;;  %4025 = vst [vmem:[%s6992_s5 + $0xf8] sm:$0xff] %v3953_v57  ;;  %v3433_v31 = vpop.f32.mrb[104].mxu0 }
 0x36a   :  { %v4373_v56 = vpop.eup %4372  ;;  %v3950_v55 = vsel %vm3488_vm7, %v4371_v21, %v3348_v6  ;;  %v3434_v36 = vadd.f32 %v3433_v31, %v6574_v10  ;;  %v3435_v61 = vpop.f32.mrb[105].mxu0 }
 0x36b   :  { %4022 = vst [vmem:[%s6992_s5 + $0xe0] sm:$0xff] %v3950_v55  ;;  %v3951_v46 = vsel %vm3488_vm7, %v4373_v56, %v3350_v50  ;;  %v3436_v53 = vadd.f32 %v3435_v61, %v6574_v10  ;;  %v3437_v41 = vpop.f32.mrb[106].mxu0 }
 0x36c   :  { %4023 = vst [vmem:[%s6992_s5 + $0xe8] sm:$0xff] %v3951_v46  ;;  %v4177_v25 = vmul.f32 -1.442695, %v3434_v36  ;;  %v3438_v13 = vadd.f32 %v3437_v41, %v6576_v49  ;;  %v3439_v2 = vpop.f32.mrb[107].mxu0 }
 0x36d   :  { %v4178_v8 = vmul.f32 -1.442695, %v3436_v53  ;;  %v3440_v51 = vadd.f32 %v3439_v2, %v6576_v49  ;;  %v3476_v58 = vpop.f32.mrb[104].mxu1 }
 0x36e   :  { %4374 = vpow2.f32 %v4177_v25  ;;  %4062 = vst [vmem:[%s6992_s5 + $0x220] sm:$0xff] %v3438_v13  ;;  %v3477_v45 = vadd.f32 %v3476_v58, %v6574_v10  ;;  %v3478_v32 = vpop.f32.mrb[105].mxu1 }
 0x36f   :  { %4376 = vpow2.f32 %v4178_v8  ;;  %4063 = vst [vmem:[%s6992_s5 + $0x228] sm:$0xff] %v3440_v51  ;;  %v3479_v44 = vadd.f32 %v3478_v32, %v6574_v10  ;;  %v3480_v29 = vpop.f32.mrb[106].mxu1 }
 0x370   :  { %v4179_v33 = vmul.f32 -1.442695, %v3477_v45  ;;  %v3481_v39 = vadd.f32 %v3480_v29, %v6576_v49  ;;  %v3482_v38 = vpop.f32.mrb[107].mxu1 }
 0x371   :  { %v4180_v18 = vmul.f32 -1.442695, %v3479_v44  ;;  %v3483_v5 = vadd.f32 %v3482_v38, %v6576_v49 }
 0x372   :  { %4378 = vpow2.f32 %v4179_v33  ;;  %4064 = vst [vmem:[%s6992_s5 + $0x230] sm:$0xff] %v3481_v39 }
 0x373   :  { %4380 = vpow2.f32 %v4180_v18  ;;  %4065 = vst [vmem:[%s6992_s5 + $0x238] sm:$0xff] %v3483_v5 }
 0x378   :  { %v4375_v9 = vpop.eup %4374 }
 0x379   :  { %v4377_v10 = vpop.eup %4376  ;;  %v3738_v35 = vadd.f32 1.0, %v4375_v9 }
 0x37a   :  { %v3739_v11 = vadd.f32 1.0, %v4377_v10 }
 0x37b   :  { %4382 = vrcp.f32 %v3738_v35 }
 0x37c   :  { %v4379_v62 = vpop.eup %4378  ;;  %4384 = vrcp.f32 %v3739_v11 }
 0x37d   :  { %v4381_v34 = vpop.eup %4380  ;;  %v3740_v26 = vadd.f32 1.0, %v4379_v62 }
 0x37e   :  { %v3741_v49 = vadd.f32 1.0, %v4381_v34 }
 0x37f   :  { %4386 = vrcp.f32 %v3740_v26 }
 0x380   :  { %4388 = vrcp.f32 %v3741_v49 }
 0x385   :  { %v4383_v42 = vpop.eup %4382 }
 0x386   :  { %v4385_v0 = vpop.eup %4384  ;;  %v3954_v63 = vsel %vm3488_vm7, %v4383_v42, %v3434_v36 }
 0x387   :  { %4026 = vst [vmem:[%s6992_s5 + $0x100] sm:$0xff] %v3954_v63  ;;  %v3955_v60 = vsel %vm3488_vm7, %v4385_v0, %v3436_v53 }
 0x388   :  { %4027 = vst [vmem:[%s6992_s5 + $0x108] sm:$0xff] %v3955_v60 }
 0x389   :  { %v4387_v43 = vpop.eup %4386 }
 0x38a   :  { %v4389_v28 = vpop.eup %4388  ;;  %v3956_v16 = vsel %vm3488_vm7, %v4387_v43, %v3477_v45 }
 0x38b   :  { %4028 = vst [vmem:[%s6992_s5 + $0x110] sm:$0xff] %v3956_v16  ;;  %v3957_v48 = vsel %vm3488_vm7, %v4389_v28, %v3479_v44 }
 0x38c   :  { %4029 = vst [vmem:[%s6992_s5 + $0x118] sm:$0xff] %v3957_v48 }

</bundles_post_ra>
